<compile_context>
chip_gen: v7x
topology: tpu7x:2x2x1
jax: 0.10.0
libtpu: 0.0.40
codegen_flags: <defaults>
</compile_context>

<pallas_src>
import jax
import jax.numpy as jnp
from jax.experimental import pallas as pl
from jax.experimental.pallas import tpu as pltpu


def _round_up(x, m):
    return ((x + m - 1) // m) * m


def make_encoder_gru_kernel(T, Bp, Hp, num_layers):
    """Build the fused multi-layer GRU kernel.

    Kernel ref order (all whole-array VMEM blocks):
      x_ref : (T*Bp, Din0)                      time-major flattened input
      per layer l: wx (Din_l, 3*Hp), wh (Hp, 3*Hp), bx (1, 3*Hp), bh (1, 3*Hp)
      out_ref : (T*Bp, Hp)                      last layer output (time-major)
      hid_ref : (num_layers, Bp, Hp)            final hidden state per layer
    """
    def kernel(x_ref, *refs):
        w_refs = refs[:4 * num_layers]
        out_ref = refs[4 * num_layers]
        hid_ref = refs[4 * num_layers + 1]

        cur = x_ref[...]                          # (T*Bp, Din_0)
        for layer in range(num_layers):
            wx_ref, wh_ref, bx_ref, bh_ref = w_refs[4 * layer: 4 * layer + 4]

            # Hoisted x-side projection for ALL timesteps at once: (T*Bp, 3*Hp).
            gx = jnp.dot(cur, wx_ref[...],
                         preferred_element_type=jnp.float32) + bx_ref[...]

            wh = wh_ref[...]                      # (Hp, 3*Hp)
            bh = bh_ref[...]                      # (1, 3*Hp)
            h = jnp.zeros((Bp, Hp), jnp.float32)  # vreg-carried hidden state
            hs = []
            for t in range(T):                    # static unroll (T is small)
                gxt = gx[t * Bp:(t + 1) * Bp, :]  # (Bp, 3*Hp), static slice
                gh = jnp.dot(h, wh, preferred_element_type=jnp.float32) + bh
                # PyTorch GRU gate order: (r, z, n); n uses separate b_in / b_hn.
                r = jax.nn.sigmoid(gxt[:, :Hp] + gh[:, :Hp])
                z = jax.nn.sigmoid(gxt[:, Hp:2 * Hp] + gh[:, Hp:2 * Hp])
                n = jnp.tanh(gxt[:, 2 * Hp:] + r * gh[:, 2 * Hp:])
                h = (1.0 - z) * n + z * h
                hs.append(h)
            hid_ref[layer, :, :] = h              # written once per layer
            cur = jnp.concatenate(hs, axis=0)     # (T*Bp, Hp) -> next layer input
        out_ref[...] = cur
    return kernel


def init_gru_params(key, input_size, H, num_layers):
    """Deterministic init matching PyTorch GRU shapes and U(-1/sqrt(H), 1/sqrt(H))."""
    bound = 1.0 / (H ** 0.5)
    params = []
    for layer in range(num_layers):
        din = input_size if layer == 0 else H
        key, k1, k2, k3, k4 = jax.random.split(key, 5)
        w_ih = jax.random.uniform(k1, (3 * H, din), jnp.float32, -bound, bound)
        w_hh = jax.random.uniform(k2, (3 * H, H), jnp.float32, -bound, bound)
        b_ih = jax.random.uniform(k3, (3 * H,), jnp.float32, -bound, bound)
        b_hh = jax.random.uniform(k4, (3 * H,), jnp.float32, -bound, bound)
        params.append((w_ih, w_hh, b_ih, b_hh))
    return params


def encoder_rnn_forward(x_btd, gru_params):
    """EncoderRNN.forward: (B, T, input_size) -> (output (B,T,H), hidden (L,B,H))."""
    B, T, Din = x_btd.shape
    H = gru_params[0][1].shape[1]          # w_hh: (3H, H)
    num_layers = len(gru_params)
    Hp = _round_up(H, 128)                 # lane-dense hidden dim (120 -> 128)
    Bp = _round_up(B, 8)                   # sublane-dense batch (2 -> 8)

    # Time-major, zero-pad batch, flatten to (T*Bp, Din).
    x_tm = jnp.transpose(x_btd, (1, 0, 2)).astype(jnp.float32)
    x_tm = jnp.pad(x_tm, ((0, 0), (0, Bp - B), (0, 0)))
    x_flat = x_tm.reshape(T * Bp, Din)

    kernel_inputs = [x_flat]
    for layer, (w_ih, w_hh, b_ih, b_hh) in enumerate(gru_params):
        din = w_ih.shape[1]
        din_pad = din if layer == 0 else Hp   # layer>0 input is padded hidden

        w_ir, w_iz, w_in = jnp.split(w_ih, 3, axis=0)   # each (H, din)
        w_hr, w_hz, w_hn = jnp.split(w_hh, 3, axis=0)   # each (H, H)
        b_ir, b_iz, b_in = jnp.split(b_ih, 3)
        b_hr, b_hz, b_hn = jnp.split(b_hh, 3)

        def prep_x(w):   # (H, din) -> (din_pad, Hp), zero padded
            wt = w.T
            return jnp.pad(wt, ((0, din_pad - din), (0, Hp - H)))

        def prep_h(w):   # (H, H) -> (Hp, Hp), zero padded
            wt = w.T
            return jnp.pad(wt, ((0, Hp - H), (0, Hp - H)))

        def prep_b(b):   # (H,) -> (Hp,), zero padded
            return jnp.pad(b, (0, Hp - H))

        wx = jnp.concatenate([prep_x(w_ir), prep_x(w_iz), prep_x(w_in)], axis=1)
        wh = jnp.concatenate([prep_h(w_hr), prep_h(w_hz), prep_h(w_hn)], axis=1)
        bx = jnp.concatenate([prep_b(b_ir), prep_b(b_iz), prep_b(b_in)]).reshape(1, 3 * Hp)
        bh = jnp.concatenate([prep_b(b_hr), prep_b(b_hz), prep_b(b_hn)]).reshape(1, 3 * Hp)
        kernel_inputs += [wx, wh, bx, bh]

    kernel = make_encoder_gru_kernel(T, Bp, Hp, num_layers)
    n_in = len(kernel_inputs)
    vmem_spec = pl.BlockSpec(memory_space=pltpu.MemorySpace.VMEM)

    out_flat, hid_pad = pl.pallas_call(
        kernel,
        out_shape=(jax.ShapeDtypeStruct((T * Bp, Hp), jnp.float32),
                   jax.ShapeDtypeStruct((num_layers, Bp, Hp), jnp.float32)),
        in_specs=[vmem_spec] * n_in,
        out_specs=(vmem_spec, vmem_spec),
    )(*kernel_inputs)

    out = out_flat.reshape(T, Bp, Hp)[:, :B, :H]     # drop padding
    output = jnp.transpose(out, (1, 0, 2))           # (B, T, H), batch_first
    hidden = hid_pad[:, :B, :H]                      # (num_layers, B, H)
    return output, hidden


def gru_reference(x_btd, gru_params):
    """Pure-JAX reference replicating torch.nn.GRU(batch_first=True) semantics."""
    B, T, _ = x_btd.shape
    x = x_btd.astype(jnp.float32)
    hiddens = []
    for (w_ih, w_hh, b_ih, b_hh) in gru_params:
        H = w_hh.shape[1]
        h = jnp.zeros((B, H), jnp.float32)
        outs = []
        for t in range(T):
            xt = x[:, t, :]
            gi = xt @ w_ih.T + b_ih
            gh = h @ w_hh.T + b_hh
            i_r, i_z, i_n = jnp.split(gi, 3, axis=1)
            h_r, h_z, h_n = jnp.split(gh, 3, axis=1)
            r = jax.nn.sigmoid(i_r + h_r)
            z = jax.nn.sigmoid(i_z + h_z)
            n = jnp.tanh(i_n + r * h_n)
            h = (1.0 - z) * n + z * h
            outs.append(h)
        x = jnp.stack(outs, axis=1)
        hiddens.append(h)
    return x, jnp.stack(hiddens, axis=0)


if __name__ == "__main__":
    # EncoderRNN(input_size=16, hidden_size=4, num_layers=2)
    # => GRU hidden dim H = 4 * 30 = 120.
    input_size, hidden_size, num_layers = 16, 4, 2
    B, T = 2, 8
    H = hidden_size * 30

    key = jax.random.PRNGKey(0)
    key, kx = jax.random.split(key)
    x = jax.random.normal(kx, (B, T, input_size), jnp.float32)
    params = init_gru_params(key, input_size, H, num_layers)

    output, hidden = encoder_rnn_forward(x, params)
    output, hidden = jax.block_until_ready((output, hidden))

    ref_out, ref_hidden = gru_reference(x, params)
    assert output.shape == (B, T, H)
    assert hidden.shape == (num_layers, B, H)
    assert jnp.allclose(output, ref_out, atol=1e-4, rtol=1e-4)
    assert jnp.allclose(hidden, ref_hidden, atol=1e-4, rtol=1e-4)
    print("KERNEL_OK")
</pallas_src>

<mosaic_0001>
module attributes {stable_mosaic.version = 11 : i64} {
  func.func @kernel(%arg0: memref<64x16xf32, #tpu.memory_space<vmem>>, %arg1: memref<16x384xf32, #tpu.memory_space<vmem>>, %arg2: memref<128x384xf32, #tpu.memory_space<vmem>>, %arg3: memref<1x384xf32, #tpu.memory_space<vmem>>, %arg4: memref<1x384xf32, #tpu.memory_space<vmem>>, %arg5: memref<128x384xf32, #tpu.memory_space<vmem>>, %arg6: memref<128x384xf32, #tpu.memory_space<vmem>>, %arg7: memref<1x384xf32, #tpu.memory_space<vmem>>, %arg8: memref<1x384xf32, #tpu.memory_space<vmem>>, %arg9: memref<64x128xf32, #tpu.memory_space<vmem>>, %arg10: memref<2x8x128xf32, #tpu.memory_space<vmem>>) attributes {dimension_semantics = [], scalar_prefetch = 0 : i64, scratch_operands = 0 : i64, tpu.core_type = #tpu.core_type<tc>} {
    %c0 = arith.constant 0 : index
    %c0_0 = arith.constant 0 : index
    %0 = vector.load %arg0[%c0, %c0_0] : memref<64x16xf32, #tpu.memory_space<vmem>>, vector<64x16xf32>
    %c0_1 = arith.constant 0 : index
    %c0_2 = arith.constant 0 : index
    %1 = vector.load %arg1[%c0_1, %c0_2] : memref<16x384xf32, #tpu.memory_space<vmem>>, vector<16x384xf32>
    %cst = arith.constant dense<0.000000e+00> : vector<64x384xf32>
    %2 = tpu.matmul %0, %1, %cst {dimension_numbers = #tpu.dot_dimension_numbers<[1], [0], [0], [1], [0, 0, 1, 1], [], []>} : vector<64x16xf32>, vector<16x384xf32>, vector<64x384xf32> -> vector<64x384xf32>
    %c0_3 = arith.constant 0 : index
    %c0_4 = arith.constant 0 : index
    %3 = vector.load %arg3[%c0_3, %c0_4] : memref<1x384xf32, #tpu.memory_space<vmem>>, vector<1x384xf32>
    %4 = vector.broadcast %3 : vector<1x384xf32> to vector<64x384xf32>
    %5 = arith.addf %2, %4 : vector<64x384xf32>
    %c0_5 = arith.constant 0 : index
    %c0_6 = arith.constant 0 : index
    %6 = vector.load %arg2[%c0_5, %c0_6] : memref<128x384xf32, #tpu.memory_space<vmem>>, vector<128x384xf32>
    %c0_7 = arith.constant 0 : index
    %c0_8 = arith.constant 0 : index
    %7 = vector.load %arg4[%c0_7, %c0_8] : memref<1x384xf32, #tpu.memory_space<vmem>>, vector<1x384xf32>
    %cst_9 = arith.constant 0.000000e+00 : f32
    %8 = vector.broadcast %cst_9 : f32 to vector<8x128xf32>
    %9 = vector.extract_strided_slice %5 {offsets = [0, 0], sizes = [8, 384], strides = [1, 1]} : vector<64x384xf32> to vector<8x384xf32>
    %cst_10 = arith.constant dense<0.000000e+00> : vector<8x384xf32>
    %10 = tpu.matmul %8, %6, %cst_10 {dimension_numbers = #tpu.dot_dimension_numbers<[1], [0], [0], [1], [0, 0, 1, 1], [], []>} : vector<8x128xf32>, vector<128x384xf32>, vector<8x384xf32> -> vector<8x384xf32>
    %11 = vector.broadcast %7 : vector<1x384xf32> to vector<8x384xf32>
    %12 = arith.addf %10, %11 : vector<8x384xf32>
    %13 = vector.extract_strided_slice %9 {offsets = [0, 0], sizes = [8, 128], strides = [1, 1]} : vector<8x384xf32> to vector<8x128xf32>
    %14 = vector.extract_strided_slice %12 {offsets = [0, 0], sizes = [8, 128], strides = [1, 1]} : vector<8x384xf32> to vector<8x128xf32>
    %15 = arith.addf %13, %14 : vector<8x128xf32>
    %16 = arith.negf %15 : vector<8x128xf32>
    %17 = math.exp %16 : vector<8x128xf32>
    %cst_11 = arith.constant 1.000000e+00 : f32
    %18 = vector.broadcast %cst_11 : f32 to vector<8x128xf32>
    %19 = arith.addf %18, %17 : vector<8x128xf32>
    %20 = arith.divf %18, %19 : vector<8x128xf32>
    %21 = vector.extract_strided_slice %9 {offsets = [0, 128], sizes = [8, 128], strides = [1, 1]} : vector<8x384xf32> to vector<8x128xf32>
    %22 = vector.extract_strided_slice %12 {offsets = [0, 128], sizes = [8, 128], strides = [1, 1]} : vector<8x384xf32> to vector<8x128xf32>
    %23 = arith.addf %21, %22 : vector<8x128xf32>
    %24 = arith.negf %23 : vector<8x128xf32>
    %25 = math.exp %24 : vector<8x128xf32>
    %cst_12 = arith.constant 1.000000e+00 : f32
    %26 = vector.broadcast %cst_12 : f32 to vector<8x128xf32>
    %27 = arith.addf %26, %25 : vector<8x128xf32>
    %28 = arith.divf %26, %27 : vector<8x128xf32>
    %29 = vector.extract_strided_slice %9 {offsets = [0, 256], sizes = [8, 128], strides = [1, 1]} : vector<8x384xf32> to vector<8x128xf32>
    %30 = vector.extract_strided_slice %12 {offsets = [0, 256], sizes = [8, 128], strides = [1, 1]} : vector<8x384xf32> to vector<8x128xf32>
    %31 = arith.mulf %20, %30 : vector<8x128xf32>
    %32 = arith.addf %29, %31 : vector<8x128xf32>
    %33 = math.tanh %32 : vector<8x128xf32>
    %cst_13 = arith.constant 1.000000e+00 : f32
    %34 = vector.broadcast %cst_13 : f32 to vector<8x128xf32>
    %35 = arith.subf %34, %28 : vector<8x128xf32>
    %36 = arith.mulf %35, %33 : vector<8x128xf32>
    %37 = arith.mulf %28, %8 : vector<8x128xf32>
    %38 = arith.addf %36, %37 : vector<8x128xf32>
    %39 = vector.extract_strided_slice %5 {offsets = [8, 0], sizes = [8, 384], strides = [1, 1]} : vector<64x384xf32> to vector<8x384xf32>
    %cst_14 = arith.constant dense<0.000000e+00> : vector<8x384xf32>
    %40 = tpu.matmul %38, %6, %cst_14 {dimension_numbers = #tpu.dot_dimension_numbers<[1], [0], [0], [1], [0, 0, 1, 1], [], []>} : vector<8x128xf32>, vector<128x384xf32>, vector<8x384xf32> -> vector<8x384xf32>
    %41 = vector.broadcast %7 : vector<1x384xf32> to vector<8x384xf32>
    %42 = arith.addf %40, %41 : vector<8x384xf32>
    %43 = vector.extract_strided_slice %39 {offsets = [0, 0], sizes = [8, 128], strides = [1, 1]} : vector<8x384xf32> to vector<8x128xf32>
    %44 = vector.extract_strided_slice %42 {offsets = [0, 0], sizes = [8, 128], strides = [1, 1]} : vector<8x384xf32> to vector<8x128xf32>
    %45 = arith.addf %43, %44 : vector<8x128xf32>
    %46 = arith.negf %45 : vector<8x128xf32>
    %47 = math.exp %46 : vector<8x128xf32>
    %cst_15 = arith.constant 1.000000e+00 : f32
    %48 = vector.broadcast %cst_15 : f32 to vector<8x128xf32>
    %49 = arith.addf %48, %47 : vector<8x128xf32>
    %50 = arith.divf %48, %49 : vector<8x128xf32>
    %51 = vector.extract_strided_slice %39 {offsets = [0, 128], sizes = [8, 128], strides = [1, 1]} : vector<8x384xf32> to vector<8x128xf32>
    %52 = vector.extract_strided_slice %42 {offsets = [0, 128], sizes = [8, 128], strides = [1, 1]} : vector<8x384xf32> to vector<8x128xf32>
    %53 = arith.addf %51, %52 : vector<8x128xf32>
    %54 = arith.negf %53 : vector<8x128xf32>
    %55 = math.exp %54 : vector<8x128xf32>
    %cst_16 = arith.constant 1.000000e+00 : f32
    %56 = vector.broadcast %cst_16 : f32 to vector<8x128xf32>
    %57 = arith.addf %56, %55 : vector<8x128xf32>
    %58 = arith.divf %56, %57 : vector<8x128xf32>
    %59 = vector.extract_strided_slice %39 {offsets = [0, 256], sizes = [8, 128], strides = [1, 1]} : vector<8x384xf32> to vector<8x128xf32>
    %60 = vector.extract_strided_slice %42 {offsets = [0, 256], sizes = [8, 128], strides = [1, 1]} : vector<8x384xf32> to vector<8x128xf32>
    %61 = arith.mulf %50, %60 : vector<8x128xf32>
    %62 = arith.addf %59, %61 : vector<8x128xf32>
    %63 = math.tanh %62 : vector<8x128xf32>
    %cst_17 = arith.constant 1.000000e+00 : f32
    %64 = vector.broadcast %cst_17 : f32 to vector<8x128xf32>
    %65 = arith.subf %64, %58 : vector<8x128xf32>
    %66 = arith.mulf %65, %63 : vector<8x128xf32>
    %67 = arith.mulf %58, %38 : vector<8x128xf32>
    %68 = arith.addf %66, %67 : vector<8x128xf32>
    %69 = vector.extract_strided_slice %5 {offsets = [16, 0], sizes = [8, 384], strides = [1, 1]} : vector<64x384xf32> to vector<8x384xf32>
    %cst_18 = arith.constant dense<0.000000e+00> : vector<8x384xf32>
    %70 = tpu.matmul %68, %6, %cst_18 {dimension_numbers = #tpu.dot_dimension_numbers<[1], [0], [0], [1], [0, 0, 1, 1], [], []>} : vector<8x128xf32>, vector<128x384xf32>, vector<8x384xf32> -> vector<8x384xf32>
    %71 = vector.broadcast %7 : vector<1x384xf32> to vector<8x384xf32>
    %72 = arith.addf %70, %71 : vector<8x384xf32>
    %73 = vector.extract_strided_slice %69 {offsets = [0, 0], sizes = [8, 128], strides = [1, 1]} : vector<8x384xf32> to vector<8x128xf32>
    %74 = vector.extract_strided_slice %72 {offsets = [0, 0], sizes = [8, 128], strides = [1, 1]} : vector<8x384xf32> to vector<8x128xf32>
    %75 = arith.addf %73, %74 : vector<8x128xf32>
    %76 = arith.negf %75 : vector<8x128xf32>
    %77 = math.exp %76 : vector<8x128xf32>
    %cst_19 = arith.constant 1.000000e+00 : f32
    %78 = vector.broadcast %cst_19 : f32 to vector<8x128xf32>
    %79 = arith.addf %78, %77 : vector<8x128xf32>
    %80 = arith.divf %78, %79 : vector<8x128xf32>
    %81 = vector.extract_strided_slice %69 {offsets = [0, 128], sizes = [8, 128], strides = [1, 1]} : vector<8x384xf32> to vector<8x128xf32>
    %82 = vector.extract_strided_slice %72 {offsets = [0, 128], sizes = [8, 128], strides = [1, 1]} : vector<8x384xf32> to vector<8x128xf32>
    %83 = arith.addf %81, %82 : vector<8x128xf32>
    %84 = arith.negf %83 : vector<8x128xf32>
    %85 = math.exp %84 : vector<8x128xf32>
    %cst_20 = arith.constant 1.000000e+00 : f32
    %86 = vector.broadcast %cst_20 : f32 to vector<8x128xf32>
    %87 = arith.addf %86, %85 : vector<8x128xf32>
    %88 = arith.divf %86, %87 : vector<8x128xf32>
    %89 = vector.extract_strided_slice %69 {offsets = [0, 256], sizes = [8, 128], strides = [1, 1]} : vector<8x384xf32> to vector<8x128xf32>
    %90 = vector.extract_strided_slice %72 {offsets = [0, 256], sizes = [8, 128], strides = [1, 1]} : vector<8x384xf32> to vector<8x128xf32>
    %91 = arith.mulf %80, %90 : vector<8x128xf32>
    %92 = arith.addf %89, %91 : vector<8x128xf32>
    %93 = math.tanh %92 : vector<8x128xf32>
    %cst_21 = arith.constant 1.000000e+00 : f32
    %94 = vector.broadcast %cst_21 : f32 to vector<8x128xf32>
    %95 = arith.subf %94, %88 : vector<8x128xf32>
    %96 = arith.mulf %95, %93 : vector<8x128xf32>
    %97 = arith.mulf %88, %68 : vector<8x128xf32>
    %98 = arith.addf %96, %97 : vector<8x128xf32>
    %99 = vector.extract_strided_slice %5 {offsets = [24, 0], sizes = [8, 384], strides = [1, 1]} : vector<64x384xf32> to vector<8x384xf32>
    %cst_22 = arith.constant dense<0.000000e+00> : vector<8x384xf32>
    %100 = tpu.matmul %98, %6, %cst_22 {dimension_numbers = #tpu.dot_dimension_numbers<[1], [0], [0], [1], [0, 0, 1, 1], [], []>} : vector<8x128xf32>, vector<128x384xf32>, vector<8x384xf32> -> vector<8x384xf32>
    %101 = vector.broadcast %7 : vector<1x384xf32> to vector<8x384xf32>
    %102 = arith.addf %100, %101 : vector<8x384xf32>
    %103 = vector.extract_strided_slice %99 {offsets = [0, 0], sizes = [8, 128], strides = [1, 1]} : vector<8x384xf32> to vector<8x128xf32>
    %104 = vector.extract_strided_slice %102 {offsets = [0, 0], sizes = [8, 128], strides = [1, 1]} : vector<8x384xf32> to vector<8x128xf32>
    %105 = arith.addf %103, %104 : vector<8x128xf32>
    %106 = arith.negf %105 : vector<8x128xf32>
    %107 = math.exp %106 : vector<8x128xf32>
    %cst_23 = arith.constant 1.000000e+00 : f32
    %108 = vector.broadcast %cst_23 : f32 to vector<8x128xf32>
    %109 = arith.addf %108, %107 : vector<8x128xf32>
    %110 = arith.divf %108, %109 : vector<8x128xf32>
    %111 = vector.extract_strided_slice %99 {offsets = [0, 128], sizes = [8, 128], strides = [1, 1]} : vector<8x384xf32> to vector<8x128xf32>
    %112 = vector.extract_strided_slice %102 {offsets = [0, 128], sizes = [8, 128], strides = [1, 1]} : vector<8x384xf32> to vector<8x128xf32>
    %113 = arith.addf %111, %112 : vector<8x128xf32>
    %114 = arith.negf %113 : vector<8x128xf32>
    %115 = math.exp %114 : vector<8x128xf32>
    %cst_24 = arith.constant 1.000000e+00 : f32
    %116 = vector.broadcast %cst_24 : f32 to vector<8x128xf32>
    %117 = arith.addf %116, %115 : vector<8x128xf32>
    %118 = arith.divf %116, %117 : vector<8x128xf32>
    %119 = vector.extract_strided_slice %99 {offsets = [0, 256], sizes = [8, 128], strides = [1, 1]} : vector<8x384xf32> to vector<8x128xf32>
    %120 = vector.extract_strided_slice %102 {offsets = [0, 256], sizes = [8, 128], strides = [1, 1]} : vector<8x384xf32> to vector<8x128xf32>
    %121 = arith.mulf %110, %120 : vector<8x128xf32>
    %122 = arith.addf %119, %121 : vector<8x128xf32>
    %123 = math.tanh %122 : vector<8x128xf32>
    %cst_25 = arith.constant 1.000000e+00 : f32
    %124 = vector.broadcast %cst_25 : f32 to vector<8x128xf32>
    %125 = arith.subf %124, %118 : vector<8x128xf32>
    %126 = arith.mulf %125, %123 : vector<8x128xf32>
    %127 = arith.mulf %118, %98 : vector<8x128xf32>
    %128 = arith.addf %126, %127 : vector<8x128xf32>
    %129 = vector.extract_strided_slice %5 {offsets = [32, 0], sizes = [8, 384], strides = [1, 1]} : vector<64x384xf32> to vector<8x384xf32>
    %cst_26 = arith.constant dense<0.000000e+00> : vector<8x384xf32>
    %130 = tpu.matmul %128, %6, %cst_26 {dimension_numbers = #tpu.dot_dimension_numbers<[1], [0], [0], [1], [0, 0, 1, 1], [], []>} : vector<8x128xf32>, vector<128x384xf32>, vector<8x384xf32> -> vector<8x384xf32>
    %131 = vector.broadcast %7 : vector<1x384xf32> to vector<8x384xf32>
    %132 = arith.addf %130, %131 : vector<8x384xf32>
    %133 = vector.extract_strided_slice %129 {offsets = [0, 0], sizes = [8, 128], strides = [1, 1]} : vector<8x384xf32> to vector<8x128xf32>
    %134 = vector.extract_strided_slice %132 {offsets = [0, 0], sizes = [8, 128], strides = [1, 1]} : vector<8x384xf32> to vector<8x128xf32>
    %135 = arith.addf %133, %134 : vector<8x128xf32>
    %136 = arith.negf %135 : vector<8x128xf32>
    %137 = math.exp %136 : vector<8x128xf32>
    %cst_27 = arith.constant 1.000000e+00 : f32
    %138 = vector.broadcast %cst_27 : f32 to vector<8x128xf32>
    %139 = arith.addf %138, %137 : vector<8x128xf32>
    %140 = arith.divf %138, %139 : vector<8x128xf32>
    %141 = vector.extract_strided_slice %129 {offsets = [0, 128], sizes = [8, 128], strides = [1, 1]} : vector<8x384xf32> to vector<8x128xf32>
    %142 = vector.extract_strided_slice %132 {offsets = [0, 128], sizes = [8, 128], strides = [1, 1]} : vector<8x384xf32> to vector<8x128xf32>
    %143 = arith.addf %141, %142 : vector<8x128xf32>
    %144 = arith.negf %143 : vector<8x128xf32>
    %145 = math.exp %144 : vector<8x128xf32>
    %cst_28 = arith.constant 1.000000e+00 : f32
    %146 = vector.broadcast %cst_28 : f32 to vector<8x128xf32>
    %147 = arith.addf %146, %145 : vector<8x128xf32>
    %148 = arith.divf %146, %147 : vector<8x128xf32>
    %149 = vector.extract_strided_slice %129 {offsets = [0, 256], sizes = [8, 128], strides = [1, 1]} : vector<8x384xf32> to vector<8x128xf32>
    %150 = vector.extract_strided_slice %132 {offsets = [0, 256], sizes = [8, 128], strides = [1, 1]} : vector<8x384xf32> to vector<8x128xf32>
    %151 = arith.mulf %140, %150 : vector<8x128xf32>
    %152 = arith.addf %149, %151 : vector<8x128xf32>
    %153 = math.tanh %152 : vector<8x128xf32>
    %cst_29 = arith.constant 1.000000e+00 : f32
    %154 = vector.broadcast %cst_29 : f32 to vector<8x128xf32>
    %155 = arith.subf %154, %148 : vector<8x128xf32>
    %156 = arith.mulf %155, %153 : vector<8x128xf32>
    %157 = arith.mulf %148, %128 : vector<8x128xf32>
    %158 = arith.addf %156, %157 : vector<8x128xf32>
    %159 = vector.extract_strided_slice %5 {offsets = [40, 0], sizes = [8, 384], strides = [1, 1]} : vector<64x384xf32> to vector<8x384xf32>
    %cst_30 = arith.constant dense<0.000000e+00> : vector<8x384xf32>
    %160 = tpu.matmul %158, %6, %cst_30 {dimension_numbers = #tpu.dot_dimension_numbers<[1], [0], [0], [1], [0, 0, 1, 1], [], []>} : vector<8x128xf32>, vector<128x384xf32>, vector<8x384xf32> -> vector<8x384xf32>
    %161 = vector.broadcast %7 : vector<1x384xf32> to vector<8x384xf32>
    %162 = arith.addf %160, %161 : vector<8x384xf32>
    %163 = vector.extract_strided_slice %159 {offsets = [0, 0], sizes = [8, 128], strides = [1, 1]} : vector<8x384xf32> to vector<8x128xf32>
    %164 = vector.extract_strided_slice %162 {offsets = [0, 0], sizes = [8, 128], strides = [1, 1]} : vector<8x384xf32> to vector<8x128xf32>
    %165 = arith.addf %163, %164 : vector<8x128xf32>
    %166 = arith.negf %165 : vector<8x128xf32>
    %167 = math.exp %166 : vector<8x128xf32>
    %cst_31 = arith.constant 1.000000e+00 : f32
    %168 = vector.broadcast %cst_31 : f32 to vector<8x128xf32>
    %169 = arith.addf %168, %167 : vector<8x128xf32>
    %170 = arith.divf %168, %169 : vector<8x128xf32>
    %171 = vector.extract_strided_slice %159 {offsets = [0, 128], sizes = [8, 128], strides = [1, 1]} : vector<8x384xf32> to vector<8x128xf32>
    %172 = vector.extract_strided_slice %162 {offsets = [0, 128], sizes = [8, 128], strides = [1, 1]} : vector<8x384xf32> to vector<8x128xf32>
    %173 = arith.addf %171, %172 : vector<8x128xf32>
    %174 = arith.negf %173 : vector<8x128xf32>
    %175 = math.exp %174 : vector<8x128xf32>
    %cst_32 = arith.constant 1.000000e+00 : f32
    %176 = vector.broadcast %cst_32 : f32 to vector<8x128xf32>
    %177 = arith.addf %176, %175 : vector<8x128xf32>
    %178 = arith.divf %176, %177 : vector<8x128xf32>
    %179 = vector.extract_strided_slice %159 {offsets = [0, 256], sizes = [8, 128], strides = [1, 1]} : vector<8x384xf32> to vector<8x128xf32>
    %180 = vector.extract_strided_slice %162 {offsets = [0, 256], sizes = [8, 128], strides = [1, 1]} : vector<8x384xf32> to vector<8x128xf32>
    %181 = arith.mulf %170, %180 : vector<8x128xf32>
    %182 = arith.addf %179, %181 : vector<8x128xf32>
    %183 = math.tanh %182 : vector<8x128xf32>
    %cst_33 = arith.constant 1.000000e+00 : f32
    %184 = vector.broadcast %cst_33 : f32 to vector<8x128xf32>
    %185 = arith.subf %184, %178 : vector<8x128xf32>
    %186 = arith.mulf %185, %183 : vector<8x128xf32>
    %187 = arith.mulf %178, %158 : vector<8x128xf32>
    %188 = arith.addf %186, %187 : vector<8x128xf32>
    %189 = vector.extract_strided_slice %5 {offsets = [48, 0], sizes = [8, 384], strides = [1, 1]} : vector<64x384xf32> to vector<8x384xf32>
    %cst_34 = arith.constant dense<0.000000e+00> : vector<8x384xf32>
    %190 = tpu.matmul %188, %6, %cst_34 {dimension_numbers = #tpu.dot_dimension_numbers<[1], [0], [0], [1], [0, 0, 1, 1], [], []>} : vector<8x128xf32>, vector<128x384xf32>, vector<8x384xf32> -> vector<8x384xf32>
    %191 = vector.broadcast %7 : vector<1x384xf32> to vector<8x384xf32>
    %192 = arith.addf %190, %191 : vector<8x384xf32>
    %193 = vector.extract_strided_slice %189 {offsets = [0, 0], sizes = [8, 128], strides = [1, 1]} : vector<8x384xf32> to vector<8x128xf32>
    %194 = vector.extract_strided_slice %192 {offsets = [0, 0], sizes = [8, 128], strides = [1, 1]} : vector<8x384xf32> to vector<8x128xf32>
    %195 = arith.addf %193, %194 : vector<8x128xf32>
    %196 = arith.negf %195 : vector<8x128xf32>
    %197 = math.exp %196 : vector<8x128xf32>
    %cst_35 = arith.constant 1.000000e+00 : f32
    %198 = vector.broadcast %cst_35 : f32 to vector<8x128xf32>
    %199 = arith.addf %198, %197 : vector<8x128xf32>
    %200 = arith.divf %198, %199 : vector<8x128xf32>
    %201 = vector.extract_strided_slice %189 {offsets = [0, 128], sizes = [8, 128], strides = [1, 1]} : vector<8x384xf32> to vector<8x128xf32>
    %202 = vector.extract_strided_slice %192 {offsets = [0, 128], sizes = [8, 128], strides = [1, 1]} : vector<8x384xf32> to vector<8x128xf32>
    %203 = arith.addf %201, %202 : vector<8x128xf32>
    %204 = arith.negf %203 : vector<8x128xf32>
    %205 = math.exp %204 : vector<8x128xf32>
    %cst_36 = arith.constant 1.000000e+00 : f32
    %206 = vector.broadcast %cst_36 : f32 to vector<8x128xf32>
    %207 = arith.addf %206, %205 : vector<8x128xf32>
    %208 = arith.divf %206, %207 : vector<8x128xf32>
    %209 = vector.extract_strided_slice %189 {offsets = [0, 256], sizes = [8, 128], strides = [1, 1]} : vector<8x384xf32> to vector<8x128xf32>
    %210 = vector.extract_strided_slice %192 {offsets = [0, 256], sizes = [8, 128], strides = [1, 1]} : vector<8x384xf32> to vector<8x128xf32>
    %211 = arith.mulf %200, %210 : vector<8x128xf32>
    %212 = arith.addf %209, %211 : vector<8x128xf32>
    %213 = math.tanh %212 : vector<8x128xf32>
    %cst_37 = arith.constant 1.000000e+00 : f32
    %214 = vector.broadcast %cst_37 : f32 to vector<8x128xf32>
    %215 = arith.subf %214, %208 : vector<8x128xf32>
    %216 = arith.mulf %215, %213 : vector<8x128xf32>
    %217 = arith.mulf %208, %188 : vector<8x128xf32>
    %218 = arith.addf %216, %217 : vector<8x128xf32>
    %219 = vector.extract_strided_slice %5 {offsets = [56, 0], sizes = [8, 384], strides = [1, 1]} : vector<64x384xf32> to vector<8x384xf32>
    %cst_38 = arith.constant dense<0.000000e+00> : vector<8x384xf32>
    %220 = tpu.matmul %218, %6, %cst_38 {dimension_numbers = #tpu.dot_dimension_numbers<[1], [0], [0], [1], [0, 0, 1, 1], [], []>} : vector<8x128xf32>, vector<128x384xf32>, vector<8x384xf32> -> vector<8x384xf32>
    %221 = vector.broadcast %7 : vector<1x384xf32> to vector<8x384xf32>
    %222 = arith.addf %220, %221 : vector<8x384xf32>
    %223 = vector.extract_strided_slice %219 {offsets = [0, 0], sizes = [8, 128], strides = [1, 1]} : vector<8x384xf32> to vector<8x128xf32>
    %224 = vector.extract_strided_slice %222 {offsets = [0, 0], sizes = [8, 128], strides = [1, 1]} : vector<8x384xf32> to vector<8x128xf32>
    %225 = arith.addf %223, %224 : vector<8x128xf32>
    %226 = arith.negf %225 : vector<8x128xf32>
    %227 = math.exp %226 : vector<8x128xf32>
    %cst_39 = arith.constant 1.000000e+00 : f32
    %228 = vector.broadcast %cst_39 : f32 to vector<8x128xf32>
    %229 = arith.addf %228, %227 : vector<8x128xf32>
    %230 = arith.divf %228, %229 : vector<8x128xf32>
    %231 = vector.extract_strided_slice %219 {offsets = [0, 128], sizes = [8, 128], strides = [1, 1]} : vector<8x384xf32> to vector<8x128xf32>
    %232 = vector.extract_strided_slice %222 {offsets = [0, 128], sizes = [8, 128], strides = [1, 1]} : vector<8x384xf32> to vector<8x128xf32>
    %233 = arith.addf %231, %232 : vector<8x128xf32>
    %234 = arith.negf %233 : vector<8x128xf32>
    %235 = math.exp %234 : vector<8x128xf32>
    %cst_40 = arith.constant 1.000000e+00 : f32
    %236 = vector.broadcast %cst_40 : f32 to vector<8x128xf32>
    %237 = arith.addf %236, %235 : vector<8x128xf32>
    %238 = arith.divf %236, %237 : vector<8x128xf32>
    %239 = vector.extract_strided_slice %219 {offsets = [0, 256], sizes = [8, 128], strides = [1, 1]} : vector<8x384xf32> to vector<8x128xf32>
    %240 = vector.extract_strided_slice %222 {offsets = [0, 256], sizes = [8, 128], strides = [1, 1]} : vector<8x384xf32> to vector<8x128xf32>
    %241 = arith.mulf %230, %240 : vector<8x128xf32>
    %242 = arith.addf %239, %241 : vector<8x128xf32>
    %243 = math.tanh %242 : vector<8x128xf32>
    %cst_41 = arith.constant 1.000000e+00 : f32
    %244 = vector.broadcast %cst_41 : f32 to vector<8x128xf32>
    %245 = arith.subf %244, %238 : vector<8x128xf32>
    %246 = arith.mulf %245, %243 : vector<8x128xf32>
    %247 = arith.mulf %238, %218 : vector<8x128xf32>
    %248 = arith.addf %246, %247 : vector<8x128xf32>
    %c0_42 = arith.constant 0 : index
    %c0_43 = arith.constant 0 : index
    %c0_44 = arith.constant 0 : index
    %249 = vector.load %arg10[%c0_42, %c0_43, %c0_44] : memref<2x8x128xf32, #tpu.memory_space<vmem>>, vector<1x8x128xf32>
    %250 = vector.shape_cast %249 : vector<1x8x128xf32> to vector<8x128xf32>
    %251 = vector.shape_cast %248 : vector<8x128xf32> to vector<1x8x128xf32>
    tpu.vector_store %arg10[%c0_42, %c0_43, %c0_44], %251 {strides = array<i32>} : memref<2x8x128xf32, #tpu.memory_space<vmem>>, vector<1x8x128xf32>,
    %252 = tpu.concatenate %38, %68, %98, %128, %158, %188, %218, %248 in 0 : vector<8x128xf32>, vector<8x128xf32>, vector<8x128xf32>, vector<8x128xf32>, vector<8x128xf32>, vector<8x128xf32>, vector<8x128xf32>, vector<8x128xf32> -> vector<64x128xf32>
    %c0_45 = arith.constant 0 : index
    %c0_46 = arith.constant 0 : index
    %253 = vector.load %arg5[%c0_45, %c0_46] : memref<128x384xf32, #tpu.memory_space<vmem>>, vector<128x384xf32>
    %cst_47 = arith.constant dense<0.000000e+00> : vector<64x384xf32>
    %254 = tpu.matmul %252, %253, %cst_47 {dimension_numbers = #tpu.dot_dimension_numbers<[1], [0], [0], [1], [0, 0, 1, 1], [], []>} : vector<64x128xf32>, vector<128x384xf32>, vector<64x384xf32> -> vector<64x384xf32>
    %c0_48 = arith.constant 0 : index
    %c0_49 = arith.constant 0 : index
    %255 = vector.load %arg7[%c0_48, %c0_49] : memref<1x384xf32, #tpu.memory_space<vmem>>, vector<1x384xf32>
    %256 = vector.broadcast %255 : vector<1x384xf32> to vector<64x384xf32>
    %257 = arith.addf %254, %256 : vector<64x384xf32>
    %c0_50 = arith.constant 0 : index
    %c0_51 = arith.constant 0 : index
    %258 = vector.load %arg6[%c0_50, %c0_51] : memref<128x384xf32, #tpu.memory_space<vmem>>, vector<128x384xf32>
    %c0_52 = arith.constant 0 : index
    %c0_53 = arith.constant 0 : index
    %259 = vector.load %arg8[%c0_52, %c0_53] : memref<1x384xf32, #tpu.memory_space<vmem>>, vector<1x384xf32>
    %cst_54 = arith.constant 0.000000e+00 : f32
    %260 = vector.broadcast %cst_54 : f32 to vector<8x128xf32>
    %261 = vector.extract_strided_slice %257 {offsets = [0, 0], sizes = [8, 384], strides = [1, 1]} : vector<64x384xf32> to vector<8x384xf32>
    %cst_55 = arith.constant dense<0.000000e+00> : vector<8x384xf32>
    %262 = tpu.matmul %260, %258, %cst_55 {dimension_numbers = #tpu.dot_dimension_numbers<[1], [0], [0], [1], [0, 0, 1, 1], [], []>} : vector<8x128xf32>, vector<128x384xf32>, vector<8x384xf32> -> vector<8x384xf32>
    %263 = vector.broadcast %259 : vector<1x384xf32> to vector<8x384xf32>
    %264 = arith.addf %262, %263 : vector<8x384xf32>
    %265 = vector.extract_strided_slice %261 {offsets = [0, 0], sizes = [8, 128], strides = [1, 1]} : vector<8x384xf32> to vector<8x128xf32>
    %266 = vector.extract_strided_slice %264 {offsets = [0, 0], sizes = [8, 128], strides = [1, 1]} : vector<8x384xf32> to vector<8x128xf32>
    %267 = arith.addf %265, %266 : vector<8x128xf32>
    %268 = arith.negf %267 : vector<8x128xf32>
    %269 = math.exp %268 : vector<8x128xf32>
    %cst_56 = arith.constant 1.000000e+00 : f32
    %270 = vector.broadcast %cst_56 : f32 to vector<8x128xf32>
    %271 = arith.addf %270, %269 : vector<8x128xf32>
    %272 = arith.divf %270, %271 : vector<8x128xf32>
    %273 = vector.extract_strided_slice %261 {offsets = [0, 128], sizes = [8, 128], strides = [1, 1]} : vector<8x384xf32> to vector<8x128xf32>
    %274 = vector.extract_strided_slice %264 {offsets = [0, 128], sizes = [8, 128], strides = [1, 1]} : vector<8x384xf32> to vector<8x128xf32>
    %275 = arith.addf %273, %274 : vector<8x128xf32>
    %276 = arith.negf %275 : vector<8x128xf32>
    %277 = math.exp %276 : vector<8x128xf32>
    %cst_57 = arith.constant 1.000000e+00 : f32
    %278 = vector.broadcast %cst_57 : f32 to vector<8x128xf32>
    %279 = arith.addf %278, %277 : vector<8x128xf32>
    %280 = arith.divf %278, %279 : vector<8x128xf32>
    %281 = vector.extract_strided_slice %261 {offsets = [0, 256], sizes = [8, 128], strides = [1, 1]} : vector<8x384xf32> to vector<8x128xf32>
    %282 = vector.extract_strided_slice %264 {offsets = [0, 256], sizes = [8, 128], strides = [1, 1]} : vector<8x384xf32> to vector<8x128xf32>
    %283 = arith.mulf %272, %282 : vector<8x128xf32>
    %284 = arith.addf %281, %283 : vector<8x128xf32>
    %285 = math.tanh %284 : vector<8x128xf32>
    %cst_58 = arith.constant 1.000000e+00 : f32
    %286 = vector.broadcast %cst_58 : f32 to vector<8x128xf32>
    %287 = arith.subf %286, %280 : vector<8x128xf32>
    %288 = arith.mulf %287, %285 : vector<8x128xf32>
    %289 = arith.mulf %280, %260 : vector<8x128xf32>
    %290 = arith.addf %288, %289 : vector<8x128xf32>
    %291 = vector.extract_strided_slice %257 {offsets = [8, 0], sizes = [8, 384], strides = [1, 1]} : vector<64x384xf32> to vector<8x384xf32>
    %cst_59 = arith.constant dense<0.000000e+00> : vector<8x384xf32>
    %292 = tpu.matmul %290, %258, %cst_59 {dimension_numbers = #tpu.dot_dimension_numbers<[1], [0], [0], [1], [0, 0, 1, 1], [], []>} : vector<8x128xf32>, vector<128x384xf32>, vector<8x384xf32> -> vector<8x384xf32>
    %293 = vector.broadcast %259 : vector<1x384xf32> to vector<8x384xf32>
    %294 = arith.addf %292, %293 : vector<8x384xf32>
    %295 = vector.extract_strided_slice %291 {offsets = [0, 0], sizes = [8, 128], strides = [1, 1]} : vector<8x384xf32> to vector<8x128xf32>
    %296 = vector.extract_strided_slice %294 {offsets = [0, 0], sizes = [8, 128], strides = [1, 1]} : vector<8x384xf32> to vector<8x128xf32>
    %297 = arith.addf %295, %296 : vector<8x128xf32>
    %298 = arith.negf %297 : vector<8x128xf32>
    %299 = math.exp %298 : vector<8x128xf32>
    %cst_60 = arith.constant 1.000000e+00 : f32
    %300 = vector.broadcast %cst_60 : f32 to vector<8x128xf32>
    %301 = arith.addf %300, %299 : vector<8x128xf32>
    %302 = arith.divf %300, %301 : vector<8x128xf32>
    %303 = vector.extract_strided_slice %291 {offsets = [0, 128], sizes = [8, 128], strides = [1, 1]} : vector<8x384xf32> to vector<8x128xf32>
    %304 = vector.extract_strided_slice %294 {offsets = [0, 128], sizes = [8, 128], strides = [1, 1]} : vector<8x384xf32> to vector<8x128xf32>
    %305 = arith.addf %303, %304 : vector<8x128xf32>
    %306 = arith.negf %305 : vector<8x128xf32>
    %307 = math.exp %306 : vector<8x128xf32>
    %cst_61 = arith.constant 1.000000e+00 : f32
    %308 = vector.broadcast %cst_61 : f32 to vector<8x128xf32>
    %309 = arith.addf %308, %307 : vector<8x128xf32>
    %310 = arith.divf %308, %309 : vector<8x128xf32>
    %311 = vector.extract_strided_slice %291 {offsets = [0, 256], sizes = [8, 128], strides = [1, 1]} : vector<8x384xf32> to vector<8x128xf32>
    %312 = vector.extract_strided_slice %294 {offsets = [0, 256], sizes = [8, 128], strides = [1, 1]} : vector<8x384xf32> to vector<8x128xf32>
    %313 = arith.mulf %302, %312 : vector<8x128xf32>
    %314 = arith.addf %311, %313 : vector<8x128xf32>
    %315 = math.tanh %314 : vector<8x128xf32>
    %cst_62 = arith.constant 1.000000e+00 : f32
    %316 = vector.broadcast %cst_62 : f32 to vector<8x128xf32>
    %317 = arith.subf %316, %310 : vector<8x128xf32>
    %318 = arith.mulf %317, %315 : vector<8x128xf32>
    %319 = arith.mulf %310, %290 : vector<8x128xf32>
    %320 = arith.addf %318, %319 : vector<8x128xf32>
    %321 = vector.extract_strided_slice %257 {offsets = [16, 0], sizes = [8, 384], strides = [1, 1]} : vector<64x384xf32> to vector<8x384xf32>
    %cst_63 = arith.constant dense<0.000000e+00> : vector<8x384xf32>
    %322 = tpu.matmul %320, %258, %cst_63 {dimension_numbers = #tpu.dot_dimension_numbers<[1], [0], [0], [1], [0, 0, 1, 1], [], []>} : vector<8x128xf32>, vector<128x384xf32>, vector<8x384xf32> -> vector<8x384xf32>
    %323 = vector.broadcast %259 : vector<1x384xf32> to vector<8x384xf32>
    %324 = arith.addf %322, %323 : vector<8x384xf32>
    %325 = vector.extract_strided_slice %321 {offsets = [0, 0], sizes = [8, 128], strides = [1, 1]} : vector<8x384xf32> to vector<8x128xf32>
    %326 = vector.extract_strided_slice %324 {offsets = [0, 0], sizes = [8, 128], strides = [1, 1]} : vector<8x384xf32> to vector<8x128xf32>
    %327 = arith.addf %325, %326 : vector<8x128xf32>
    %328 = arith.negf %327 : vector<8x128xf32>
    %329 = math.exp %328 : vector<8x128xf32>
    %cst_64 = arith.constant 1.000000e+00 : f32
    %330 = vector.broadcast %cst_64 : f32 to vector<8x128xf32>
    %331 = arith.addf %330, %329 : vector<8x128xf32>
    %332 = arith.divf %330, %331 : vector<8x128xf32>
    %333 = vector.extract_strided_slice %321 {offsets = [0, 128], sizes = [8, 128], strides = [1, 1]} : vector<8x384xf32> to vector<8x128xf32>
    %334 = vector.extract_strided_slice %324 {offsets = [0, 128], sizes = [8, 128], strides = [1, 1]} : vector<8x384xf32> to vector<8x128xf32>
    %335 = arith.addf %333, %334 : vector<8x128xf32>
    %336 = arith.negf %335 : vector<8x128xf32>
    %337 = math.exp %336 : vector<8x128xf32>
    %cst_65 = arith.constant 1.000000e+00 : f32
    %338 = vector.broadcast %cst_65 : f32 to vector<8x128xf32>
    %339 = arith.addf %338, %337 : vector<8x128xf32>
    %340 = arith.divf %338, %339 : vector<8x128xf32>
    %341 = vector.extract_strided_slice %321 {offsets = [0, 256], sizes = [8, 128], strides = [1, 1]} : vector<8x384xf32> to vector<8x128xf32>
    %342 = vector.extract_strided_slice %324 {offsets = [0, 256], sizes = [8, 128], strides = [1, 1]} : vector<8x384xf32> to vector<8x128xf32>
    %343 = arith.mulf %332, %342 : vector<8x128xf32>
    %344 = arith.addf %341, %343 : vector<8x128xf32>
    %345 = math.tanh %344 : vector<8x128xf32>
    %cst_66 = arith.constant 1.000000e+00 : f32
    %346 = vector.broadcast %cst_66 : f32 to vector<8x128xf32>
    %347 = arith.subf %346, %340 : vector<8x128xf32>
    %348 = arith.mulf %347, %345 : vector<8x128xf32>
    %349 = arith.mulf %340, %320 : vector<8x128xf32>
    %350 = arith.addf %348, %349 : vector<8x128xf32>
    %351 = vector.extract_strided_slice %257 {offsets = [24, 0], sizes = [8, 384], strides = [1, 1]} : vector<64x384xf32> to vector<8x384xf32>
    %cst_67 = arith.constant dense<0.000000e+00> : vector<8x384xf32>
    %352 = tpu.matmul %350, %258, %cst_67 {dimension_numbers = #tpu.dot_dimension_numbers<[1], [0], [0], [1], [0, 0, 1, 1], [], []>} : vector<8x128xf32>, vector<128x384xf32>, vector<8x384xf32> -> vector<8x384xf32>
    %353 = vector.broadcast %259 : vector<1x384xf32> to vector<8x384xf32>
    %354 = arith.addf %352, %353 : vector<8x384xf32>
    %355 = vector.extract_strided_slice %351 {offsets = [0, 0], sizes = [8, 128], strides = [1, 1]} : vector<8x384xf32> to vector<8x128xf32>
    %356 = vector.extract_strided_slice %354 {offsets = [0, 0], sizes = [8, 128], strides = [1, 1]} : vector<8x384xf32> to vector<8x128xf32>
    %357 = arith.addf %355, %356 : vector<8x128xf32>
    %358 = arith.negf %357 : vector<8x128xf32>
    %359 = math.exp %358 : vector<8x128xf32>
    %cst_68 = arith.constant 1.000000e+00 : f32
    %360 = vector.broadcast %cst_68 : f32 to vector<8x128xf32>
    %361 = arith.addf %360, %359 : vector<8x128xf32>
    %362 = arith.divf %360, %361 : vector<8x128xf32>
    %363 = vector.extract_strided_slice %351 {offsets = [0, 128], sizes = [8, 128], strides = [1, 1]} : vector<8x384xf32> to vector<8x128xf32>
    %364 = vector.extract_strided_slice %354 {offsets = [0, 128], sizes = [8, 128], strides = [1, 1]} : vector<8x384xf32> to vector<8x128xf32>
    %365 = arith.addf %363, %364 : vector<8x128xf32>
    %366 = arith.negf %365 : vector<8x128xf32>
    %367 = math.exp %366 : vector<8x128xf32>
    %cst_69 = arith.constant 1.000000e+00 : f32
    %368 = vector.broadcast %cst_69 : f32 to vector<8x128xf32>
    %369 = arith.addf %368, %367 : vector<8x128xf32>
    %370 = arith.divf %368, %369 : vector<8x128xf32>
    %371 = vector.extract_strided_slice %351 {offsets = [0, 256], sizes = [8, 128], strides = [1, 1]} : vector<8x384xf32> to vector<8x128xf32>
    %372 = vector.extract_strided_slice %354 {offsets = [0, 256], sizes = [8, 128], strides = [1, 1]} : vector<8x384xf32> to vector<8x128xf32>
    %373 = arith.mulf %362, %372 : vector<8x128xf32>
    %374 = arith.addf %371, %373 : vector<8x128xf32>
    %375 = math.tanh %374 : vector<8x128xf32>
    %cst_70 = arith.constant 1.000000e+00 : f32
    %376 = vector.broadcast %cst_70 : f32 to vector<8x128xf32>
    %377 = arith.subf %376, %370 : vector<8x128xf32>
    %378 = arith.mulf %377, %375 : vector<8x128xf32>
    %379 = arith.mulf %370, %350 : vector<8x128xf32>
    %380 = arith.addf %378, %379 : vector<8x128xf32>
    %381 = vector.extract_strided_slice %257 {offsets = [32, 0], sizes = [8, 384], strides = [1, 1]} : vector<64x384xf32> to vector<8x384xf32>
    %cst_71 = arith.constant dense<0.000000e+00> : vector<8x384xf32>
    %382 = tpu.matmul %380, %258, %cst_71 {dimension_numbers = #tpu.dot_dimension_numbers<[1], [0], [0], [1], [0, 0, 1, 1], [], []>} : vector<8x128xf32>, vector<128x384xf32>, vector<8x384xf32> -> vector<8x384xf32>
    %383 = vector.broadcast %259 : vector<1x384xf32> to vector<8x384xf32>
    %384 = arith.addf %382, %383 : vector<8x384xf32>
    %385 = vector.extract_strided_slice %381 {offsets = [0, 0], sizes = [8, 128], strides = [1, 1]} : vector<8x384xf32> to vector<8x128xf32>
    %386 = vector.extract_strided_slice %384 {offsets = [0, 0], sizes = [8, 128], strides = [1, 1]} : vector<8x384xf32> to vector<8x128xf32>
    %387 = arith.addf %385, %386 : vector<8x128xf32>
    %388 = arith.negf %387 : vector<8x128xf32>
    %389 = math.exp %388 : vector<8x128xf32>
    %cst_72 = arith.constant 1.000000e+00 : f32
    %390 = vector.broadcast %cst_72 : f32 to vector<8x128xf32>
    %391 = arith.addf %390, %389 : vector<8x128xf32>
    %392 = arith.divf %390, %391 : vector<8x128xf32>
    %393 = vector.extract_strided_slice %381 {offsets = [0, 128], sizes = [8, 128], strides = [1, 1]} : vector<8x384xf32> to vector<8x128xf32>
    %394 = vector.extract_strided_slice %384 {offsets = [0, 128], sizes = [8, 128], strides = [1, 1]} : vector<8x384xf32> to vector<8x128xf32>
    %395 = arith.addf %393, %394 : vector<8x128xf32>
    %396 = arith.negf %395 : vector<8x128xf32>
    %397 = math.exp %396 : vector<8x128xf32>
    %cst_73 = arith.constant 1.000000e+00 : f32
    %398 = vector.broadcast %cst_73 : f32 to vector<8x128xf32>
    %399 = arith.addf %398, %397 : vector<8x128xf32>
    %400 = arith.divf %398, %399 : vector<8x128xf32>
    %401 = vector.extract_strided_slice %381 {offsets = [0, 256], sizes = [8, 128], strides = [1, 1]} : vector<8x384xf32> to vector<8x128xf32>
    %402 = vector.extract_strided_slice %384 {offsets = [0, 256], sizes = [8, 128], strides = [1, 1]} : vector<8x384xf32> to vector<8x128xf32>
    %403 = arith.mulf %392, %402 : vector<8x128xf32>
    %404 = arith.addf %401, %403 : vector<8x128xf32>
    %405 = math.tanh %404 : vector<8x128xf32>
    %cst_74 = arith.constant 1.000000e+00 : f32
    %406 = vector.broadcast %cst_74 : f32 to vector<8x128xf32>
    %407 = arith.subf %406, %400 : vector<8x128xf32>
    %408 = arith.mulf %407, %405 : vector<8x128xf32>
    %409 = arith.mulf %400, %380 : vector<8x128xf32>
    %410 = arith.addf %408, %409 : vector<8x128xf32>
    %411 = vector.extract_strided_slice %257 {offsets = [40, 0], sizes = [8, 384], strides = [1, 1]} : vector<64x384xf32> to vector<8x384xf32>
    %cst_75 = arith.constant dense<0.000000e+00> : vector<8x384xf32>
    %412 = tpu.matmul %410, %258, %cst_75 {dimension_numbers = #tpu.dot_dimension_numbers<[1], [0], [0], [1], [0, 0, 1, 1], [], []>} : vector<8x128xf32>, vector<128x384xf32>, vector<8x384xf32> -> vector<8x384xf32>
    %413 = vector.broadcast %259 : vector<1x384xf32> to vector<8x384xf32>
    %414 = arith.addf %412, %413 : vector<8x384xf32>
    %415 = vector.extract_strided_slice %411 {offsets = [0, 0], sizes = [8, 128], strides = [1, 1]} : vector<8x384xf32> to vector<8x128xf32>
    %416 = vector.extract_strided_slice %414 {offsets = [0, 0], sizes = [8, 128], strides = [1, 1]} : vector<8x384xf32> to vector<8x128xf32>
    %417 = arith.addf %415, %416 : vector<8x128xf32>
    %418 = arith.negf %417 : vector<8x128xf32>
    %419 = math.exp %418 : vector<8x128xf32>
    %cst_76 = arith.constant 1.000000e+00 : f32
    %420 = vector.broadcast %cst_76 : f32 to vector<8x128xf32>
    %421 = arith.addf %420, %419 : vector<8x128xf32>
    %422 = arith.divf %420, %421 : vector<8x128xf32>
    %423 = vector.extract_strided_slice %411 {offsets = [0, 128], sizes = [8, 128], strides = [1, 1]} : vector<8x384xf32> to vector<8x128xf32>
    %424 = vector.extract_strided_slice %414 {offsets = [0, 128], sizes = [8, 128], strides = [1, 1]} : vector<8x384xf32> to vector<8x128xf32>
    %425 = arith.addf %423, %424 : vector<8x128xf32>
    %426 = arith.negf %425 : vector<8x128xf32>
    %427 = math.exp %426 : vector<8x128xf32>
    %cst_77 = arith.constant 1.000000e+00 : f32
    %428 = vector.broadcast %cst_77 : f32 to vector<8x128xf32>
    %429 = arith.addf %428, %427 : vector<8x128xf32>
    %430 = arith.divf %428, %429 : vector<8x128xf32>
    %431 = vector.extract_strided_slice %411 {offsets = [0, 256], sizes = [8, 128], strides = [1, 1]} : vector<8x384xf32> to vector<8x128xf32>
    %432 = vector.extract_strided_slice %414 {offsets = [0, 256], sizes = [8, 128], strides = [1, 1]} : vector<8x384xf32> to vector<8x128xf32>
    %433 = arith.mulf %422, %432 : vector<8x128xf32>
    %434 = arith.addf %431, %433 : vector<8x128xf32>
    %435 = math.tanh %434 : vector<8x128xf32>
    %cst_78 = arith.constant 1.000000e+00 : f32
    %436 = vector.broadcast %cst_78 : f32 to vector<8x128xf32>
    %437 = arith.subf %436, %430 : vector<8x128xf32>
    %438 = arith.mulf %437, %435 : vector<8x128xf32>
    %439 = arith.mulf %430, %410 : vector<8x128xf32>
    %440 = arith.addf %438, %439 : vector<8x128xf32>
    %441 = vector.extract_strided_slice %257 {offsets = [48, 0], sizes = [8, 384], strides = [1, 1]} : vector<64x384xf32> to vector<8x384xf32>
    %cst_79 = arith.constant dense<0.000000e+00> : vector<8x384xf32>
    %442 = tpu.matmul %440, %258, %cst_79 {dimension_numbers = #tpu.dot_dimension_numbers<[1], [0], [0], [1], [0, 0, 1, 1], [], []>} : vector<8x128xf32>, vector<128x384xf32>, vector<8x384xf32> -> vector<8x384xf32>
    %443 = vector.broadcast %259 : vector<1x384xf32> to vector<8x384xf32>
    %444 = arith.addf %442, %443 : vector<8x384xf32>
    %445 = vector.extract_strided_slice %441 {offsets = [0, 0], sizes = [8, 128], strides = [1, 1]} : vector<8x384xf32> to vector<8x128xf32>
    %446 = vector.extract_strided_slice %444 {offsets = [0, 0], sizes = [8, 128], strides = [1, 1]} : vector<8x384xf32> to vector<8x128xf32>
    %447 = arith.addf %445, %446 : vector<8x128xf32>
    %448 = arith.negf %447 : vector<8x128xf32>
    %449 = math.exp %448 : vector<8x128xf32>
    %cst_80 = arith.constant 1.000000e+00 : f32
    %450 = vector.broadcast %cst_80 : f32 to vector<8x128xf32>
    %451 = arith.addf %450, %449 : vector<8x128xf32>
    %452 = arith.divf %450, %451 : vector<8x128xf32>
    %453 = vector.extract_strided_slice %441 {offsets = [0, 128], sizes = [8, 128], strides = [1, 1]} : vector<8x384xf32> to vector<8x128xf32>
    %454 = vector.extract_strided_slice %444 {offsets = [0, 128], sizes = [8, 128], strides = [1, 1]} : vector<8x384xf32> to vector<8x128xf32>
    %455 = arith.addf %453, %454 : vector<8x128xf32>
    %456 = arith.negf %455 : vector<8x128xf32>
    %457 = math.exp %456 : vector<8x128xf32>
    %cst_81 = arith.constant 1.000000e+00 : f32
    %458 = vector.broadcast %cst_81 : f32 to vector<8x128xf32>
    %459 = arith.addf %458, %457 : vector<8x128xf32>
    %460 = arith.divf %458, %459 : vector<8x128xf32>
    %461 = vector.extract_strided_slice %441 {offsets = [0, 256], sizes = [8, 128], strides = [1, 1]} : vector<8x384xf32> to vector<8x128xf32>
    %462 = vector.extract_strided_slice %444 {offsets = [0, 256], sizes = [8, 128], strides = [1, 1]} : vector<8x384xf32> to vector<8x128xf32>
    %463 = arith.mulf %452, %462 : vector<8x128xf32>
    %464 = arith.addf %461, %463 : vector<8x128xf32>
    %465 = math.tanh %464 : vector<8x128xf32>
    %cst_82 = arith.constant 1.000000e+00 : f32
    %466 = vector.broadcast %cst_82 : f32 to vector<8x128xf32>
    %467 = arith.subf %466, %460 : vector<8x128xf32>
    %468 = arith.mulf %467, %465 : vector<8x128xf32>
    %469 = arith.mulf %460, %440 : vector<8x128xf32>
    %470 = arith.addf %468, %469 : vector<8x128xf32>
    %471 = vector.extract_strided_slice %257 {offsets = [56, 0], sizes = [8, 384], strides = [1, 1]} : vector<64x384xf32> to vector<8x384xf32>
    %cst_83 = arith.constant dense<0.000000e+00> : vector<8x384xf32>
    %472 = tpu.matmul %470, %258, %cst_83 {dimension_numbers = #tpu.dot_dimension_numbers<[1], [0], [0], [1], [0, 0, 1, 1], [], []>} : vector<8x128xf32>, vector<128x384xf32>, vector<8x384xf32> -> vector<8x384xf32>
    %473 = vector.broadcast %259 : vector<1x384xf32> to vector<8x384xf32>
    %474 = arith.addf %472, %473 : vector<8x384xf32>
    %475 = vector.extract_strided_slice %471 {offsets = [0, 0], sizes = [8, 128], strides = [1, 1]} : vector<8x384xf32> to vector<8x128xf32>
    %476 = vector.extract_strided_slice %474 {offsets = [0, 0], sizes = [8, 128], strides = [1, 1]} : vector<8x384xf32> to vector<8x128xf32>
    %477 = arith.addf %475, %476 : vector<8x128xf32>
    %478 = arith.negf %477 : vector<8x128xf32>
    %479 = math.exp %478 : vector<8x128xf32>
    %cst_84 = arith.constant 1.000000e+00 : f32
    %480 = vector.broadcast %cst_84 : f32 to vector<8x128xf32>
    %481 = arith.addf %480, %479 : vector<8x128xf32>
    %482 = arith.divf %480, %481 : vector<8x128xf32>
    %483 = vector.extract_strided_slice %471 {offsets = [0, 128], sizes = [8, 128], strides = [1, 1]} : vector<8x384xf32> to vector<8x128xf32>
    %484 = vector.extract_strided_slice %474 {offsets = [0, 128], sizes = [8, 128], strides = [1, 1]} : vector<8x384xf32> to vector<8x128xf32>
    %485 = arith.addf %483, %484 : vector<8x128xf32>
    %486 = arith.negf %485 : vector<8x128xf32>
    %487 = math.exp %486 : vector<8x128xf32>
    %cst_85 = arith.constant 1.000000e+00 : f32
    %488 = vector.broadcast %cst_85 : f32 to vector<8x128xf32>
    %489 = arith.addf %488, %487 : vector<8x128xf32>
    %490 = arith.divf %488, %489 : vector<8x128xf32>
    %491 = vector.extract_strided_slice %471 {offsets = [0, 256], sizes = [8, 128], strides = [1, 1]} : vector<8x384xf32> to vector<8x128xf32>
    %492 = vector.extract_strided_slice %474 {offsets = [0, 256], sizes = [8, 128], strides = [1, 1]} : vector<8x384xf32> to vector<8x128xf32>
    %493 = arith.mulf %482, %492 : vector<8x128xf32>
    %494 = arith.addf %491, %493 : vector<8x128xf32>
    %495 = math.tanh %494 : vector<8x128xf32>
    %cst_86 = arith.constant 1.000000e+00 : f32
    %496 = vector.broadcast %cst_86 : f32 to vector<8x128xf32>
    %497 = arith.subf %496, %490 : vector<8x128xf32>
    %498 = arith.mulf %497, %495 : vector<8x128xf32>
    %499 = arith.mulf %490, %470 : vector<8x128xf32>
    %500 = arith.addf %498, %499 : vector<8x128xf32>
    %c1 = arith.constant 1 : index
    %c0_87 = arith.constant 0 : index
    %c0_88 = arith.constant 0 : index
    %501 = vector.load %arg10[%c1, %c0_87, %c0_88] : memref<2x8x128xf32, #tpu.memory_space<vmem>>, vector<1x8x128xf32>
    %502 = vector.shape_cast %501 : vector<1x8x128xf32> to vector<8x128xf32>
    %503 = vector.shape_cast %500 : vector<8x128xf32> to vector<1x8x128xf32>
    tpu.vector_store %arg10[%c1, %c0_87, %c0_88], %503 {strides = array<i32>} : memref<2x8x128xf32, #tpu.memory_space<vmem>>, vector<1x8x128xf32>,
    %504 = tpu.concatenate %290, %320, %350, %380, %410, %440, %470, %500 in 0 : vector<8x128xf32>, vector<8x128xf32>, vector<8x128xf32>, vector<8x128xf32>, vector<8x128xf32>, vector<8x128xf32>, vector<8x128xf32>, vector<8x128xf32> -> vector<64x128xf32>
    %c0_89 = arith.constant 0 : index
    %c0_90 = arith.constant 0 : index
    %505 = vector.load %arg9[%c0_89, %c0_90] : memref<64x128xf32, #tpu.memory_space<vmem>>, vector<64x128xf32>
    tpu.vector_store %arg9[%c0_89, %c0_90], %504 {strides = array<i32>} : memref<64x128xf32, #tpu.memory_space<vmem>>, vector<64x128xf32>,
    return
  }
}

</mosaic_0001>

<bundles_post_ra>
// kernel: tpu_custom_call.1
= control target key start
LH: loop header
LB: loop body
LE: loop exit
PB: predicated region body
PF: predicated region fallthrough
CT: control target
= control target key end

     0   :  { %16 = vsyncpa [#allocation3], 0  ;;  %s6837_s0 = inlined_call_operand.vmem [shape: f32[64,16], index: 0, kind: input, shape index: {}]   ;;  %s6838_s1 = inlined_call_operand.vmem [shape: f32[16,384], index: 1, kind: input, shape index: {}]   ;;  %s6839_s2 = inlined_call_operand.hbm [shape: f32[128,384], index: 2, kind: input, shape index: {}]   ;;  %s6840_s3 = inlined_call_operand.vmem [shape: f32[1,384], index: 3, kind: input, shape index: {}]   ;;  %s6841_s4 = inlined_call_operand.vmem [shape: f32[1,384], index: 4, kind: input, shape index: {}]   ;;  %s6842_s5 = inlined_call_operand.hbm [shape: f32[128,384], index: 5, kind: input, shape index: {}]   ;;  %s6843_s6 = inlined_call_operand.hbm [shape: f32[128,384], index: 6, kind: input, shape index: {}]   ;;  %s6844_s7 = inlined_call_operand.vmem [shape: f32[1,384], index: 7, kind: input, shape index: {}]   ;;  %s6845_s8 = inlined_call_operand.vmem [shape: f32[1,384], index: 8, kind: input, shape index: {}]   ;;  %s6846_s9 = inlined_call_operand.hbm [shape: f32[64,128], index: 9, kind: output, shape index: {0}]   ;;  %s6847_s10 = inlined_call_operand.hbm [shape: f32[2,8,128], index: 10, kind: output, shape index: {1}]  }
   0x1   :  { %17 = vsyncpa [#allocation6], 0 }
   0x2   :  { %18 = vsyncpa [#allocation4], 0 }
   0x3   :  { %19 = vsyncpa [#allocation10], 0  ;;  %s5729_s13 = smov [#allocation5]   ;;  %s5730_s15 = smov [#allocation2]  }
   0x4   :  { %s45_s14 = sshll.u32 %s5729_s13, 4  ;;  %s29_s16 = sshll.u32 %s5730_s15, 4  ;;  %s46_s14 = int_to_ptr.vmem [resolvable:$true] %s45_s14  ;;  %s5796_s16 = int_to_ptr.vmem [resolvable:$true] %s29_s16 }
   0x5   :  { %s5611_s19 = scalar_lea.hbm %s6842_s5, 6144 }
   0x6   :  { %p5612_p0 = scmp.ne.s32.totalorder %s6842_s5, %s5611_s19  ;;  %p5615_p1 = scmp.lt.u32.totalorder %s5611_s19, %s6842_s5 }
   0x8   :  { %p5617_p2 = pnand %p5615_p1, %p5612_p0 }
   0xa   :  { %5620 = shalt.err (!%p5617_p2)
}
   0xb   :  { %s5621_s24 = scalar_lea.vmem %s46_s14, 6144  ;;  %p5626_p4 = scmp.lt.s32.totalorder %s46_s14, %s46_s14 }
   0xc   :  { %p5622_p3 = scmp.ne.s32.totalorder %s46_s14, %s5621_s24  ;;  %p5627_p5 = scmp.lt.s32.totalorder %s5621_s24, %s5621_s24 }
   0xe   :  { %p5628_p6 = por %p5627_p5, %p5626_p4 }
  0x10   :  { %p5629_p7 = pnand %p5628_p6, %p5622_p3 }
  0x12   :  { %5632 = shalt.err (!%p5629_p7)
}
  0x13   :  { %s5731_s25 = smov 384   ;;  %s5732_s26 = smov 24  }
  0x14   :  { %51 = dma.hbm_to_vmem [thread:$0]  %s6842_s5, 6144, %s46_s14, [#allocation6], %s5731_s25, %s5731_s25, %s5732_s26  }
  0x15   :  { %s5633_s11 = scalar_lea.hbm %s6839_s2, 6144 }
  0x16   :  { %p5634_p8 = scmp.ne.s32.totalorder %s6839_s2, %s5633_s11  ;;  %p5637_p9 = scmp.lt.u32.totalorder %s5633_s11, %s6839_s2 }
  0x18   :  { %p5639_p10 = pnand %p5637_p9, %p5634_p8 }
  0x1a   :  { %5642 = shalt.err (!%p5639_p10)
}
  0x1b   :  { %s5643_s18 = scalar_lea.vmem %s5796_s16, 6144  ;;  %p5648_p12 = scmp.lt.s32.totalorder %s5796_s16, %s5796_s16 }
  0x1c   :  { %p5644_p11 = scmp.ne.s32.totalorder %s5796_s16, %s5643_s18  ;;  %p5649_p13 = scmp.lt.s32.totalorder %s5643_s18, %s5643_s18 }
  0x1e   :  { %p5650_p0 = por %p5649_p13, %p5648_p12 }
  0x20   :  { %p5651_p1 = pnand %p5650_p0, %p5644_p11 }
  0x22   :  { %5654 = shalt.err (!%p5651_p1)
}
  0x23   :  { %35 = dma.hbm_to_vmem [thread:$0]  %s6839_s2, 6144, %s5796_s16, [#allocation3], %s5731_s25, %s5731_s25, %s5732_s26  }
  0x24   :  { %s5733_s19 = smov [#allocation7]   ;;  %s5655_s23 = scalar_lea.hbm %s6843_s6, 6144 }
  0x25   :  { %s57_s20 = sshll.u32 %s5733_s19, 4  ;;  %p5656_p2 = scmp.ne.s32.totalorder %s6843_s6, %s5655_s23  ;;  %s58_s20 = int_to_ptr.vmem [resolvable:$true] %s57_s20 }
  0x26   :  { %p5659_p3 = scmp.lt.u32.totalorder %s5655_s23, %s6843_s6 }
  0x28   :  { %p5661_p4 = pnand %p5659_p3, %p5656_p2 }
  0x2a   :  { %5664 = shalt.err (!%p5661_p4)
}
  0x2b   :  { %s5665_s30 = scalar_lea.vmem %s58_s20, 6144  ;;  %p5670_p6 = scmp.lt.s32.totalorder %s58_s20, %s58_s20 }
  0x2c   :  { %p5666_p5 = scmp.ne.s32.totalorder %s58_s20, %s5665_s30  ;;  %p5671_p7 = scmp.lt.s32.totalorder %s5665_s30, %s5665_s30 }
  0x2e   :  { %p5672_p8 = por %p5671_p7, %p5670_p6 }
  0x30   :  { %p5673_p9 = pnand %p5672_p8, %p5666_p5 }
  0x32   :  { %5676 = shalt.err (!%p5673_p9)
}
  0x33   :  { %63 = dma.hbm_to_vmem [thread:$0]  %s6843_s6, 6144, %s58_s20, [#allocation6], %s5731_s25, %s5731_s25, %s5732_s26  }
  0x34   :  { %5721 = dma.done.wait [#allocation3], 6144  }
  0x35   :  { %5722 = vsyncadd [#allocation3], 4294961152 }
  0x36   :  { %5723 = dma.done.wait [#allocation6], 12288  }
  0x37   :  { %5724 = vsyncadd [#allocation6], 4294955008  ;;  %v5734_v0 = vmov 0.0   ;;  %v86_v1 = vld [vmem:[%s6838_s1 + $0x8] sm:$0xff]  ;;  %v89_v2 = vld [vmem:[%s6838_s1 + $0x20] sm:$0xff]  ;;  %vm108_vm0 = vcmask 130048  }
  0x38   :  { %197 = vmatprep.mubr.f32.mxu0 %v5734_v0  ;;  %v85_v3 = vld [vmem:[%s6838_s1] sm:$0xff]  ;;  %v4375_v4 = vpack.c.bf16 %v89_v2, %v86_v1  ;;  %v88_v5 = vld [vmem:[%s6838_s1 + $0x18] sm:$0xff]  ;;  %v355_v9 = vld [vmem:[#allocation2 + $0x20] sm:$0xff]  ;;  %v5735_v48 = vmov 0.0|0.0   ;;  %vm5736_vm1 = vmmov 0   ;;  %s5738_s5 = smov [#allocation9]  }
  0x39   :  { %v77_v6 = vld [vmem:[%s6837_s0] sm:$0xff]  ;;  %v352_v7 = vld [vmem:[#allocation2 + $0x8] sm:$0xff]  ;;  %v4377_v8 = vpack.c.bf16 %v88_v5, %v85_v3  ;;  %v351_v10 = vld [vmem:[#allocation2] sm:$0xff]  ;;  %s3384_s14 = sshll.u32 %s5738_s5, 4  ;;  %s6806_s14 = int_to_ptr.vmem [resolvable:$true] %s3384_s14 }
  0x3a   :  { %v354_v11 = vld [vmem:[#allocation2 + $0x18] sm:$0xff]  ;;  %3759 = vmatprep.mubr.msk.f32.mxu1 %vm108_vm0, %v77_v6  ;;  %4376 = vmatprep.subr.bf16.mxu0 %v4375_v4  ;;  %v5865_v12 = vpack.c.bf16 %v355_v9, %v352_v7  ;;  %v361_v14 = vld [vmem:[#allocation2 + $0x50] sm:$0xff]  ;;  %v360_v18 = vld [vmem:[#allocation2 + $0x48] sm:$0xff] }
  0x3b   :  { %v358_v13 = vld [vmem:[#allocation2 + $0x38] sm:$0xff]  ;;  %4378 = vmatpush1.bf16.msra.mxu0 %v4377_v8  ;;  %v5867_v15 = vpack.c.bf16 %v354_v11, %v351_v10  ;;  %v357_v17 = vld [vmem:[#allocation2 + $0x30] sm:$0xff]  ;;  %v364_v19 = vld [vmem:[#allocation2 + $0x68] sm:$0xff] }
  0x3c   :  { %4384 = vmatprep.subr.bf16.mxu0 %v5865_v12  ;;  %v5870_v16 = vpack.c.bf16 %v361_v14, %v358_v13  ;;  %v367_v20 = vld [vmem:[#allocation2 + $0x80] sm:$0xff]  ;;  %v78_v21 = vld [vmem:[%s6837_s0 + $0x8] sm:$0xff]  ;;  %v5878_v22 = vpack.c.bf16 %v360_v18, %v357_v17  ;;  %v373_v27 = vld [vmem:[#allocation2 + $0xb0] sm:$0xff] }
  0x3d   :  { %v5881_v23 = vpack.c.bf16 %v367_v20, %v364_v19  ;;  %v363_v24 = vld [vmem:[#allocation2 + $0x60] sm:$0xff]  ;;  %v366_v25 = vld [vmem:[#allocation2 + $0x78] sm:$0xff]  ;;  %v369_v34 = vld [vmem:[#allocation2 + $0x90] sm:$0xff] }
  0x3e   :  { %3401 = vmatmul.mubr.msk.f32.vlgmr.msra.gmra.mrb[0].mxu0 %vm108_vm0, %v77_v6  ;;  %v370_v26 = vld [vmem:[#allocation2 + $0x98] sm:$0xff]  ;;  %v87_v28 = vld [vmem:[%s6838_s1 + $0x10] sm:$0xff]  ;;  %v5895_v31 = vpack.c.bf16 %v366_v25, %v363_v24  ;;  %v372_v35 = vld [vmem:[#allocation2 + $0xa8] sm:$0xff] }
  0x3f   :  { %4386 = vmatpush1.bf16.msra.mxu0 %v5867_v15  ;;  %203 = vmatprep.mubr.f32.mxu0 %v5734_v0  ;;  %v90_v29 = vld [vmem:[%s6838_s1 + $0x28] sm:$0xff]  ;;  %v79_v30 = vld [vmem:[%s6837_s0 + $0x10] sm:$0xff]  ;;  %v5898_v33 = vpack.c.bf16 %v373_v27, %v370_v26  ;;  %v353_v36 = vld [vmem:[#allocation2 + $0x10] sm:$0xff]  ;;  %v5908_v42 = vpack.c.bf16 %v372_v35, %v369_v34  ;;  %v93_v35 = vlaneseq }
  0x40   :  { %4388 = vmatprep.subr.bf16.mxu0 %v5870_v16  ;;  %v4379_v32 = vpack.c.bf16 %v90_v29, %v87_v28  ;;  %v376_v37 = vld [vmem:[#allocation2 + $0xc8] sm:$0xff]  ;;  %v379_v38 = vld [vmem:[#allocation2 + $0xe0] sm:$0xff]  ;;  %v362_v44 = vld [vmem:[#allocation2 + $0x58] sm:$0xff] }
  0x41   :  { %v356_v39 = vld [vmem:[#allocation2 + $0x28] sm:$0xff]  ;;  %v359_v43 = vld [vmem:[#allocation2 + $0x40] sm:$0xff]  ;;  %v5911_v45 = vpack.c.bf16 %v379_v38, %v376_v37  ;;  %v378_v47 = vld [vmem:[#allocation2 + $0xd8] sm:$0xff] }
  0x42   :  { %3402 = vmatmul.mubr.msk.f32.gmra.mrb[2].mxu0 %vm108_vm0, %v78_v21  ;;  %4380 = vmatprep.subr.bf16.mxu1 %v4379_v32  ;;  %v5901_v40 = vpack.c.bf16 %v356_v39, %v353_v36  ;;  %v80_v41 = vld [vmem:[%s6837_s0 + $0x18] sm:$0xff]  ;;  %v375_v46 = vld [vmem:[#allocation2 + $0xc0] sm:$0xff]  ;;  %v382_v49 = vld [vmem:[#allocation2 + $0xf8] sm:$0xff]  ;;  %v5917_v51 = vpack.c.bf16 %v362_v44, %v359_v43  ;;  %v94_v36 = vshrl.u32 %v93_v35, 7 }
  0x43   :  { %4390 = vmatpush1.bf16.msra.mxu0 %v5878_v22  ;;  %209 = vmatprep.mubr.f32.mxu0 %v5734_v0  ;;  %v385_v50 = vld [vmem:[#allocation2 + $0x110] sm:$0xff]  ;;  %v5924_v53 = vpack.c.bf16 %v378_v47, %v375_v46  ;;  %v368_v55 = vld [vmem:[#allocation2 + $0x88] sm:$0xff]  ;;  %v391_v60 = vld [vmem:[#allocation2 + $0x140] sm:$0xff] }
  0x44   :  { %4392 = vmatprep.subr.bf16.mxu0 %v5881_v23  ;;  %4382 = vmatpush3.bf16.msra.mxu1 %v4379_v32  ;;  %v81_v52 = vld [vmem:[%s6837_s0 + $0x20] sm:$0xff]  ;;  %v5927_v56 = vpack.c.bf16 %v385_v50, %v382_v49  ;;  %v384_v58 = vld [vmem:[#allocation2 + $0x108] sm:$0xff]  ;;  %v82_v62 = vld [vmem:[%s6837_s0 + $0x28] sm:$0xff]  ;;  %v6036_v37 = vsub.s32 2, %v94_v36  ;;  %v6046_v50 = vsub.s32 0, %v94_v36 }
  0x45   :  { %4415 = vmatprep.subr.bf16.mxu1 %v5735_v48  ;;  %v365_v54 = vld [vmem:[#allocation2 + $0x70] sm:$0xff]  ;;  %v388_v59 = vld [vmem:[#allocation2 + $0x128] sm:$0xff]  ;;  %v371_v1 = vld [vmem:[#allocation2 + $0xa0] sm:$0xff] }
  0x46   :  { %3403 = vmatmul.mubr.msk.f32.gmra.mrb[4].mxu0 %vm108_vm0, %v79_v30  ;;  %v381_v57 = vld [vmem:[#allocation2 + $0xf0] sm:$0xff]  ;;  %v5933_v61 = vpack.c.bf16 %v368_v55, %v365_v54  ;;  %v374_v2 = vld [vmem:[#allocation2 + $0xb8] sm:$0xff]  ;;  %v5943_v3 = vpack.c.bf16 %v391_v60, %v388_v59  ;;  %v387_v4 = vld [vmem:[#allocation2 + $0x120] sm:$0xff]  ;;  %v6053_v55 = vsub.s32 1, %v94_v36 }
  0x47   :  { %4394 = vmatpush1.bf16.msra.mxu0 %v5895_v31  ;;  %215 = vmatprep.mubr.f32.mxu0 %v5734_v0  ;;  %v5940_v63 = vpack.c.bf16 %v384_v58, %v381_v57  ;;  %v390_v5 = vld [vmem:[#allocation2 + $0x138] sm:$0xff]  ;;  %v397_v7 = vld [vmem:[#allocation2 + $0x170] sm:$0xff]  ;;  %v5949_v8 = vpack.c.bf16 %v374_v2, %v371_v1  ;;  %v83_v9 = vld [vmem:[%s6837_s0 + $0x30] sm:$0xff] }
  0x48   :  { %4396 = vmatprep.subr.bf16.mxu0 %v5898_v33  ;;  %3760 = vmatmul.mubr.msk.f32.vlgmr.msra.gmra.mrb[0].mxu1 %vm108_vm0, %v78_v21  ;;  %v394_v6 = vld [vmem:[#allocation2 + $0x158] sm:$0xff]  ;;  %v5956_v10 = vpack.c.bf16 %v390_v5, %v387_v4  ;;  %v377_v11 = vld [vmem:[#allocation2 + $0xd0] sm:$0xff]  ;;  %v380_v13 = vld [vmem:[#allocation2 + $0xe8] sm:$0xff] }
  0x49   :  { %4417 = vmatpush3.bf16.msra.mxu1 %v5901_v40  ;;  %3762 = vmatprep.mubr.msk.f32.mxu1 %vm108_vm0, %v79_v30  ;;  %v5959_v14 = vpack.c.bf16 %v397_v7, %v394_v6  ;;  %v393_v17 = vld [vmem:[#allocation2 + $0x150] sm:$0xff]  ;;  %v396_v18 = vld [vmem:[#allocation2 + $0x168] sm:$0xff]  ;;  %v5965_v19 = vpack.c.bf16 %v380_v13, %v377_v11  ;;  %v383_v24 = vld [vmem:[#allocation2 + $0x100] sm:$0xff] }
  0x4a   :  { %3404 = vmatmul.mubr.msk.f32.gmra.mrb[6].mxu0 %vm108_vm0, %v80_v41  ;;  %4418 = vmatprep.subr.bf16.mxu1 %v5735_v48  ;;  %v84_v20 = vld [vmem:[%s6837_s0 + $0x38] sm:$0xff]  ;;  %v5972_v21 = vpack.c.bf16 %v396_v18, %v393_v17  ;;  %v386_v25 = vld [vmem:[#allocation2 + $0x118] sm:$0xff]  ;;  %v389_v27 = vld [vmem:[#allocation2 + $0x130] sm:$0xff] }
  0x4b   :  { %4398 = vmatpush1.bf16.msra.mxu0 %v5908_v42  ;;  %221 = vmatprep.mubr.f32.mxu0 %v5734_v0  ;;  %v5979_v26 = vpack.c.bf16 %v386_v25, %v383_v24  ;;  %v392_v28 = vld [vmem:[#allocation2 + $0x148] sm:$0xff]  ;;  %v395_v30 = vld [vmem:[#allocation2 + $0x160] sm:$0xff]  ;;  %v398_v32 = vld [vmem:[#allocation2 + $0x178] sm:$0xff] }
  0x4c   :  { %4400 = vmatprep.subr.bf16.mxu0 %v5911_v45  ;;  %3763 = vmatmul.mubr.msk.f32.gmra.mrb[2].mxu1 %vm108_vm0, %v80_v41  ;;  %v5989_v29 = vpack.c.bf16 %v392_v28, %v389_v27  ;;  %v5998_v34 = vpack.c.bf16 %v398_v32, %v395_v30  ;;  %v91_v38 = vld [vmem:[%s6840_s3] sm:$0x7] }
  0x4d   :  { %4420 = vmatpush3.bf16.msra.mxu1 %v5917_v51  ;;  %3765 = vmatprep.mubr.msk.f32.mxu1 %vm108_vm0, %v81_v52  ;;  %v104_v39 = vrot.slane %v91_v38, %v6036_v37  ;;  %v399_v54 = vld [vmem:[%s6841_s4] sm:$0x7]  ;;  %v96_v57 = vrot.slane %v91_v38, %v6046_v50  ;;  %v100_v60 = vrot.slane %v91_v38, %v6053_v55 }
  0x4e   :  { %3405 = vmatmul.mubr.msk.f32.gmra.mrb[8].mxu0 %vm108_vm0, %v81_v52  ;;  %4421 = vmatprep.subr.bf16.mxu1 %v5735_v48  ;;  %v404_v58 = vrot.slane %v399_v54, %v6046_v50  ;;  %v6074_v36 = vrot.slane %v399_v54, %v6036_v37 }
  0x4f   :  { %4402 = vmatpush1.bf16.msra.mxu0 %v5924_v53  ;;  %227 = vmatprep.mubr.f32.mxu0 %v5734_v0 }
  0x50   :  { %4404 = vmatprep.subr.bf16.mxu0 %v5927_v56  ;;  %3766 = vmatmul.mubr.msk.f32.gmra.mrb[4].mxu1 %vm108_vm0, %v82_v62  ;;  %v6061_v4 = vadd.f32 %v404_v58, %v96_v57 }
  0x51   :  { %4423 = vmatpush3.bf16.msra.mxu1 %v5933_v61  ;;  %3768 = vmatprep.mubr.msk.f32.mxu1 %vm108_vm0, %v83_v9 }
  0x52   :  { %3406 = vmatmul.mubr.msk.f32.gmra.mrb[10].mxu0 %vm108_vm0, %v82_v62  ;;  %4424 = vmatprep.subr.bf16.mxu1 %v5735_v48  ;;  %v408_v62 = vrot.slane %v399_v54, %v6053_v55 }
  0x53   :  { %4406 = vmatpush1.bf16.msra.mxu0 %v5940_v63  ;;  %233 = vmatprep.mubr.f32.mxu0 %v5734_v0 }
  0x54   :  { %4408 = vmatprep.subr.bf16.mxu0 %v5943_v3  ;;  %3769 = vmatmul.mubr.msk.f32.gmra.mrb[6].mxu1 %vm108_vm0, %v84_v20 }
  0x55   :  { %4426 = vmatpush3.bf16.msra.mxu1 %v5949_v8  ;;  %3803 = vmatprep.mubr.msk.f32.mxu1 %vm5736_vm1, %v5734_v0 }
  0x56   :  { %3407 = vmatmul.mubr.msk.f32.gmra.mrb[12].mxu0 %vm108_vm0, %v83_v9  ;;  %4427 = vmatprep.subr.bf16.mxu1 %v5735_v48  ;;  %v6065_v9 = vadd.f32 %v408_v62, %v100_v60 }
  0x57   :  { %4410 = vmatpush1.bf16.msra.mxu0 %v5956_v10  ;;  %239 = vmatprep.mubr.f32.mxu0 %v5734_v0 }
  0x58   :  { %4412 = vmatprep.subr.bf16.mxu0 %v5959_v14 }
  0x59   :  { %4429 = vmatpush3.bf16.msra.mxu1 %v5965_v19 }
  0x5a   :  { %3408 = vmatmul.mubr.msk.f32.gmra.mrb[14].mxu0 %vm108_vm0, %v84_v20  ;;  %4430 = vmatprep.subr.bf16.mxu1 %v5735_v48 }
  0x5b   :  { %4414 = vmatpush1.bf16.msra.mxu0 %v5972_v21  ;;  %480 = vmatprep.mubr.f32.mxu0 %v5734_v0 }
  0x5c   :  { %4440 = vmatprep.subr.bf16.mxu0 %v5865_v12 }
  0x5d   :  { %4432 = vmatpush3.bf16.msra.mxu1 %v5979_v26 }
  0x5e   :  { %481 = vmatmul.mubr.f32.vlgmr.msra.gmra.mrb[0].mxu0 %v5734_v0  ;;  %4433 = vmatprep.subr.bf16.mxu1 %v5735_v48 }
  0x5f   :  { %4442 = vmatpush1.bf16.msra.mxu0 %v5867_v15  ;;  %642 = vmatprep.mubr.f32.mxu0 %v5734_v0 }
  0x60   :  { %4444 = vmatprep.subr.bf16.mxu0 %v5870_v16 }
  0x61   :  { %4435 = vmatpush3.bf16.msra.mxu1 %v5989_v29 }
  0x62   :  { %4436 = vmatprep.subr.bf16.mxu1 %v5735_v48 }
  0x63   :  { %4446 = vmatpush1.bf16.msra.mxu0 %v5878_v22 }
  0x64   :  { %4448 = vmatprep.subr.bf16.mxu0 %v5881_v23 }
  0x65   :  { %4438 = vmatpush3.bf16.msra.mxu1 %v5998_v34 }
  0x66   :  { %4471 = vmatprep.subr.bf16.mxu1 %v5735_v48 }
  0x67   :  { %4450 = vmatpush1.bf16.msra.mxu0 %v5895_v31 }
  0x68   :  { %3804 = vmatmul.mubr.f32.vlgmr.msra.gmra.mrb[8].mxu1 %v5734_v0  ;;  %4452 = vmatprep.subr.bf16.mxu0 %v5898_v33 }
  0x69   :  { %4473 = vmatpush3.bf16.msra.mxu1 %v5901_v40  ;;  %3838 = vmatprep.mubr.msk.f32.mxu1 %vm5736_vm1, %v5734_v0 }
  0x6a   :  { %4474 = vmatprep.subr.bf16.mxu1 %v5735_v48 }
  0x6b   :  { %4454 = vmatpush1.bf16.msra.mxu0 %v5908_v42 }
  0x6c   :  { %4456 = vmatprep.subr.bf16.mxu0 %v5911_v45 }
  0x6d   :  { %4476 = vmatpush3.bf16.msra.mxu1 %v5917_v51 }
  0x6e   :  { %4477 = vmatprep.subr.bf16.mxu1 %v5735_v48 }
  0x6f   :  { %4458 = vmatpush1.bf16.msra.mxu0 %v5924_v53 }
  0x70   :  { %4460 = vmatprep.subr.bf16.mxu0 %v5927_v56 }
  0x71   :  { %4479 = vmatpush3.bf16.msra.mxu1 %v5933_v61 }
  0x72   :  { %4480 = vmatprep.subr.bf16.mxu1 %v5735_v48 }
  0x73   :  { %4462 = vmatpush1.bf16.msra.mxu0 %v5940_v63 }
  0x74   :  { %4464 = vmatprep.subr.bf16.mxu0 %v5943_v3 }
  0x75   :  { %4482 = vmatpush3.bf16.msra.mxu1 %v5949_v8 }
  0x76   :  { %4483 = vmatprep.subr.bf16.mxu1 %v5735_v48 }
  0x77   :  { %4466 = vmatpush1.bf16.msra.mxu0 %v5956_v10 }
  0x78   :  { %4468 = vmatprep.subr.bf16.mxu0 %v5959_v14 }
  0x79   :  { %4485 = vmatpush3.bf16.msra.mxu1 %v5965_v19 }
  0x7a   :  { %4486 = vmatprep.subr.bf16.mxu1 %v5735_v48 }
  0x7b   :  { %4470 = vmatpush1.bf16.msra.mxu0 %v5972_v21 }
  0x7c   :  { %4496 = vmatprep.subr.bf16.mxu0 %v5865_v12 }
  0x7d   :  { %4488 = vmatpush3.bf16.msra.mxu1 %v5979_v26 }
  0x7e   :  { %4489 = vmatprep.subr.bf16.mxu1 %v5735_v48 }
  0x81   :  { %4491 = vmatpush3.bf16.msra.mxu1 %v5989_v29 }
  0x82   :  { %4492 = vmatprep.subr.bf16.mxu1 %v5735_v48 }
  0x85   :  { %4494 = vmatpush3.bf16.msra.mxu1 %v5998_v34 }
  0x86   :  { %4527 = vmatprep.subr.bf16.mxu1 %v5735_v48 }
 0x11b   :  { %v3761_v41 = vpop.f32.mrb[0].mxu1 }
 0x11c   :  { %v6042_v43 = vadd.f32 %v3761_v41, %v104_v39  ;;  %v312_v44 = vpop.f32.mrb[1].mxu1 }
 0x11d   :  { %v313_v57 = vadd.f32 %v312_v44, %v104_v39 }
 0x11f   :  { %v3764_v46 = vpop.f32.mrb[2].mxu1 }
 0x120   :  { %v6044_v47 = vadd.f32 %v3764_v46, %v104_v39  ;;  %v322_v49 = vpop.f32.mrb[3].mxu1 }
 0x121   :  { %v6048_v52 = vadd.f32 %v322_v49, %v104_v39 }
 0x123   :  { %v3767_v59 = vpop.f32.mrb[4].mxu1 }
 0x124   :  { %v6059_v1 = vadd.f32 %v3767_v59, %v104_v39  ;;  %v332_v2 = vpop.f32.mrb[5].mxu1 }
 0x125   :  { %v6063_v5 = vadd.f32 %v332_v2, %v104_v39 }
 0x127   :  { %v3770_v6 = vpop.f32.mrb[6].mxu1 }
 0x128   :  { %v6067_v11 = vadd.f32 %v3770_v6, %v104_v39  ;;  %v342_v13 = vpop.f32.mrb[7].mxu1 }
 0x129   :  { %v6070_v20 = vadd.f32 %v342_v13, %v104_v39 }
 0x131   :  { %v482_v7 = vpop.f32.mrb[0].mxu0 }
 0x132   :  { %v5344_v17 = vadd.f32 %v6061_v4, %v482_v7  ;;  %v484_v18 = vpop.f32.mrb[1].mxu0 }
 0x133   :  { %v5346_v25 = vadd.f32 %v6065_v9, %v484_v18 }
 0x134   :  { %v3417_v24 = vmul.f32 -1.442695, %v5344_v17 }
 0x135   :  { %v3418_v27 = vmul.f32 -1.442695, %v5346_v25 }
 0x136   :  { %5451 = vpow2.f32 %v3417_v24 }
 0x137   :  { %5453 = vpow2.f32 %v3418_v27 }
 0x13b   :  { %v553_v28 = vpop.f32.mrb[8].mxu1 }
 0x13c   :  { %v3805_v30 = vpop.f32.mrb[9].mxu1  ;;  %v554_v46 = vadd.f32 %v553_v28, %v6074_v36 }
 0x140   :  { %v5452_v32 = vpop.eup %5451 }
 0x141   :  { %v561_v35 = vadd.f32 1.0, %v5452_v32  ;;  %v5454_v38 = vpop.eup %5453 }
 0x142   :  { %v568_v41 = vadd.f32 1.0, %v5454_v38 }
 0x143   :  { %5455 = vrcp.f32 %v561_v35 }
 0x144   :  { %5457 = vrcp.f32 %v568_v41 }
 0x14d   :  { %v5456_v49 = vpop.eup %5455 }
 0x14e   :  { %v571_v58 = vmul.f32 %v5456_v49, %v554_v46  ;;  %v5458_v60 = vpop.eup %5457 }
 0x14f   :  { %v574_v62 = vsub.f32 1.0, %v5458_v60  ;;  %v576_v7 = vmul.f32 0.0, %v5458_v60 }
 0x150   :  { %v572_v59 = vadd.f32 %v571_v58, %v313_v57 }
 0x152   :  { %5459 = vtanh.f32 %v572_v59 }
 0x15c   :  { %v5460_v2 = vpop.eup %5459 }
 0x15d   :  { %v575_v6 = vmul.f32 %v5460_v2, %v574_v62 }
 0x15f   :  { %v6077_v13 = vadd.f32 %v576_v7, %v575_v6 }
 0x161   :  { %643 = vmatmul.mubr.f32.vlgmr.msra.gmra.mrb[2].mxu0 %v6077_v13  ;;  %3839 = vmatmul.mubr.f32.vlgmr.msra.gmra.mrb[10].mxu1 %v6077_v13 }
 0x162   :  { %4498 = vmatpush1.bf16.msra.mxu0 %v5867_v15  ;;  %4529 = vmatpush3.bf16.msra.mxu1 %v5901_v40 }
 0x163   :  { %4500 = vmatprep.subr.bf16.mxu0 %v5870_v16  ;;  %4530 = vmatprep.subr.bf16.mxu1 %v5735_v48 }
 0x164   :  { %804 = vmatprep.mubr.f32.mxu0 %v5734_v0  ;;  %3873 = vmatprep.mubr.msk.f32.mxu1 %vm5736_vm1, %v5734_v0 }
 0x166   :  { %4502 = vmatpush1.bf16.msra.mxu0 %v5878_v22  ;;  %4532 = vmatpush3.bf16.msra.mxu1 %v5917_v51 }
 0x167   :  { %4504 = vmatprep.subr.bf16.mxu0 %v5881_v23  ;;  %4533 = vmatprep.subr.bf16.mxu1 %v5735_v48 }
 0x16a   :  { %4506 = vmatpush1.bf16.msra.mxu0 %v5895_v31  ;;  %4535 = vmatpush3.bf16.msra.mxu1 %v5933_v61 }
 0x16b   :  { %4508 = vmatprep.subr.bf16.mxu0 %v5898_v33  ;;  %4536 = vmatprep.subr.bf16.mxu1 %v5735_v48 }
 0x16e   :  { %4510 = vmatpush1.bf16.msra.mxu0 %v5908_v42  ;;  %4538 = vmatpush3.bf16.msra.mxu1 %v5949_v8 }
 0x16f   :  { %4512 = vmatprep.subr.bf16.mxu0 %v5911_v45  ;;  %4539 = vmatprep.subr.bf16.mxu1 %v5735_v48 }
 0x172   :  { %4514 = vmatpush1.bf16.msra.mxu0 %v5924_v53  ;;  %4541 = vmatpush3.bf16.msra.mxu1 %v5965_v19 }
 0x173   :  { %4516 = vmatprep.subr.bf16.mxu0 %v5927_v56  ;;  %4542 = vmatprep.subr.bf16.mxu1 %v5735_v48 }
 0x176   :  { %4518 = vmatpush1.bf16.msra.mxu0 %v5940_v63  ;;  %4544 = vmatpush3.bf16.msra.mxu1 %v5979_v26 }
 0x177   :  { %4520 = vmatprep.subr.bf16.mxu0 %v5943_v3  ;;  %4545 = vmatprep.subr.bf16.mxu1 %v5735_v48 }
 0x17a   :  { %4522 = vmatpush1.bf16.msra.mxu0 %v5956_v10  ;;  %4547 = vmatpush3.bf16.msra.mxu1 %v5989_v29 }
 0x17b   :  { %4524 = vmatprep.subr.bf16.mxu0 %v5959_v14  ;;  %4548 = vmatprep.subr.bf16.mxu1 %v5735_v48 }
 0x17e   :  { %4526 = vmatpush1.bf16.msra.mxu0 %v5972_v21  ;;  %4550 = vmatpush3.bf16.msra.mxu1 %v5998_v34 }
 0x17f   :  { %4552 = vmatprep.subr.bf16.mxu0 %v5865_v12  ;;  %4583 = vmatprep.subr.bf16.mxu1 %v5735_v48 }
 0x234   :  { %v644_v39 = vpop.f32.mrb[2].mxu0  ;;  %v715_v44 = vpop.f32.mrb[10].mxu1 }
 0x235   :  { %v5348_v54 = vadd.f32 %v6061_v4, %v644_v39  ;;  %v646_v17 = vpop.f32.mrb[3].mxu0  ;;  %v3840_v18 = vpop.f32.mrb[11].mxu1  ;;  %v716_v38 = vadd.f32 %v715_v44, %v6074_v36 }
 0x236   :  { %v5350_v25 = vadd.f32 %v6065_v9, %v646_v17 }
 0x237   :  { %v3419_v24 = vmul.f32 -1.442695, %v5348_v54 }
 0x238   :  { %v3420_v27 = vmul.f32 -1.442695, %v5350_v25 }
 0x239   :  { %5461 = vpow2.f32 %v3419_v24 }
 0x23a   :  { %5463 = vpow2.f32 %v3420_v27 }
 0x243   :  { %v5462_v28 = vpop.eup %5461 }
 0x244   :  { %v723_v30 = vadd.f32 1.0, %v5462_v28  ;;  %v5464_v32 = vpop.eup %5463 }
 0x245   :  { %v730_v35 = vadd.f32 1.0, %v5464_v32 }
 0x246   :  { %5465 = vrcp.f32 %v723_v30 }
 0x247   :  { %5467 = vrcp.f32 %v730_v35 }
 0x250   :  { %v5466_v41 = vpop.eup %5465 }
 0x251   :  { %v733_v46 = vmul.f32 %v5466_v41, %v716_v38  ;;  %v5468_v57 = vpop.eup %5467 }
 0x252   :  { %v736_v58 = vsub.f32 1.0, %v5468_v57  ;;  %v738_v62 = vmul.f32 %v5468_v57, %v6077_v13 }
 0x253   :  { %v734_v49 = vadd.f32 %v733_v46, %v6042_v43 }
 0x255   :  { %5469 = vtanh.f32 %v734_v49 }
 0x25f   :  { %v5470_v59 = vpop.eup %5469 }
 0x260   :  { %v737_v60 = vmul.f32 %v5470_v59, %v736_v58 }
 0x262   :  { %v6121_v2 = vadd.f32 %v738_v62, %v737_v60 }
 0x264   :  { %805 = vmatmul.mubr.f32.vlgmr.msra.gmra.mrb[4].mxu0 %v6121_v2  ;;  %3874 = vmatmul.mubr.f32.vlgmr.msra.gmra.mrb[12].mxu1 %v6121_v2 }
 0x265   :  { %4554 = vmatpush1.bf16.msra.mxu0 %v5867_v15  ;;  %4585 = vmatpush3.bf16.msra.mxu1 %v5901_v40 }
 0x266   :  { %4556 = vmatprep.subr.bf16.mxu0 %v5870_v16  ;;  %4586 = vmatprep.subr.bf16.mxu1 %v5735_v48 }
 0x267   :  { %966 = vmatprep.mubr.f32.mxu0 %v5734_v0  ;;  %3908 = vmatprep.mubr.msk.f32.mxu1 %vm5736_vm1, %v5734_v0 }
 0x269   :  { %4558 = vmatpush1.bf16.msra.mxu0 %v5878_v22  ;;  %4588 = vmatpush3.bf16.msra.mxu1 %v5917_v51 }
 0x26a   :  { %4560 = vmatprep.subr.bf16.mxu0 %v5881_v23  ;;  %4589 = vmatprep.subr.bf16.mxu1 %v5735_v48 }
 0x26d   :  { %4562 = vmatpush1.bf16.msra.mxu0 %v5895_v31  ;;  %4591 = vmatpush3.bf16.msra.mxu1 %v5933_v61 }
 0x26e   :  { %4564 = vmatprep.subr.bf16.mxu0 %v5898_v33  ;;  %4592 = vmatprep.subr.bf16.mxu1 %v5735_v48 }
 0x271   :  { %4566 = vmatpush1.bf16.msra.mxu0 %v5908_v42  ;;  %4594 = vmatpush3.bf16.msra.mxu1 %v5949_v8 }
 0x272   :  { %4568 = vmatprep.subr.bf16.mxu0 %v5911_v45  ;;  %4595 = vmatprep.subr.bf16.mxu1 %v5735_v48 }
 0x275   :  { %4570 = vmatpush1.bf16.msra.mxu0 %v5924_v53  ;;  %4597 = vmatpush3.bf16.msra.mxu1 %v5965_v19 }
 0x276   :  { %4572 = vmatprep.subr.bf16.mxu0 %v5927_v56  ;;  %4598 = vmatprep.subr.bf16.mxu1 %v5735_v48 }
 0x279   :  { %4574 = vmatpush1.bf16.msra.mxu0 %v5940_v63  ;;  %4600 = vmatpush3.bf16.msra.mxu1 %v5979_v26 }
 0x27a   :  { %4576 = vmatprep.subr.bf16.mxu0 %v5943_v3  ;;  %4601 = vmatprep.subr.bf16.mxu1 %v5735_v48 }
 0x27d   :  { %4578 = vmatpush1.bf16.msra.mxu0 %v5956_v10  ;;  %4603 = vmatpush3.bf16.msra.mxu1 %v5989_v29 }
 0x27e   :  { %4580 = vmatprep.subr.bf16.mxu0 %v5959_v14  ;;  %4604 = vmatprep.subr.bf16.mxu1 %v5735_v48 }
 0x281   :  { %4582 = vmatpush1.bf16.msra.mxu0 %v5972_v21  ;;  %4606 = vmatpush3.bf16.msra.mxu1 %v5998_v34 }
 0x282   :  { %4608 = vmatprep.subr.bf16.mxu0 %v5865_v12  ;;  %4639 = vmatprep.subr.bf16.mxu1 %v5735_v48 }
 0x337   :  { %v806_v43 = vpop.f32.mrb[4].mxu0  ;;  %v877_v6 = vpop.f32.mrb[12].mxu1 }
 0x338   :  { %v5352_v7 = vadd.f32 %v6061_v4, %v806_v43  ;;  %v808_v39 = vpop.f32.mrb[5].mxu0  ;;  %v3875_v44 = vpop.f32.mrb[13].mxu1  ;;  %v878_v30 = vadd.f32 %v877_v6, %v6074_v36 }
 0x339   :  { %v5354_v17 = vadd.f32 %v6065_v9, %v808_v39 }
 0x33a   :  { %v3421_v54 = vmul.f32 -1.442695, %v5352_v7 }
 0x33b   :  { %v3422_v18 = vmul.f32 -1.442695, %v5354_v17 }
 0x33c   :  { %5471 = vpow2.f32 %v3421_v54 }
 0x33d   :  { %5473 = vpow2.f32 %v3422_v18 }
 0x346   :  { %v5472_v24 = vpop.eup %5471 }
 0x347   :  { %v885_v25 = vadd.f32 1.0, %v5472_v24  ;;  %v5474_v27 = vpop.eup %5473 }
 0x348   :  { %v892_v28 = vadd.f32 1.0, %v5474_v27 }
 0x349   :  { %5475 = vrcp.f32 %v885_v25 }
 0x34a   :  { %5477 = vrcp.f32 %v892_v28 }
 0x353   :  { %v5476_v32 = vpop.eup %5475 }
 0x354   :  { %v895_v35 = vmul.f32 %v5476_v32, %v878_v30  ;;  %v5478_v41 = vpop.eup %5477 }
 0x355   :  { %v898_v46 = vsub.f32 1.0, %v5478_v41  ;;  %v900_v58 = vmul.f32 %v5478_v41, %v6121_v2 }
 0x356   :  { %v896_v38 = vadd.f32 %v895_v35, %v6048_v52 }
 0x358   :  { %5479 = vtanh.f32 %v896_v38 }
 0x362   :  { %v5480_v49 = vpop.eup %5479 }
 0x363   :  { %v899_v57 = vmul.f32 %v5480_v49, %v898_v46 }
 0x365   :  { %v6165_v59 = vadd.f32 %v900_v58, %v899_v57 }
 0x367   :  { %967 = vmatmul.mubr.f32.vlgmr.msra.gmra.mrb[6].mxu0 %v6165_v59  ;;  %3909 = vmatmul.mubr.f32.vlgmr.msra.gmra.mrb[14].mxu1 %v6165_v59 }
 0x368   :  { %4610 = vmatpush1.bf16.msra.mxu0 %v5867_v15  ;;  %4641 = vmatpush3.bf16.msra.mxu1 %v5901_v40 }
 0x369   :  { %4612 = vmatprep.subr.bf16.mxu0 %v5870_v16  ;;  %4642 = vmatprep.subr.bf16.mxu1 %v5735_v48 }
 0x36a   :  { %1128 = vmatprep.mubr.f32.mxu0 %v5734_v0  ;;  %3943 = vmatprep.mubr.msk.f32.mxu1 %vm5736_vm1, %v5734_v0 }
 0x36c   :  { %4614 = vmatpush1.bf16.msra.mxu0 %v5878_v22  ;;  %4644 = vmatpush3.bf16.msra.mxu1 %v5917_v51 }
 0x36d   :  { %4616 = vmatprep.subr.bf16.mxu0 %v5881_v23  ;;  %4645 = vmatprep.subr.bf16.mxu1 %v5735_v48 }
 0x370   :  { %4618 = vmatpush1.bf16.msra.mxu0 %v5895_v31  ;;  %4647 = vmatpush3.bf16.msra.mxu1 %v5933_v61 }
 0x371   :  { %4620 = vmatprep.subr.bf16.mxu0 %v5898_v33  ;;  %4648 = vmatprep.subr.bf16.mxu1 %v5735_v48 }
 0x374   :  { %4622 = vmatpush1.bf16.msra.mxu0 %v5908_v42  ;;  %4650 = vmatpush3.bf16.msra.mxu1 %v5949_v8 }
 0x375   :  { %4624 = vmatprep.subr.bf16.mxu0 %v5911_v45  ;;  %4651 = vmatprep.subr.bf16.mxu1 %v5735_v48 }
 0x378   :  { %4626 = vmatpush1.bf16.msra.mxu0 %v5924_v53  ;;  %4653 = vmatpush3.bf16.msra.mxu1 %v5965_v19 }
 0x379   :  { %4628 = vmatprep.subr.bf16.mxu0 %v5927_v56  ;;  %4654 = vmatprep.subr.bf16.mxu1 %v5735_v48 }
 0x37c   :  { %4630 = vmatpush1.bf16.msra.mxu0 %v5940_v63  ;;  %4656 = vmatpush3.bf16.msra.mxu1 %v5979_v26 }
 0x37d   :  { %4632 = vmatprep.subr.bf16.mxu0 %v5943_v3  ;;  %4657 = vmatprep.subr.bf16.mxu1 %v5735_v48 }
 0x380   :  { %4634 = vmatpush1.bf16.msra.mxu0 %v5956_v10  ;;  %4659 = vmatpush3.bf16.msra.mxu1 %v5989_v29 }
 0x381   :  { %4636 = vmatprep.subr.bf16.mxu0 %v5959_v14  ;;  %4660 = vmatprep.subr.bf16.mxu1 %v5735_v48 }
 0x384   :  { %4638 = vmatpush1.bf16.msra.mxu0 %v5972_v21  ;;  %4662 = vmatpush3.bf16.msra.mxu1 %v5998_v34 }
 0x385   :  { %4664 = vmatprep.subr.bf16.mxu0 %v5865_v12  ;;  %4695 = vmatprep.subr.bf16.mxu1 %v5735_v48 }
 0x43a   :  { %v968_v52 = vpop.f32.mrb[6].mxu0  ;;  %v1039_v60 = vpop.f32.mrb[14].mxu1 }
 0x43b   :  { %v5356_v62 = vadd.f32 %v6061_v4, %v968_v52  ;;  %v970_v43 = vpop.f32.mrb[7].mxu0  ;;  %v3910_v6 = vpop.f32.mrb[15].mxu1  ;;  %v1040_v25 = vadd.f32 %v1039_v60, %v6074_v36 }
 0x43c   :  { %v5358_v39 = vadd.f32 %v6065_v9, %v970_v43 }
 0x43d   :  { %v3423_v7 = vmul.f32 -1.442695, %v5356_v62 }
 0x43e   :  { %v3424_v44 = vmul.f32 -1.442695, %v5358_v39 }
 0x43f   :  { %5481 = vpow2.f32 %v3423_v7 }
 0x440   :  { %5483 = vpow2.f32 %v3424_v44 }
 0x449   :  { %v5482_v54 = vpop.eup %5481 }
 0x44a   :  { %v1047_v17 = vadd.f32 1.0, %v5482_v54  ;;  %v5484_v18 = vpop.eup %5483 }
 0x44b   :  { %v1054_v24 = vadd.f32 1.0, %v5484_v18 }
 0x44c   :  { %5485 = vrcp.f32 %v1047_v17 }
 0x44d   :  { %5487 = vrcp.f32 %v1054_v24 }
 0x456   :  { %v5486_v27 = vpop.eup %5485 }
 0x457   :  { %v1057_v28 = vmul.f32 %v5486_v27, %v1040_v25  ;;  %v5488_v32 = vpop.eup %5487 }
 0x458   :  { %v1060_v35 = vsub.f32 1.0, %v5488_v32  ;;  %v1062_v46 = vmul.f32 %v5488_v32, %v6165_v59 }
 0x459   :  { %v1058_v30 = vadd.f32 %v1057_v28, %v6044_v47 }
 0x45b   :  { %5489 = vtanh.f32 %v1058_v30 }
 0x465   :  { %v5490_v38 = vpop.eup %5489 }
 0x466   :  { %v1061_v41 = vmul.f32 %v5490_v38, %v1060_v35 }
 0x468   :  { %v6209_v49 = vadd.f32 %v1062_v46, %v1061_v41 }
 0x46a   :  { %1129 = vmatmul.mubr.f32.vlgmr.msra.gmra.mrb[8].mxu0 %v6209_v49  ;;  %3944 = vmatmul.mubr.f32.vlgmr.msra.gmra.mrb[16].mxu1 %v6209_v49 }
 0x46b   :  { %4666 = vmatpush1.bf16.msra.mxu0 %v5867_v15  ;;  %4697 = vmatpush3.bf16.msra.mxu1 %v5901_v40 }
 0x46c   :  { %4668 = vmatprep.subr.bf16.mxu0 %v5870_v16  ;;  %4698 = vmatprep.subr.bf16.mxu1 %v5735_v48 }
 0x46d   :  { %1290 = vmatprep.mubr.f32.mxu0 %v5734_v0  ;;  %3978 = vmatprep.mubr.msk.f32.mxu1 %vm5736_vm1, %v5734_v0 }
 0x46f   :  { %4670 = vmatpush1.bf16.msra.mxu0 %v5878_v22  ;;  %4700 = vmatpush3.bf16.msra.mxu1 %v5917_v51 }
 0x470   :  { %4672 = vmatprep.subr.bf16.mxu0 %v5881_v23  ;;  %4701 = vmatprep.subr.bf16.mxu1 %v5735_v48 }
 0x473   :  { %4674 = vmatpush1.bf16.msra.mxu0 %v5895_v31  ;;  %4703 = vmatpush3.bf16.msra.mxu1 %v5933_v61 }
 0x474   :  { %4676 = vmatprep.subr.bf16.mxu0 %v5898_v33  ;;  %4704 = vmatprep.subr.bf16.mxu1 %v5735_v48 }
 0x477   :  { %4678 = vmatpush1.bf16.msra.mxu0 %v5908_v42  ;;  %4706 = vmatpush3.bf16.msra.mxu1 %v5949_v8 }
 0x478   :  { %4680 = vmatprep.subr.bf16.mxu0 %v5911_v45  ;;  %4707 = vmatprep.subr.bf16.mxu1 %v5735_v48 }
 0x47b   :  { %4682 = vmatpush1.bf16.msra.mxu0 %v5924_v53  ;;  %4709 = vmatpush3.bf16.msra.mxu1 %v5965_v19 }
 0x47c   :  { %4684 = vmatprep.subr.bf16.mxu0 %v5927_v56  ;;  %4710 = vmatprep.subr.bf16.mxu1 %v5735_v48 }
 0x47f   :  { %4686 = vmatpush1.bf16.msra.mxu0 %v5940_v63  ;;  %4712 = vmatpush3.bf16.msra.mxu1 %v5979_v26 }
 0x480   :  { %4688 = vmatprep.subr.bf16.mxu0 %v5943_v3  ;;  %4713 = vmatprep.subr.bf16.mxu1 %v5735_v48 }
 0x483   :  { %4690 = vmatpush1.bf16.msra.mxu0 %v5956_v10  ;;  %4715 = vmatpush3.bf16.msra.mxu1 %v5989_v29 }
 0x484   :  { %4692 = vmatprep.subr.bf16.mxu0 %v5959_v14  ;;  %4716 = vmatprep.subr.bf16.mxu1 %v5735_v48 }
 0x487   :  { %4694 = vmatpush1.bf16.msra.mxu0 %v5972_v21  ;;  %4718 = vmatpush3.bf16.msra.mxu1 %v5998_v34 }
 0x488   :  { %4720 = vmatprep.subr.bf16.mxu0 %v5865_v12  ;;  %4751 = vmatprep.subr.bf16.mxu1 %v5735_v48 }
 0x53d   :  { %v1130_v47 = vpop.f32.mrb[8].mxu0  ;;  %v1201_v57 = vpop.f32.mrb[16].mxu1 }
 0x53e   :  { %v5360_v58 = vadd.f32 %v6061_v4, %v1130_v47  ;;  %v1132_v52 = vpop.f32.mrb[9].mxu0  ;;  %v3945_v60 = vpop.f32.mrb[17].mxu1  ;;  %v1202_v17 = vadd.f32 %v1201_v57, %v6074_v36 }
 0x53f   :  { %v5362_v43 = vadd.f32 %v6065_v9, %v1132_v52 }
 0x540   :  { %v3425_v62 = vmul.f32 -1.442695, %v5360_v58 }
 0x541   :  { %v3426_v6 = vmul.f32 -1.442695, %v5362_v43 }
 0x542   :  { %5491 = vpow2.f32 %v3425_v62 }
 0x543   :  { %5493 = vpow2.f32 %v3426_v6 }
 0x54c   :  { %v5492_v7 = vpop.eup %5491 }
 0x54d   :  { %v1209_v39 = vadd.f32 1.0, %v5492_v7  ;;  %v5494_v44 = vpop.eup %5493 }
 0x54e   :  { %v1216_v54 = vadd.f32 1.0, %v5494_v44 }
 0x54f   :  { %5495 = vrcp.f32 %v1209_v39 }
 0x550   :  { %5497 = vrcp.f32 %v1216_v54 }
 0x559   :  { %v5496_v18 = vpop.eup %5495 }
 0x55a   :  { %v1219_v24 = vmul.f32 %v5496_v18, %v1202_v17  ;;  %v5498_v27 = vpop.eup %5497 }
 0x55b   :  { %v1222_v28 = vsub.f32 1.0, %v5498_v27  ;;  %v1224_v35 = vmul.f32 %v5498_v27, %v6209_v49 }
 0x55c   :  { %v1220_v25 = vadd.f32 %v1219_v24, %v6063_v5 }
 0x55e   :  { %5499 = vtanh.f32 %v1220_v25 }
 0x568   :  { %v5500_v30 = vpop.eup %5499 }
 0x569   :  { %v1223_v32 = vmul.f32 %v5500_v30, %v1222_v28  ;;  %v1713_v30 = vld [vmem:[#allocation5] sm:$0xff] }
 0x56b   :  { %v6253_v38 = vadd.f32 %v1224_v35, %v1223_v32  ;;  %v1716_v32 = vld [vmem:[#allocation5 + $0x18] sm:$0xff] }
 0x56d   :  { %1291 = vmatmul.mubr.f32.vlgmr.msra.gmra.mrb[10].mxu0 %v6253_v38  ;;  %3979 = vmatmul.mubr.f32.vlgmr.msra.gmra.mrb[18].mxu1 %v6253_v38 }
 0x56e   :  { %4722 = vmatpush1.bf16.msra.mxu0 %v5867_v15  ;;  %4753 = vmatpush3.bf16.msra.mxu1 %v5901_v40 }
 0x56f   :  { %4724 = vmatprep.subr.bf16.mxu0 %v5870_v16  ;;  %4754 = vmatprep.subr.bf16.mxu1 %v5735_v48 }
 0x570   :  { %1452 = vmatprep.mubr.f32.mxu0 %v5734_v0  ;;  %4013 = vmatprep.mubr.msk.f32.mxu1 %vm5736_vm1, %v5734_v0 }
 0x572   :  { %4726 = vmatpush1.bf16.msra.mxu0 %v5878_v22  ;;  %4756 = vmatpush3.bf16.msra.mxu1 %v5917_v51 }
 0x573   :  { %4728 = vmatprep.subr.bf16.mxu0 %v5881_v23  ;;  %4757 = vmatprep.subr.bf16.mxu1 %v5735_v48 }
 0x576   :  { %4730 = vmatpush1.bf16.msra.mxu0 %v5895_v31  ;;  %4759 = vmatpush3.bf16.msra.mxu1 %v5933_v61 }
 0x577   :  { %4732 = vmatprep.subr.bf16.mxu0 %v5898_v33  ;;  %4760 = vmatprep.subr.bf16.mxu1 %v5735_v48 }
 0x57a   :  { %4734 = vmatpush1.bf16.msra.mxu0 %v5908_v42  ;;  %4762 = vmatpush3.bf16.msra.mxu1 %v5949_v8 }
 0x57b   :  { %4736 = vmatprep.subr.bf16.mxu0 %v5911_v45  ;;  %4763 = vmatprep.subr.bf16.mxu1 %v5735_v48 }
 0x57e   :  { %4738 = vmatpush1.bf16.msra.mxu0 %v5924_v53  ;;  %4765 = vmatpush3.bf16.msra.mxu1 %v5965_v19 }
 0x57f   :  { %4740 = vmatprep.subr.bf16.mxu0 %v5927_v56  ;;  %4766 = vmatprep.subr.bf16.mxu1 %v5735_v48 }
 0x582   :  { %4742 = vmatpush1.bf16.msra.mxu0 %v5940_v63  ;;  %4768 = vmatpush3.bf16.msra.mxu1 %v5979_v26 }
 0x583   :  { %4744 = vmatprep.subr.bf16.mxu0 %v5943_v3  ;;  %4769 = vmatprep.subr.bf16.mxu1 %v5735_v48 }
 0x586   :  { %4746 = vmatpush1.bf16.msra.mxu0 %v5956_v10  ;;  %4771 = vmatpush3.bf16.msra.mxu1 %v5989_v29 }
 0x587   :  { %4748 = vmatprep.subr.bf16.mxu0 %v5959_v14  ;;  %4772 = vmatprep.subr.bf16.mxu1 %v5735_v48 }
 0x58a   :  { %4750 = vmatpush1.bf16.msra.mxu0 %v5972_v21  ;;  %4774 = vmatpush3.bf16.msra.mxu1 %v5998_v34 }
 0x58b   :  { %4776 = vmatprep.subr.bf16.mxu0 %v5865_v12  ;;  %4807 = vmatprep.subr.bf16.mxu1 %v5735_v48 }
 0x640   :  { %v1292_v5 = vpop.f32.mrb[10].mxu0  ;;  %v1363_v41 = vpop.f32.mrb[18].mxu1 }
 0x641   :  { %v5364_v46 = vadd.f32 %v6061_v4, %v1292_v5  ;;  %v1294_v47 = vpop.f32.mrb[11].mxu0  ;;  %v3980_v57 = vpop.f32.mrb[19].mxu1  ;;  %v1364_v12 = vadd.f32 %v1363_v41, %v6074_v36  ;;  %v1720_v5 = vld [vmem:[#allocation5 + $0x38] sm:$0xff]  ;;  %v1723_v41 = vld [vmem:[#allocation5 + $0x50] sm:$0xff] }
 0x642   :  { %v5366_v52 = vadd.f32 %v6065_v9, %v1294_v47  ;;  %v1721_v57 = vld [vmem:[#allocation5 + $0x40] sm:$0xff] }
 0x643   :  { %v3427_v58 = vmul.f32 -1.442695, %v5364_v46 }
 0x644   :  { %v3428_v60 = vmul.f32 -1.442695, %v5366_v52  ;;  %v4833_v52 = vpack.c.bf16 %v1716_v32, %v1713_v30  ;;  %v1743_v30 = vld [vmem:[#allocation5 + $0xf0] sm:$0xff]  ;;  %v1746_v32 = vld [vmem:[#allocation5 + $0x108] sm:$0xff] }
 0x645   :  { %5501 = vpow2.f32 %v3427_v58  ;;  %v1724_v58 = vld [vmem:[#allocation5 + $0x58] sm:$0xff] }
 0x646   :  { %5503 = vpow2.f32 %v3428_v60 }
 0x64f   :  { %v5502_v62 = vpop.eup %5501 }
 0x650   :  { %v1371_v43 = vadd.f32 1.0, %v5502_v62  ;;  %v5504_v6 = vpop.eup %5503  ;;  %v4835_v62 = vpack.c.bf16 %v1723_v41, %v1720_v5  ;;  %v1753_v5 = vld [vmem:[#allocation5 + $0x140] sm:$0xff]  ;;  %v1751_v41 = vld [vmem:[#allocation5 + $0x130] sm:$0xff] }
 0x651   :  { %v1378_v7 = vadd.f32 1.0, %v5504_v6  ;;  %v1722_v6 = vld [vmem:[#allocation5 + $0x48] sm:$0xff] }
 0x652   :  { %5505 = vrcp.f32 %v1371_v43  ;;  %v1719_v43 = vld [vmem:[#allocation5 + $0x30] sm:$0xff] }
 0x653   :  { %5507 = vrcp.f32 %v1378_v7  ;;  %v4867_v7 = vpack.c.bf16 %v1724_v58, %v1721_v57 }
 0x65c   :  { %v5506_v39 = vpop.eup %5505 }
 0x65d   :  { %v1381_v44 = vmul.f32 %v5506_v39, %v1364_v12  ;;  %v5508_v17 = vpop.eup %5507  ;;  %v1729_v12 = vld [vmem:[#allocation5 + $0x80] sm:$0xff]  ;;  %v1727_v39 = vld [vmem:[#allocation5 + $0x70] sm:$0xff] }
 0x65e   :  { %v1384_v18 = vsub.f32 1.0, %v5508_v17  ;;  %v1386_v27 = vmul.f32 %v5508_v17, %v6253_v38 }
 0x65f   :  { %v1382_v54 = vadd.f32 %v1381_v44, %v6059_v1  ;;  %v1730_v44 = vld [vmem:[#allocation5 + $0x88] sm:$0xff] }
 0x661   :  { %5509 = vtanh.f32 %v1382_v54  ;;  %v4837_v54 = vpack.c.bf16 %v1722_v6, %v1719_v43  ;;  %v1756_v43 = vld [vmem:[#allocation5 + $0x158] sm:$0xff]  ;;  %v1759_v6 = vld [vmem:[#allocation5 + $0x170] sm:$0xff] }
 0x66b   :  { %v5510_v24 = vpop.eup %5509 }
 0x66c   :  { %v1385_v25 = vmul.f32 %v5510_v24, %v1384_v18  ;;  %v4871_v18 = vpack.c.bf16 %v1730_v44, %v1727_v39  ;;  %v1725_v24 = vld [vmem:[#allocation5 + $0x60] sm:$0xff]  ;;  %v4859_v39 = vpack.c.bf16 %v1759_v6, %v1756_v43  ;;  %v2039_v6 = vld [vmem:[#allocation7 + $0x158] sm:$0xff] }
 0x66e   :  { %v6297_v28 = vadd.f32 %v1386_v27, %v1385_v25  ;;  %v1728_v25 = vld [vmem:[#allocation5 + $0x78] sm:$0xff] }
 0x66f   :  { %v1732_v27 = vld [vmem:[#allocation5 + $0x98] sm:$0xff] }
 0x670   :  { %1453 = vmatmul.mubr.f32.vlgmr.msra.gmra.mrb[12].mxu0 %v6297_v28  ;;  %4014 = vmatmul.mubr.f32.vlgmr.msra.gmra.mrb[20].mxu1 %v6297_v28 }
 0x671   :  { %4778 = vmatpush1.bf16.msra.mxu0 %v5867_v15  ;;  %4809 = vmatpush3.bf16.msra.mxu1 %v5901_v40  ;;  %v1714_v15 = vld [vmem:[#allocation5 + $0x8] sm:$0xff] }
 0x672   :  { %4780 = vmatprep.subr.bf16.mxu0 %v5870_v16  ;;  %4810 = vmatprep.subr.bf16.mxu1 %v5735_v48  ;;  %v1717_v16 = vld [vmem:[#allocation5 + $0x20] sm:$0xff] }
 0x673   :  { %1614 = vmatprep.mubr.f32.mxu0 %v5734_v0  ;;  %4048 = vmatprep.mubr.msk.f32.mxu1 %vm5736_vm1, %v5734_v0 }
 0x675   :  { %4782 = vmatpush1.bf16.msra.mxu0 %v5878_v22  ;;  %4812 = vmatpush3.bf16.msra.mxu1 %v5917_v51  ;;  %v1715_v22 = vld [vmem:[#allocation5 + $0x10] sm:$0xff] }
 0x676   :  { %4784 = vmatprep.subr.bf16.mxu0 %v5881_v23  ;;  %4813 = vmatprep.subr.bf16.mxu1 %v5735_v48  ;;  %v4831_v23 = vpack.c.bf16 %v1717_v16, %v1714_v15  ;;  %v1735_v15 = vld [vmem:[#allocation5 + $0xb0] sm:$0xff]  ;;  %v1733_v16 = vld [vmem:[#allocation5 + $0xa0] sm:$0xff] }
 0x679   :  { %4786 = vmatpush1.bf16.msra.mxu0 %v5895_v31  ;;  %4815 = vmatpush3.bf16.msra.mxu1 %v5933_v61  ;;  %v1718_v31 = vld [vmem:[#allocation5 + $0x28] sm:$0xff] }
 0x67a   :  { %4788 = vmatprep.subr.bf16.mxu0 %v5898_v33  ;;  %4816 = vmatprep.subr.bf16.mxu1 %v5735_v48  ;;  %v4863_v33 = vpack.c.bf16 %v1718_v31, %v1715_v22  ;;  %v1736_v22 = vld [vmem:[#allocation5 + $0xb8] sm:$0xff]  ;;  %v4843_v31 = vpack.c.bf16 %v1735_v15, %v1732_v27  ;;  %v2002_v15 = vld [vmem:[#allocation7 + $0x30] sm:$0xff] }
 0x67d   :  { %4790 = vmatpush1.bf16.msra.mxu0 %v5908_v42  ;;  %4818 = vmatpush3.bf16.msra.mxu1 %v5949_v8 }
 0x67e   :  { %4792 = vmatprep.subr.bf16.mxu0 %v5911_v45  ;;  %4819 = vmatprep.subr.bf16.mxu1 %v5735_v48 }
 0x681   :  { %4794 = vmatpush1.bf16.msra.mxu0 %v5924_v53  ;;  %4821 = vmatpush3.bf16.msra.mxu1 %v5965_v19 }
 0x682   :  { %4796 = vmatprep.subr.bf16.mxu0 %v5927_v56  ;;  %4822 = vmatprep.subr.bf16.mxu1 %v5735_v48 }
 0x685   :  { %4798 = vmatpush1.bf16.msra.mxu0 %v5940_v63  ;;  %4824 = vmatpush3.bf16.msra.mxu1 %v5979_v26 }
 0x686   :  { %4800 = vmatprep.subr.bf16.mxu0 %v5943_v3  ;;  %4825 = vmatprep.subr.bf16.mxu1 %v5735_v48 }
 0x689   :  { %4802 = vmatpush1.bf16.msra.mxu0 %v5956_v10  ;;  %4827 = vmatpush3.bf16.msra.mxu1 %v5989_v29 }
 0x68a   :  { %4804 = vmatprep.subr.bf16.mxu0 %v5959_v14  ;;  %4828 = vmatprep.subr.bf16.mxu1 %v5735_v48 }
 0x68d   :  { %4806 = vmatpush1.bf16.msra.mxu0 %v5972_v21  ;;  %4830 = vmatpush3.bf16.msra.mxu1 %v5998_v34 }
 0x68e   :  { %4832 = vmatprep.subr.bf16.mxu0 %v4831_v23  ;;  %4864 = vmatprep.subr.bf16.mxu1 %v4863_v33  ;;  %v4841_v23 = vpack.c.bf16 %v1728_v25, %v1725_v24  ;;  %v1996_v24 = vld [vmem:[#allocation7] sm:$0xff] }
 0x743   :  { %v1454_v40 = vpop.f32.mrb[12].mxu0  ;;  %v1525_v42 = vpop.f32.mrb[20].mxu1 }
 0x744   :  { %v5368_v45 = vadd.f32 %v6061_v4, %v1454_v40  ;;  %v1456_v51 = vpop.f32.mrb[13].mxu0  ;;  %v4015_v53 = vpop.f32.mrb[21].mxu1  ;;  %v1526_v19 = vadd.f32 %v1525_v42, %v6074_v36  ;;  %v1731_v40 = vld [vmem:[#allocation5 + $0x90] sm:$0xff]  ;;  %v1734_v42 = vld [vmem:[#allocation5 + $0xa8] sm:$0xff] }
 0x745   :  { %v5370_v61 = vadd.f32 %v6065_v9, %v1456_v51  ;;  %v1741_v51 = vld [vmem:[#allocation5 + $0xe0] sm:$0xff]  ;;  %v1739_v53 = vld [vmem:[#allocation5 + $0xd0] sm:$0xff] }
 0x746   :  { %v3429_v56 = vmul.f32 -1.442695, %v5368_v45  ;;  %v1738_v45 = vld [vmem:[#allocation5 + $0xc8] sm:$0xff] }
 0x747   :  { %v3430_v63 = vmul.f32 -1.442695, %v5370_v61  ;;  %v4845_v61 = vpack.c.bf16 %v1734_v42, %v1731_v40  ;;  %v2008_v40 = vld [vmem:[#allocation7 + $0x60] sm:$0xff]  ;;  %v2011_v42 = vld [vmem:[#allocation7 + $0x78] sm:$0xff] }
 0x748   :  { %5511 = vpow2.f32 %v3429_v56  ;;  %v1742_v56 = vld [vmem:[#allocation5 + $0xe8] sm:$0xff] }
 0x749   :  { %5513 = vpow2.f32 %v3430_v63  ;;  %v4847_v63 = vpack.c.bf16 %v1741_v51, %v1738_v45  ;;  %v6380_v45 = vpack.c.bf16 %v2011_v42, %v2008_v40  ;;  %v2015_v51 = vld [vmem:[#allocation7 + $0x98] sm:$0xff] }
 0x74a   :  { %v2031_v40 = vld [vmem:[#allocation7 + $0x118] sm:$0xff] }
 0x752   :  { %v5512_v3 = vpop.eup %5511 }
 0x753   :  { %v1533_v8 = vadd.f32 1.0, %v5512_v3  ;;  %v5514_v10 = vpop.eup %5513  ;;  %v4879_v3 = vpack.c.bf16 %v1742_v56, %v1739_v53  ;;  %v2018_v53 = vld [vmem:[#allocation7 + $0xb0] sm:$0xff] }
 0x754   :  { %v1540_v14 = vadd.f32 1.0, %v5514_v10  ;;  %v1740_v10 = vld [vmem:[#allocation5 + $0xd8] sm:$0xff]  ;;  %v6384_v56 = vpack.c.bf16 %v2018_v53, %v2015_v51  ;;  %v2034_v51 = vld [vmem:[#allocation7 + $0x130] sm:$0xff]  ;;  %v2037_v53 = vld [vmem:[#allocation7 + $0x148] sm:$0xff] }
 0x755   :  { %5515 = vrcp.f32 %v1533_v8  ;;  %v1737_v8 = vld [vmem:[#allocation5 + $0xc0] sm:$0xff] }
 0x756   :  { %5517 = vrcp.f32 %v1540_v14  ;;  %v1744_v14 = vld [vmem:[#allocation5 + $0xf8] sm:$0xff] }
 0x75f   :  { %v5516_v21 = vpop.eup %5515 }
 0x760   :  { %v1543_v26 = vmul.f32 %v5516_v21, %v1526_v19  ;;  %v5518_v34 = vpop.eup %5517  ;;  %v1747_v19 = vld [vmem:[#allocation5 + $0x110] sm:$0xff]  ;;  %v1745_v21 = vld [vmem:[#allocation5 + $0x100] sm:$0xff] }
 0x761   :  { %v1546_v1 = vsub.f32 1.0, %v5518_v34  ;;  %v1548_v47 = vmul.f32 %v5518_v34, %v6297_v28  ;;  %v4851_v34 = vpack.c.bf16 %v1747_v19, %v1744_v14  ;;  %v2020_v19 = vld [vmem:[#allocation7 + $0xc0] sm:$0xff] }
 0x762   :  { %v1544_v29 = vadd.f32 %v1543_v26, %v6070_v20  ;;  %v1726_v20 = vld [vmem:[#allocation5 + $0x68] sm:$0xff]  ;;  %v1748_v26 = vld [vmem:[#allocation5 + $0x118] sm:$0xff] }
 0x763   :  { %v4839_v17 = vpack.c.bf16 %v1729_v12, %v1726_v20  ;;  %v1757_v20 = vld [vmem:[#allocation5 + $0x160] sm:$0xff] }
 0x764   :  { %5519 = vtanh.f32 %v1544_v29  ;;  %v4849_v29 = vpack.c.bf16 %v1740_v10, %v1737_v8  ;;  %v2021_v8 = vld [vmem:[#allocation7 + $0xc8] sm:$0xff]  ;;  %v2024_v10 = vld [vmem:[#allocation7 + $0xe0] sm:$0xff] }
 0x765   :  { %v6390_v14 = vpack.c.bf16 %v2024_v10, %v2021_v8  ;;  %v2043_v8 = vld [vmem:[#allocation7 + $0x178] sm:$0xff] }
 0x76e   :  { %v5520_v35 = vpop.eup %5519 }
 0x76f   :  { %v1547_v46 = vmul.f32 %v5520_v35, %v1546_v1  ;;  %v4883_v1 = vpack.c.bf16 %v1748_v26, %v1745_v21  ;;  %v1750_v35 = vld [vmem:[#allocation5 + $0x128] sm:$0xff]  ;;  %v2023_v21 = vld [vmem:[#allocation7 + $0xd8] sm:$0xff] }
 0x770   :  { %v4855_v57 = vpack.c.bf16 %v1753_v5, %v1750_v35  ;;  %v6392_v26 = vpack.c.bf16 %v2023_v21, %v2020_v19  ;;  %v2033_v5 = vld [vmem:[#allocation7 + $0x128] sm:$0xff] }
 0x771   :  { %v6339_v60 = vadd.f32 %v1548_v47, %v1547_v46  ;;  %v1754_v46 = vld [vmem:[#allocation5 + $0x148] sm:$0xff]  ;;  %v4853_v47 = vpack.c.bf16 %v1746_v32, %v1743_v30  ;;  %v2026_v30 = vld [vmem:[#allocation7 + $0xf0] sm:$0xff] }
 0x772   :  { %v4887_v58 = vpack.c.bf16 %v1754_v46, %v1751_v41  ;;  %v2029_v32 = vld [vmem:[#allocation7 + $0x108] sm:$0xff]  ;;  %v2036_v41 = vld [vmem:[#allocation7 + $0x140] sm:$0xff] }
 0x773   :  { %1615 = vmatmul.mubr.f32.vlgmr.msra.gmra.mrb[14].mxu0 %v6339_v60  ;;  %4049 = vmatmul.mubr.f32.vlgmr.msra.gmra.mrb[22].mxu1 %v6339_v60  ;;  %v6398_v35 = vpack.c.bf16 %v2029_v32, %v2026_v30  ;;  %v2032_v46 = vld [vmem:[#allocation7 + $0x120] sm:$0xff] }
 0x774   :  { %4834 = vmatpush1.bf16.msra.mxu0 %v4833_v52  ;;  %4866 = vmatpush3.bf16.msra.mxu1 %v4863_v33  ;;  %v4875_v33 = vpack.c.bf16 %v1736_v22, %v1733_v16  ;;  %v1749_v52 = vld [vmem:[#allocation5 + $0x120] sm:$0xff]  ;;  %v2005_v16 = vld [vmem:[#allocation7 + $0x48] sm:$0xff] }
 0x775   :  { %4083 = vmatprep.mubr.f32.mxu1 %v6077_v13  ;;  %4836 = vmatprep.subr.bf16.mxu0 %v4835_v62  ;;  %v1752_v62 = vld [vmem:[#allocation5 + $0x138] sm:$0xff]  ;;  %v6374_v22 = vpack.c.bf16 %v2005_v16, %v2002_v15  ;;  %v2022_v15 = vld [vmem:[#allocation7 + $0xd0] sm:$0xff]  ;;  %v2025_v16 = vld [vmem:[#allocation7 + $0xe8] sm:$0xff] }
 0x776   :  { %4868 = vmatprep.subr.bf16.mxu1 %v4867_v7  ;;  %1842 = vmatprep.mubr.f32.mxu0 %v5734_v0  ;;  %v4857_v12 = vpack.c.bf16 %v1752_v62, %v1749_v52  ;;  %v2001_v52 = vld [vmem:[#allocation7 + $0x28] sm:$0xff] }
 0x778   :  { %4838 = vmatpush1.bf16.msra.mxu0 %v4837_v54  ;;  %4870 = vmatpush3.bf16.msra.mxu1 %v4867_v7  ;;  %v1760_v7 = vld [vmem:[#allocation5 + $0x178] sm:$0xff]  ;;  %v1755_v54 = vld [vmem:[#allocation5 + $0x150] sm:$0xff] }
 0x779   :  { %4840 = vmatprep.subr.bf16.mxu0 %v4839_v17  ;;  %4872 = vmatprep.subr.bf16.mxu1 %v4871_v18  ;;  %v4891_v44 = vpack.c.bf16 %v1760_v7, %v1757_v20  ;;  %v1758_v17 = vld [vmem:[#allocation5 + $0x168] sm:$0xff]  ;;  %v2042_v20 = vld [vmem:[#allocation7 + $0x170] sm:$0xff] }
 0x77a   :  { %v6411_v7 = vpack.c.bf16 %v2042_v20, %v2039_v6 }
 0x77c   :  { %4842 = vmatpush1.bf16.msra.mxu0 %v4841_v23  ;;  %4874 = vmatpush3.bf16.msra.mxu1 %v4871_v18  ;;  %v4861_v18 = vpack.c.bf16 %v1758_v17, %v1755_v54  ;;  %v2009_v23 = vld [vmem:[#allocation7 + $0x68] sm:$0xff]  ;;  %v2004_v54 = vld [vmem:[#allocation7 + $0x40] sm:$0xff]  ;;  %v2007_v17 = vld [vmem:[#allocation7 + $0x58] sm:$0xff] }
 0x77d   :  { %4844 = vmatprep.subr.bf16.mxu0 %v4843_v31  ;;  %4876 = vmatprep.subr.bf16.mxu1 %v4875_v33  ;;  %v2012_v31 = vld [vmem:[#allocation7 + $0x80] sm:$0xff] }
 0x780   :  { %4846 = vmatpush1.bf16.msra.mxu0 %v4845_v61  ;;  %4878 = vmatpush3.bf16.msra.mxu1 %v4875_v33  ;;  %v6378_v33 = vpack.c.bf16 %v2012_v31, %v2009_v23  ;;  %v2014_v61 = vld [vmem:[#allocation7 + $0x90] sm:$0xff]  ;;  %v6430_v23 = vpack.c.bf16 %v2025_v16, %v2022_v15  ;;  %v2028_v31 = vld [vmem:[#allocation7 + $0x100] sm:$0xff] }
 0x781   :  { %4848 = vmatprep.subr.bf16.mxu0 %v4847_v63  ;;  %4880 = vmatprep.subr.bf16.mxu1 %v4879_v3  ;;  %v2017_v63 = vld [vmem:[#allocation7 + $0xa8] sm:$0xff]  ;;  %v6434_v42 = vpack.c.bf16 %v2031_v40, %v2028_v31  ;;  %v1761_v31 = vld [vmem:[%s6844_s7] sm:$0x7]  ;;  %s5737_s7 = smov [#allocation8]  }
 0x782   :  { %v1766_v40 = vrot.slane %v1761_v31, %v6046_v50 }
 0x784   :  { %4850 = vmatpush1.bf16.msra.mxu0 %v4849_v29  ;;  %4882 = vmatpush3.bf16.msra.mxu1 %v4879_v3  ;;  %v6386_v3 = vpack.c.bf16 %v2017_v63, %v2014_v61  ;;  %v2027_v29 = vld [vmem:[#allocation7 + $0xf8] sm:$0xff]  ;;  %v6438_v61 = vpack.c.bf16 %v2037_v53, %v2034_v51  ;;  %v2040_v63 = vld [vmem:[#allocation7 + $0x160] sm:$0xff] }
 0x785   :  { %4852 = vmatprep.subr.bf16.mxu0 %v4851_v34  ;;  %4884 = vmatprep.subr.bf16.mxu1 %v4883_v1  ;;  %v2030_v34 = vld [vmem:[#allocation7 + $0x110] sm:$0xff]  ;;  %v6442_v10 = vpack.c.bf16 %v2043_v8, %v2040_v63  ;;  %v1770_v63 = vrot.slane %v1761_v31, %v6053_v55 }
 0x788   :  { %4854 = vmatpush1.bf16.msra.mxu0 %v4853_v47  ;;  %4886 = vmatpush3.bf16.msra.mxu1 %v4883_v1  ;;  %v6396_v1 = vpack.c.bf16 %v2030_v34, %v2027_v29  ;;  %v6402_v47 = vpack.c.bf16 %v2036_v41, %v2033_v5 }
 0x789   :  { %4856 = vmatprep.subr.bf16.mxu0 %v4855_v57  ;;  %4888 = vmatprep.subr.bf16.mxu1 %v4887_v58  ;;  %v2035_v57 = vld [vmem:[#allocation7 + $0x138] sm:$0xff] }
 0x78a   :  { %v6404_v62 = vpack.c.bf16 %v2035_v57, %v2032_v46 }
 0x78c   :  { %4858 = vmatpush1.bf16.msra.mxu0 %v4857_v12  ;;  %4890 = vmatpush3.bf16.msra.mxu1 %v4887_v58  ;;  %v1998_v58 = vld [vmem:[#allocation7 + $0x10] sm:$0xff] }
 0x78d   :  { %4860 = vmatprep.subr.bf16.mxu0 %v4859_v39  ;;  %4892 = vmatprep.subr.bf16.mxu1 %v4891_v44  ;;  %v6406_v43 = vpack.c.bf16 %v2001_v52, %v1998_v58  ;;  %v2038_v12 = vld [vmem:[#allocation7 + $0x150] sm:$0xff]  ;;  %v2041_v39 = vld [vmem:[#allocation7 + $0x168] sm:$0xff] }
 0x790   :  { %4862 = vmatpush1.bf16.msra.mxu0 %v4861_v18  ;;  %4894 = vmatpush3.bf16.msra.mxu1 %v4891_v44  ;;  %v6414_v44 = vpack.c.bf16 %v2041_v39, %v2038_v12  ;;  %v6417_v18 = vpack.c.bf16 %v2007_v17, %v2004_v54 }
 0x791   :  { %4927 = vmatprep.subr.bf16.mxu1 %v5735_v48 }
 0x793   :  { %1843 = vmatmul.mubr.f32.vlgmr.msra.gmra.mrb[16].mxu0 %v6077_v13  ;;  %4084 = vmatmul.mubr.f32.vlgmr.msra.gmra.mrb[24].mxu1 %v6121_v2  ;;  %v1997_v13 = vld [vmem:[#allocation7 + $0x8] sm:$0xff] }
 0x794   :  { %4086 = vmatprep.mubr.f32.mxu1 %v6165_v59  ;;  %1848 = vmatprep.mubr.f32.mxu0 %v5734_v0 }
 0x795   :  { %4929 = vmatpush3.bf16.msra.mxu1 %v6406_v43 }
 0x796   :  { %4930 = vmatprep.subr.bf16.mxu1 %v5735_v48 }
 0x797   :  { %1849 = vmatmul.mubr.f32.gmra.mrb[18].mxu0 %v6121_v2  ;;  %4087 = vmatmul.mubr.f32.gmra.mrb[26].mxu1 %v6209_v49  ;;  %v2000_v2 = vld [vmem:[#allocation7 + $0x20] sm:$0xff] }
 0x798   :  { %4089 = vmatprep.mubr.f32.mxu1 %v6253_v38  ;;  %1854 = vmatprep.mubr.f32.mxu0 %v5734_v0 }
 0x799   :  { %4932 = vmatpush3.bf16.msra.mxu1 %v6417_v18 }
 0x79a   :  { %4933 = vmatprep.subr.bf16.mxu1 %v5735_v48 }
 0x79b   :  { %1855 = vmatmul.mubr.f32.gmra.mrb[20].mxu0 %v6165_v59  ;;  %4090 = vmatmul.mubr.f32.gmra.mrb[28].mxu1 %v6297_v28  ;;  %v6366_v59 = vpack.c.bf16 %v2000_v2, %v1997_v13  ;;  %v2010_v13 = vld [vmem:[#allocation7 + $0x70] sm:$0xff]  ;;  %v2013_v2 = vld [vmem:[#allocation7 + $0x88] sm:$0xff] }
 0x79c   :  { %4092 = vmatprep.mubr.f32.mxu1 %v6339_v60  ;;  %1860 = vmatprep.mubr.f32.mxu0 %v5734_v0 }
 0x79d   :  { %4896 = vmatprep.subr.bf16.mxu0 %v6366_v59 }
 0x79f   :  { %1861 = vmatmul.mubr.f32.gmra.mrb[22].mxu0 %v6209_v49  ;;  %v1999_v49 = vld [vmem:[#allocation7 + $0x18] sm:$0xff] }
 0x7a0   :  { %1866 = vmatprep.mubr.f32.mxu0 %v5734_v0  ;;  %v6368_v25 = vpack.c.bf16 %v1999_v49, %v1996_v24  ;;  %v2016_v24 = vld [vmem:[#allocation7 + $0xa0] sm:$0xff]  ;;  %v6423_v49 = vpack.c.bf16 %v2013_v2, %v2010_v13 }
 0x7a2   :  { %4898 = vmatpush1.bf16.msra.mxu0 %v6368_v25  ;;  %4935 = vmatpush3.bf16.msra.mxu1 %v6423_v49 }
 0x7a3   :  { %1867 = vmatmul.mubr.f32.gmra.mrb[24].mxu0 %v6253_v38  ;;  %v2003_v38 = vld [vmem:[#allocation7 + $0x38] sm:$0xff]  ;;  %4936 = vmatprep.subr.bf16.mxu1 %v5735_v48 }
 0x7a4   :  { %1872 = vmatprep.mubr.f32.mxu0 %v5734_v0 }
 0x7a7   :  { %1873 = vmatmul.mubr.f32.gmra.mrb[26].mxu0 %v6297_v28  ;;  %v2006_v28 = vld [vmem:[#allocation7 + $0x50] sm:$0xff] }
 0x7a8   :  { %1878 = vmatprep.mubr.f32.mxu0 %v5734_v0  ;;  %v6372_v27 = vpack.c.bf16 %v2006_v28, %v2003_v38  ;;  %v2019_v38 = vld [vmem:[#allocation7 + $0xb8] sm:$0xff] }
 0x7a9   :  { %v6426_v28 = vpack.c.bf16 %v2019_v38, %v2016_v24 }
 0x7aa   :  { %4900 = vmatprep.subr.bf16.mxu0 %v6372_v27 }
 0x7ab   :  { %1879 = vmatmul.mubr.f32.gmra.mrb[28].mxu0 %v6339_v60  ;;  %4938 = vmatpush3.bf16.msra.mxu1 %v6426_v28 }
 0x7ac   :  { %1884 = vmatprep.mubr.f32.mxu0 %v5734_v0  ;;  %4902 = vmatpush1.bf16.msra.mxu0 %v6374_v22 }
 0x7ad   :  { %4904 = vmatprep.subr.bf16.mxu0 %v6378_v33  ;;  %4939 = vmatprep.subr.bf16.mxu1 %v5735_v48 }
 0x7af   :  { %4941 = vmatpush3.bf16.msra.mxu1 %v6430_v23 }
 0x7b0   :  { %4906 = vmatpush1.bf16.msra.mxu0 %v6380_v45  ;;  %4942 = vmatprep.subr.bf16.mxu1 %v5735_v48 }
 0x7b1   :  { %4908 = vmatprep.subr.bf16.mxu0 %v6384_v56 }
 0x7b3   :  { %4944 = vmatpush3.bf16.msra.mxu1 %v6434_v42 }
 0x7b4   :  { %4910 = vmatpush1.bf16.msra.mxu0 %v6386_v3  ;;  %4945 = vmatprep.subr.bf16.mxu1 %v5735_v48 }
 0x7b5   :  { %4912 = vmatprep.subr.bf16.mxu0 %v6390_v14 }
 0x7b7   :  { %4947 = vmatpush3.bf16.msra.mxu1 %v6438_v61 }
 0x7b8   :  { %4914 = vmatpush1.bf16.msra.mxu0 %v6392_v26  ;;  %4948 = vmatprep.subr.bf16.mxu1 %v5735_v48 }
 0x7b9   :  { %4916 = vmatprep.subr.bf16.mxu0 %v6396_v1 }
 0x7bb   :  { %4950 = vmatpush3.bf16.msra.mxu1 %v6442_v10 }
 0x7bc   :  { %4918 = vmatpush1.bf16.msra.mxu0 %v6398_v35  ;;  %4983 = vmatprep.subr.bf16.mxu1 %v5735_v48 }
 0x7bd   :  { %4920 = vmatprep.subr.bf16.mxu0 %v6402_v47 }
 0x7c0   :  { %4922 = vmatpush1.bf16.msra.mxu0 %v6404_v62 }
 0x7c1   :  { %4924 = vmatprep.subr.bf16.mxu0 %v6411_v7 }
 0x7c4   :  { %4926 = vmatpush1.bf16.msra.mxu0 %v6414_v44 }
 0x7c5   :  { %4952 = vmatprep.subr.bf16.mxu0 %v6366_v59 }
 0x846   :  { %v1616_v19 = vpop.f32.mrb[14].mxu0  ;;  %v1687_v21 = vpop.f32.mrb[22].mxu1 }
 0x847   :  { %v5372_v29 = vadd.f32 %v6061_v4, %v1616_v19  ;;  %v1618_v34 = vpop.f32.mrb[15].mxu0  ;;  %v4050_v30 = vpop.f32.mrb[23].mxu1  ;;  %v1688_v6 = vadd.f32 %v1687_v21, %v6074_v36 }
 0x848   :  { %v5374_v5 = vadd.f32 %v6065_v9, %v1618_v34 }
 0x849   :  { %v3431_v32 = vmul.f32 -1.442695, %v5372_v29 }
 0x84a   :  { %v3432_v41 = vmul.f32 -1.442695, %v5374_v5 }
 0x84b   :  { %5521 = vpow2.f32 %v3431_v32 }
 0x84c   :  { %5523 = vpow2.f32 %v3432_v41 }
 0x855   :  { %v5522_v46 = vpop.eup %5521 }
 0x856   :  { %v1695_v57 = vadd.f32 1.0, %v5522_v46  ;;  %v5524_v58 = vpop.eup %5523 }
 0x857   :  { %v1702_v52 = vadd.f32 1.0, %v5524_v58 }
 0x858   :  { %5525 = vrcp.f32 %v1695_v57 }
 0x859   :  { %5527 = vrcp.f32 %v1702_v52 }
 0x862   :  { %v5526_v20 = vpop.eup %5525 }
 0x863   :  { %v1705_v12 = vmul.f32 %v5526_v20, %v1688_v6  ;;  %v5528_v13 = vpop.eup %5527  ;;  %v6528_v20 = vrot.slane %v1761_v31, %v6036_v37 }
 0x864   :  { %v1708_v36 = vsub.f32 1.0, %v5528_v13  ;;  %v1710_v16 = vmul.f32 %v5528_v13, %v6339_v60  ;;  %v2044_v60 = vld [vmem:[%s6845_s8] sm:$0x7]  ;;  %s3372_s8 = sshll.u32 %s5737_s7, 4  ;;  %s3373_s8 = int_to_ptr.vmem [resolvable:$true] %s3372_s8 }
 0x865   :  { %v1706_v4 = vadd.f32 %v1705_v12, %v6067_v11  ;;  %v2049_v51 = vrot.slane %v2044_v60, %v6046_v50  ;;  %v2053_v8 = vrot.slane %v2044_v60, %v6053_v55  ;;  %v6525_v52 = vrot.slane %v2044_v60, %v6036_v37  ;;  %s5677_s19 = scalar_lea.vmem %s3373_s8, 1024  ;;  %p5682_p11 = scmp.lt.s32.totalorder %s3373_s8, %s3373_s8 }
 0x866   :  { %v6451_v39 = vpop.f32.mrb[24].mxu1  ;;  %p5678_p10 = scmp.ne.s32.totalorder %s3373_s8, %s5677_s19  ;;  %p5683_p12 = scmp.lt.s32.totalorder %s5677_s19, %s5677_s19 }
 0x867   :  { %5529 = vtanh.f32 %v1706_v4  ;;  %v6453_v54 = vpop.f32.mrb[25].mxu1  ;;  %v6518_v21 = vadd.f32 %v2049_v51, %v1766_v40  ;;  %v6520_v34 = vadd.f32 %v2053_v8, %v1770_v63 }
 0x868   :  { %p5684_p13 = por %p5683_p12, %p5682_p11 }
 0x86a   :  { %v6455_v9 = vpop.f32.mrb[26].mxu1  ;;  %p5685_p0 = pnand %p5684_p13, %p5678_p10 }
 0x86b   :  { %v6457_v17 = vpop.f32.mrb[27].mxu1 }
 0x86e   :  { %v6459_v2 = vpop.f32.mrb[28].mxu1 }
 0x86f   :  { %v6461_v24 = vpop.f32.mrb[29].mxu1 }
 0x871   :  { %v5530_v38 = vpop.eup %5529 }
 0x872   :  { %v1709_v15 = vmul.f32 %v5530_v38, %v1708_v36  ;;  %v1958_v36 = vadd.f32 %v6453_v54, %v6528_v20 }
 0x874   :  { %v1711_v11 = vadd.f32 %v1710_v16, %v1709_v15 }
 0x876   :  { %1885 = vmatmul.mubr.f32.gmra.mrb[30].mxu0 %v1711_v11  ;;  %1712 = vst [vmem:[#allocation9] sm:$0xff] %v1711_v11  ;;  %4093 = vmatmul.mubr.f32.gmra.mrb[30].mxu1 %v1711_v11 }
 0x877   :  { %2125 = vmatprep.mubr.f32.mxu0 %v5734_v0  ;;  %4127 = vmatprep.mubr.msk.f32.mxu1 %vm5736_vm1, %v5734_v0 }
 0x87a   :  { %2126 = vmatmul.mubr.f32.vlgmr.msra.gmra.mrb[16].mxu0 %v5734_v0  ;;  %4128 = vmatmul.mubr.f32.vlgmr.msra.gmra.mrb[32].mxu1 %v5734_v0 }
 0x87b   :  { %4954 = vmatpush1.bf16.msra.mxu0 %v6368_v25  ;;  %4985 = vmatpush3.bf16.msra.mxu1 %v6406_v43 }
 0x87c   :  { %4956 = vmatprep.subr.bf16.mxu0 %v6372_v27  ;;  %4986 = vmatprep.subr.bf16.mxu1 %v5735_v48 }
 0x87d   :  { %2287 = vmatprep.mubr.f32.mxu0 %v5734_v0  ;;  %4162 = vmatprep.mubr.msk.f32.mxu1 %vm5736_vm1, %v5734_v0 }
 0x87f   :  { %4958 = vmatpush1.bf16.msra.mxu0 %v6374_v22  ;;  %4988 = vmatpush3.bf16.msra.mxu1 %v6417_v18 }
 0x880   :  { %4960 = vmatprep.subr.bf16.mxu0 %v6378_v33  ;;  %4989 = vmatprep.subr.bf16.mxu1 %v5735_v48 }
 0x883   :  { %4962 = vmatpush1.bf16.msra.mxu0 %v6380_v45  ;;  %4991 = vmatpush3.bf16.msra.mxu1 %v6423_v49 }
 0x884   :  { %4964 = vmatprep.subr.bf16.mxu0 %v6384_v56  ;;  %4992 = vmatprep.subr.bf16.mxu1 %v5735_v48 }
 0x887   :  { %4966 = vmatpush1.bf16.msra.mxu0 %v6386_v3  ;;  %4994 = vmatpush3.bf16.msra.mxu1 %v6426_v28 }
 0x888   :  { %4968 = vmatprep.subr.bf16.mxu0 %v6390_v14  ;;  %4995 = vmatprep.subr.bf16.mxu1 %v5735_v48 }
 0x88b   :  { %4970 = vmatpush1.bf16.msra.mxu0 %v6392_v26  ;;  %4997 = vmatpush3.bf16.msra.mxu1 %v6430_v23 }
 0x88c   :  { %4972 = vmatprep.subr.bf16.mxu0 %v6396_v1  ;;  %4998 = vmatprep.subr.bf16.mxu1 %v5735_v48 }
 0x88f   :  { %4974 = vmatpush1.bf16.msra.mxu0 %v6398_v35  ;;  %5000 = vmatpush3.bf16.msra.mxu1 %v6434_v42 }
 0x890   :  { %4976 = vmatprep.subr.bf16.mxu0 %v6402_v47  ;;  %5001 = vmatprep.subr.bf16.mxu1 %v5735_v48 }
 0x893   :  { %4978 = vmatpush1.bf16.msra.mxu0 %v6404_v62  ;;  %5003 = vmatpush3.bf16.msra.mxu1 %v6438_v61 }
 0x894   :  { %4980 = vmatprep.subr.bf16.mxu0 %v6411_v7  ;;  %5004 = vmatprep.subr.bf16.mxu1 %v5735_v48 }
 0x897   :  { %4982 = vmatpush1.bf16.msra.mxu0 %v6414_v44  ;;  %5006 = vmatpush3.bf16.msra.mxu1 %v6442_v10 }
 0x898   :  { %5008 = vmatprep.subr.bf16.mxu0 %v6366_v59  ;;  %5039 = vmatprep.subr.bf16.mxu1 %v5735_v48 }
 0x949   :  { %v6512_v53 = vpop.f32.mrb[30].mxu1 }
 0x94a   :  { %v6516_v19 = vpop.f32.mrb[31].mxu1 }
 0x94d   :  { %v2127_v29 = vpop.f32.mrb[16].mxu0  ;;  %v2198_v30 = vpop.f32.mrb[32].mxu1 }
 0x94e   :  { %v5376_v32 = vadd.f32 %v6518_v21, %v2127_v29  ;;  %v2129_v5 = vpop.f32.mrb[17].mxu0  ;;  %v4129_v41 = vpop.f32.mrb[33].mxu1  ;;  %v2199_v4 = vadd.f32 %v2198_v30, %v6525_v52 }
 0x94f   :  { %v5378_v50 = vadd.f32 %v6520_v34, %v2129_v5 }
 0x950   :  { %v3433_v46 = vmul.f32 -1.442695, %v5376_v32 }
 0x951   :  { %v3434_v57 = vmul.f32 -1.442695, %v5378_v50 }
 0x952   :  { %5531 = vpow2.f32 %v3433_v46 }
 0x953   :  { %5533 = vpow2.f32 %v3434_v57 }
 0x95c   :  { %v5532_v58 = vpop.eup %5531 }
 0x95d   :  { %v2206_v55 = vadd.f32 1.0, %v5532_v58  ;;  %v5534_v6 = vpop.eup %5533 }
 0x95e   :  { %v2213_v12 = vadd.f32 1.0, %v5534_v6  ;;  %v1963_v6 = vadd.f32 %v6451_v39, %v6528_v20 }
 0x95f   :  { %5535 = vrcp.f32 %v2206_v55 }
 0x960   :  { %5537 = vrcp.f32 %v2213_v12 }
 0x969   :  { %v5536_v13 = vpop.eup %5535 }
 0x96a   :  { %v2216_v38 = vmul.f32 %v5536_v13, %v2199_v4  ;;  %v5538_v16 = vpop.eup %5537 }
 0x96b   :  { %v2219_v11 = vsub.f32 1.0, %v5538_v16  ;;  %v2221_v51 = vmul.f32 0.0, %v5538_v16 }
 0x96c   :  { %v2217_v15 = vadd.f32 %v2216_v38, %v1958_v36 }
 0x96e   :  { %5539 = vtanh.f32 %v2217_v15 }
 0x978   :  { %v5540_v40 = vpop.eup %5539 }
 0x979   :  { %v2220_v60 = vmul.f32 %v5540_v40, %v2219_v11 }
 0x97b   :  { %v6533_v63 = vadd.f32 %v2221_v51, %v2220_v60 }
 0x97d   :  { %2288 = vmatmul.mubr.f32.vlgmr.msra.gmra.mrb[18].mxu0 %v6533_v63  ;;  %3359 = vst [vmem:[#allocation8] sm:$0xff] %v6533_v63  ;;  %4163 = vmatmul.mubr.f32.vlgmr.msra.gmra.mrb[34].mxu1 %v6533_v63 }
 0x97e   :  { %5010 = vmatpush1.bf16.msra.mxu0 %v6368_v25  ;;  %5041 = vmatpush3.bf16.msra.mxu1 %v6406_v43 }
 0x97f   :  { %5012 = vmatprep.subr.bf16.mxu0 %v6372_v27  ;;  %5042 = vmatprep.subr.bf16.mxu1 %v5735_v48 }
 0x980   :  { %2449 = vmatprep.mubr.f32.mxu0 %v5734_v0  ;;  %4197 = vmatprep.mubr.msk.f32.mxu1 %vm5736_vm1, %v5734_v0 }
 0x982   :  { %5014 = vmatpush1.bf16.msra.mxu0 %v6374_v22  ;;  %5044 = vmatpush3.bf16.msra.mxu1 %v6417_v18 }
 0x983   :  { %5016 = vmatprep.subr.bf16.mxu0 %v6378_v33  ;;  %5045 = vmatprep.subr.bf16.mxu1 %v5735_v48 }
 0x986   :  { %5018 = vmatpush1.bf16.msra.mxu0 %v6380_v45  ;;  %5047 = vmatpush3.bf16.msra.mxu1 %v6423_v49 }
 0x987   :  { %5020 = vmatprep.subr.bf16.mxu0 %v6384_v56  ;;  %5048 = vmatprep.subr.bf16.mxu1 %v5735_v48 }
 0x98a   :  { %5022 = vmatpush1.bf16.msra.mxu0 %v6386_v3  ;;  %5050 = vmatpush3.bf16.msra.mxu1 %v6426_v28 }
 0x98b   :  { %5024 = vmatprep.subr.bf16.mxu0 %v6390_v14  ;;  %5051 = vmatprep.subr.bf16.mxu1 %v5735_v48 }
 0x98e   :  { %5026 = vmatpush1.bf16.msra.mxu0 %v6392_v26  ;;  %5053 = vmatpush3.bf16.msra.mxu1 %v6430_v23 }
 0x98f   :  { %5028 = vmatprep.subr.bf16.mxu0 %v6396_v1  ;;  %5054 = vmatprep.subr.bf16.mxu1 %v5735_v48 }
 0x992   :  { %5030 = vmatpush1.bf16.msra.mxu0 %v6398_v35  ;;  %5056 = vmatpush3.bf16.msra.mxu1 %v6434_v42 }
 0x993   :  { %5032 = vmatprep.subr.bf16.mxu0 %v6402_v47  ;;  %5057 = vmatprep.subr.bf16.mxu1 %v5735_v48 }
 0x996   :  { %5034 = vmatpush1.bf16.msra.mxu0 %v6404_v62  ;;  %5059 = vmatpush3.bf16.msra.mxu1 %v6438_v61 }
 0x997   :  { %5036 = vmatprep.subr.bf16.mxu0 %v6411_v7  ;;  %5060 = vmatprep.subr.bf16.mxu1 %v5735_v48 }
 0x99a   :  { %5038 = vmatpush1.bf16.msra.mxu0 %v6414_v44  ;;  %5062 = vmatpush3.bf16.msra.mxu1 %v6442_v10 }
 0x99b   :  { %5064 = vmatprep.subr.bf16.mxu0 %v6366_v59  ;;  %5095 = vmatprep.subr.bf16.mxu1 %v5735_v48 }
 0xa50   :  { %v2289_v37 = vpop.f32.mrb[18].mxu0  ;;  %v2360_v54 = vpop.f32.mrb[34].mxu1 }
 0xa51   :  { %v5380_v31 = vadd.f32 %v6518_v21, %v2289_v37  ;;  %v2291_v8 = vpop.f32.mrb[19].mxu0  ;;  %v4164_v29 = vpop.f32.mrb[35].mxu1  ;;  %v2361_v58 = vadd.f32 %v2360_v54, %v6525_v52 }
 0xa52   :  { %v5382_v32 = vadd.f32 %v6520_v34, %v2291_v8 }
 0xa53   :  { %v3435_v30 = vmul.f32 -1.442695, %v5380_v31 }
 0xa54   :  { %v3436_v5 = vmul.f32 -1.442695, %v5382_v32 }
 0xa55   :  { %5541 = vpow2.f32 %v3435_v30 }
 0xa56   :  { %5543 = vpow2.f32 %v3436_v5 }
 0xa5f   :  { %v5542_v41 = vpop.eup %5541 }
 0xa60   :  { %v2368_v46 = vadd.f32 1.0, %v5542_v41  ;;  %v5544_v50 = vpop.eup %5543 }
 0xa61   :  { %v2375_v57 = vadd.f32 1.0, %v5544_v50 }
 0xa62   :  { %5545 = vrcp.f32 %v2368_v46  ;;  %v1968_v46 = vadd.f32 %v6457_v17, %v6528_v20 }
 0xa63   :  { %5547 = vrcp.f32 %v2375_v57 }
 0xa6c   :  { %v5546_v55 = vpop.eup %5545 }
 0xa6d   :  { %v2378_v12 = vmul.f32 %v5546_v55, %v2361_v58  ;;  %v5548_v13 = vpop.eup %5547 }
 0xa6e   :  { %v2381_v36 = vsub.f32 1.0, %v5548_v13  ;;  %v2383_v16 = vmul.f32 %v5548_v13, %v6533_v63 }
 0xa6f   :  { %v2379_v4 = vadd.f32 %v2378_v12, %v1963_v6 }
 0xa71   :  { %5549 = vtanh.f32 %v2379_v4 }
 0xa7b   :  { %v5550_v38 = vpop.eup %5549 }
 0xa7c   :  { %v2382_v15 = vmul.f32 %v5550_v38, %v2381_v36 }
 0xa7e   :  { %v6579_v11 = vadd.f32 %v2383_v16, %v2382_v15 }
 0xa80   :  { %2450 = vmatmul.mubr.f32.vlgmr.msra.gmra.mrb[20].mxu0 %v6579_v11  ;;  %3360 = vst [vmem:[#allocation8 + $0x8] sm:$0xff] %v6579_v11  ;;  %4198 = vmatmul.mubr.f32.vlgmr.msra.gmra.mrb[36].mxu1 %v6579_v11 }
 0xa81   :  { %5066 = vmatpush1.bf16.msra.mxu0 %v6368_v25  ;;  %5097 = vmatpush3.bf16.msra.mxu1 %v6406_v43 }
 0xa82   :  { %5068 = vmatprep.subr.bf16.mxu0 %v6372_v27  ;;  %5098 = vmatprep.subr.bf16.mxu1 %v5735_v48 }
 0xa83   :  { %2611 = vmatprep.mubr.f32.mxu0 %v5734_v0  ;;  %4232 = vmatprep.mubr.msk.f32.mxu1 %vm5736_vm1, %v5734_v0 }
 0xa85   :  { %5070 = vmatpush1.bf16.msra.mxu0 %v6374_v22  ;;  %5100 = vmatpush3.bf16.msra.mxu1 %v6417_v18 }
 0xa86   :  { %5072 = vmatprep.subr.bf16.mxu0 %v6378_v33  ;;  %5101 = vmatprep.subr.bf16.mxu1 %v5735_v48 }
 0xa89   :  { %5074 = vmatpush1.bf16.msra.mxu0 %v6380_v45  ;;  %5103 = vmatpush3.bf16.msra.mxu1 %v6423_v49 }
 0xa8a   :  { %5076 = vmatprep.subr.bf16.mxu0 %v6384_v56  ;;  %5104 = vmatprep.subr.bf16.mxu1 %v5735_v48 }
 0xa8d   :  { %5078 = vmatpush1.bf16.msra.mxu0 %v6386_v3  ;;  %5106 = vmatpush3.bf16.msra.mxu1 %v6426_v28 }
 0xa8e   :  { %5080 = vmatprep.subr.bf16.mxu0 %v6390_v14  ;;  %5107 = vmatprep.subr.bf16.mxu1 %v5735_v48 }
 0xa91   :  { %5082 = vmatpush1.bf16.msra.mxu0 %v6392_v26  ;;  %5109 = vmatpush3.bf16.msra.mxu1 %v6430_v23 }
 0xa92   :  { %5084 = vmatprep.subr.bf16.mxu0 %v6396_v1  ;;  %5110 = vmatprep.subr.bf16.mxu1 %v5735_v48 }
 0xa95   :  { %5086 = vmatpush1.bf16.msra.mxu0 %v6398_v35  ;;  %5112 = vmatpush3.bf16.msra.mxu1 %v6434_v42 }
 0xa96   :  { %5088 = vmatprep.subr.bf16.mxu0 %v6402_v47  ;;  %5113 = vmatprep.subr.bf16.mxu1 %v5735_v48 }
 0xa99   :  { %5090 = vmatpush1.bf16.msra.mxu0 %v6404_v62  ;;  %5115 = vmatpush3.bf16.msra.mxu1 %v6438_v61 }
 0xa9a   :  { %5092 = vmatprep.subr.bf16.mxu0 %v6411_v7  ;;  %5116 = vmatprep.subr.bf16.mxu1 %v5735_v48 }
 0xa9d   :  { %5094 = vmatpush1.bf16.msra.mxu0 %v6414_v44  ;;  %5118 = vmatpush3.bf16.msra.mxu1 %v6442_v10 }
 0xa9e   :  { %5120 = vmatprep.subr.bf16.mxu0 %v6366_v59  ;;  %5151 = vmatprep.subr.bf16.mxu1 %v5735_v48 }
 0xb53   :  { %v2451_v39 = vpop.f32.mrb[20].mxu0  ;;  %v2522_v40 = vpop.f32.mrb[36].mxu1 }
 0xb54   :  { %v5384_v60 = vadd.f32 %v6518_v21, %v2451_v39  ;;  %v2453_v51 = vpop.f32.mrb[21].mxu0  ;;  %v4199_v63 = vpop.f32.mrb[37].mxu1  ;;  %v2523_v5 = vadd.f32 %v2522_v40, %v6525_v52 }
 0xb55   :  { %v5386_v54 = vadd.f32 %v6520_v34, %v2453_v51 }
 0xb56   :  { %v3437_v37 = vmul.f32 -1.442695, %v5384_v60 }
 0xb57   :  { %v3438_v31 = vmul.f32 -1.442695, %v5386_v54 }
 0xb58   :  { %5551 = vpow2.f32 %v3437_v37 }
 0xb59   :  { %5553 = vpow2.f32 %v3438_v31 }
 0xb62   :  { %v5552_v8 = vpop.eup %5551 }
 0xb63   :  { %v2530_v29 = vadd.f32 1.0, %v5552_v8  ;;  %v5554_v30 = vpop.eup %5553  ;;  %v1973_v8 = vadd.f32 %v6455_v9, %v6528_v20 }
 0xb64   :  { %v2537_v32 = vadd.f32 1.0, %v5554_v30 }
 0xb65   :  { %5555 = vrcp.f32 %v2530_v29 }
 0xb66   :  { %5557 = vrcp.f32 %v2537_v32 }
 0xb6f   :  { %v5556_v41 = vpop.eup %5555 }
 0xb70   :  { %v2540_v50 = vmul.f32 %v5556_v41, %v2523_v5  ;;  %v5558_v58 = vpop.eup %5557 }
 0xb71   :  { %v2543_v55 = vsub.f32 1.0, %v5558_v58  ;;  %v2545_v4 = vmul.f32 %v5558_v58, %v6579_v11 }
 0xb72   :  { %v2541_v57 = vadd.f32 %v2540_v50, %v1968_v46 }
 0xb74   :  { %5559 = vtanh.f32 %v2541_v57 }
 0xb7e   :  { %v5560_v6 = vpop.eup %5559 }
 0xb7f   :  { %v2544_v12 = vmul.f32 %v5560_v6, %v2543_v55 }
 0xb81   :  { %v6625_v13 = vadd.f32 %v2545_v4, %v2544_v12 }
 0xb83   :  { %2612 = vmatmul.mubr.f32.vlgmr.msra.gmra.mrb[22].mxu0 %v6625_v13  ;;  %3361 = vst [vmem:[#allocation8 + $0x10] sm:$0xff] %v6625_v13  ;;  %4233 = vmatmul.mubr.f32.vlgmr.msra.gmra.mrb[38].mxu1 %v6625_v13 }
 0xb84   :  { %5122 = vmatpush1.bf16.msra.mxu0 %v6368_v25  ;;  %5153 = vmatpush3.bf16.msra.mxu1 %v6406_v43 }
 0xb85   :  { %5124 = vmatprep.subr.bf16.mxu0 %v6372_v27  ;;  %5154 = vmatprep.subr.bf16.mxu1 %v5735_v48 }
 0xb86   :  { %2773 = vmatprep.mubr.f32.mxu0 %v5734_v0  ;;  %4267 = vmatprep.mubr.msk.f32.mxu1 %vm5736_vm1, %v5734_v0 }
 0xb88   :  { %5126 = vmatpush1.bf16.msra.mxu0 %v6374_v22  ;;  %5156 = vmatpush3.bf16.msra.mxu1 %v6417_v18 }
 0xb89   :  { %5128 = vmatprep.subr.bf16.mxu0 %v6378_v33  ;;  %5157 = vmatprep.subr.bf16.mxu1 %v5735_v48 }
 0xb8c   :  { %5130 = vmatpush1.bf16.msra.mxu0 %v6380_v45  ;;  %5159 = vmatpush3.bf16.msra.mxu1 %v6423_v49 }
 0xb8d   :  { %5132 = vmatprep.subr.bf16.mxu0 %v6384_v56  ;;  %5160 = vmatprep.subr.bf16.mxu1 %v5735_v48 }
 0xb90   :  { %5134 = vmatpush1.bf16.msra.mxu0 %v6386_v3  ;;  %5162 = vmatpush3.bf16.msra.mxu1 %v6426_v28 }
 0xb91   :  { %5136 = vmatprep.subr.bf16.mxu0 %v6390_v14  ;;  %5163 = vmatprep.subr.bf16.mxu1 %v5735_v48 }
 0xb94   :  { %5138 = vmatpush1.bf16.msra.mxu0 %v6392_v26  ;;  %5165 = vmatpush3.bf16.msra.mxu1 %v6430_v23 }
 0xb95   :  { %5140 = vmatprep.subr.bf16.mxu0 %v6396_v1  ;;  %5166 = vmatprep.subr.bf16.mxu1 %v5735_v48 }
 0xb98   :  { %5142 = vmatpush1.bf16.msra.mxu0 %v6398_v35  ;;  %5168 = vmatpush3.bf16.msra.mxu1 %v6434_v42 }
 0xb99   :  { %5144 = vmatprep.subr.bf16.mxu0 %v6402_v47  ;;  %5169 = vmatprep.subr.bf16.mxu1 %v5735_v48 }
 0xb9c   :  { %5146 = vmatpush1.bf16.msra.mxu0 %v6404_v62  ;;  %5171 = vmatpush3.bf16.msra.mxu1 %v6438_v61 }
 0xb9d   :  { %5148 = vmatprep.subr.bf16.mxu0 %v6411_v7  ;;  %5172 = vmatprep.subr.bf16.mxu1 %v5735_v48 }
 0xba0   :  { %5150 = vmatpush1.bf16.msra.mxu0 %v6414_v44  ;;  %5174 = vmatpush3.bf16.msra.mxu1 %v6442_v10 }
 0xba1   :  { %5176 = vmatprep.subr.bf16.mxu0 %v6366_v59  ;;  %5207 = vmatprep.subr.bf16.mxu1 %v5735_v48 }
 0xc56   :  { %v2613_v17 = vpop.f32.mrb[22].mxu0  ;;  %v2684_v36 = vpop.f32.mrb[38].mxu1 }
 0xc57   :  { %v5388_v38 = vadd.f32 %v6518_v21, %v2613_v17  ;;  %v2615_v15 = vpop.f32.mrb[23].mxu0  ;;  %v4234_v16 = vpop.f32.mrb[39].mxu1  ;;  %v2685_v54 = vadd.f32 %v2684_v36, %v6525_v52 }
 0xc58   :  { %v5390_v39 = vadd.f32 %v6520_v34, %v2615_v15 }
 0xc59   :  { %v3439_v11 = vmul.f32 -1.442695, %v5388_v38 }
 0xc5a   :  { %v3440_v40 = vmul.f32 -1.442695, %v5390_v39 }
 0xc5b   :  { %5561 = vpow2.f32 %v3439_v11 }
 0xc5c   :  { %5563 = vpow2.f32 %v3440_v40  ;;  %v1978_v40 = vadd.f32 %v6461_v24, %v6528_v20 }
 0xc65   :  { %v5562_v60 = vpop.eup %5561 }
 0xc66   :  { %v2692_v51 = vadd.f32 1.0, %v5562_v60  ;;  %v5564_v63 = vpop.eup %5563 }
 0xc67   :  { %v2699_v37 = vadd.f32 1.0, %v5564_v63 }
 0xc68   :  { %5565 = vrcp.f32 %v2692_v51 }
 0xc69   :  { %5567 = vrcp.f32 %v2699_v37 }
 0xc72   :  { %v5566_v31 = vpop.eup %5565 }
 0xc73   :  { %v2702_v29 = vmul.f32 %v5566_v31, %v2685_v54  ;;  %v5568_v32 = vpop.eup %5567 }
 0xc74   :  { %v2705_v5 = vsub.f32 1.0, %v5568_v32  ;;  %v2707_v50 = vmul.f32 %v5568_v32, %v6625_v13 }
 0xc75   :  { %v2703_v30 = vadd.f32 %v2702_v29, %v1973_v8 }
 0xc77   :  { %5569 = vtanh.f32 %v2703_v30 }
 0xc81   :  { %v5570_v41 = vpop.eup %5569 }
 0xc82   :  { %v2706_v46 = vmul.f32 %v5570_v41, %v2705_v5 }
 0xc84   :  { %v6671_v57 = vadd.f32 %v2707_v50, %v2706_v46 }
 0xc86   :  { %2774 = vmatmul.mubr.f32.vlgmr.msra.gmra.mrb[24].mxu0 %v6671_v57  ;;  %3362 = vst [vmem:[#allocation8 + $0x18] sm:$0xff] %v6671_v57  ;;  %4268 = vmatmul.mubr.f32.vlgmr.msra.gmra.mrb[40].mxu1 %v6671_v57 }
 0xc87   :  { %5178 = vmatpush1.bf16.msra.mxu0 %v6368_v25  ;;  %5209 = vmatpush3.bf16.msra.mxu1 %v6406_v43 }
 0xc88   :  { %5180 = vmatprep.subr.bf16.mxu0 %v6372_v27  ;;  %5210 = vmatprep.subr.bf16.mxu1 %v5735_v48 }
 0xc89   :  { %2935 = vmatprep.mubr.f32.mxu0 %v5734_v0  ;;  %4302 = vmatprep.mubr.msk.f32.mxu1 %vm5736_vm1, %v5734_v0 }
 0xc8b   :  { %5182 = vmatpush1.bf16.msra.mxu0 %v6374_v22  ;;  %5212 = vmatpush3.bf16.msra.mxu1 %v6417_v18 }
 0xc8c   :  { %5184 = vmatprep.subr.bf16.mxu0 %v6378_v33  ;;  %5213 = vmatprep.subr.bf16.mxu1 %v5735_v48 }
 0xc8f   :  { %5186 = vmatpush1.bf16.msra.mxu0 %v6380_v45  ;;  %5215 = vmatpush3.bf16.msra.mxu1 %v6423_v49 }
 0xc90   :  { %5188 = vmatprep.subr.bf16.mxu0 %v6384_v56  ;;  %5216 = vmatprep.subr.bf16.mxu1 %v5735_v48 }
 0xc93   :  { %5190 = vmatpush1.bf16.msra.mxu0 %v6386_v3  ;;  %5218 = vmatpush3.bf16.msra.mxu1 %v6426_v28 }
 0xc94   :  { %5192 = vmatprep.subr.bf16.mxu0 %v6390_v14  ;;  %5219 = vmatprep.subr.bf16.mxu1 %v5735_v48 }
 0xc97   :  { %5194 = vmatpush1.bf16.msra.mxu0 %v6392_v26  ;;  %5221 = vmatpush3.bf16.msra.mxu1 %v6430_v23 }
 0xc98   :  { %5196 = vmatprep.subr.bf16.mxu0 %v6396_v1  ;;  %5222 = vmatprep.subr.bf16.mxu1 %v5735_v48 }
 0xc9b   :  { %5198 = vmatpush1.bf16.msra.mxu0 %v6398_v35  ;;  %5224 = vmatpush3.bf16.msra.mxu1 %v6434_v42 }
 0xc9c   :  { %5200 = vmatprep.subr.bf16.mxu0 %v6402_v47  ;;  %5225 = vmatprep.subr.bf16.mxu1 %v5735_v48 }
 0xc9f   :  { %5202 = vmatpush1.bf16.msra.mxu0 %v6404_v62  ;;  %5227 = vmatpush3.bf16.msra.mxu1 %v6438_v61 }
 0xca0   :  { %5204 = vmatprep.subr.bf16.mxu0 %v6411_v7  ;;  %5228 = vmatprep.subr.bf16.mxu1 %v5735_v48 }
 0xca3   :  { %5206 = vmatpush1.bf16.msra.mxu0 %v6414_v44  ;;  %5230 = vmatpush3.bf16.msra.mxu1 %v6442_v10 }
 0xca4   :  { %5232 = vmatprep.subr.bf16.mxu0 %v6366_v59  ;;  %5263 = vmatprep.subr.bf16.mxu1 %v5735_v48 }
 0xd59   :  { %v2775_v9 = vpop.f32.mrb[24].mxu0  ;;  %v2846_v58 = vpop.f32.mrb[40].mxu1 }
 0xd5a   :  { %v5392_v55 = vadd.f32 %v6518_v21, %v2775_v9  ;;  %v2777_v6 = vpop.f32.mrb[25].mxu0  ;;  %v4269_v12 = vpop.f32.mrb[41].mxu1  ;;  %v2847_v11 = vadd.f32 %v2846_v58, %v6525_v52 }
 0xd5b   :  { %v5394_v13 = vadd.f32 %v6520_v34, %v2777_v6 }
 0xd5c   :  { %v3441_v4 = vmul.f32 -1.442695, %v5392_v55 }
 0xd5d   :  { %v3442_v17 = vmul.f32 -1.442695, %v5394_v13 }
 0xd5e   :  { %5571 = vpow2.f32 %v3441_v4  ;;  %v1983_v4 = vadd.f32 %v6459_v2, %v6528_v20 }
 0xd5f   :  { %5573 = vpow2.f32 %v3442_v17 }
 0xd68   :  { %v5572_v36 = vpop.eup %5571 }
 0xd69   :  { %v2854_v38 = vadd.f32 1.0, %v5572_v36  ;;  %v5574_v15 = vpop.eup %5573 }
 0xd6a   :  { %v2861_v16 = vadd.f32 1.0, %v5574_v15 }
 0xd6b   :  { %5575 = vrcp.f32 %v2854_v38 }
 0xd6c   :  { %5577 = vrcp.f32 %v2861_v16 }
 0xd75   :  { %v5576_v39 = vpop.eup %5575 }
 0xd76   :  { %v2864_v60 = vmul.f32 %v5576_v39, %v2847_v11  ;;  %v5578_v63 = vpop.eup %5577 }
 0xd77   :  { %v2867_v37 = vsub.f32 1.0, %v5578_v63  ;;  %v2869_v8 = vmul.f32 %v5578_v63, %v6671_v57 }
 0xd78   :  { %v2865_v51 = vadd.f32 %v2864_v60, %v1978_v40 }
 0xd7a   :  { %5579 = vtanh.f32 %v2865_v51 }
 0xd84   :  { %v5580_v54 = vpop.eup %5579 }
 0xd85   :  { %v2868_v31 = vmul.f32 %v5580_v54, %v2867_v37 }
 0xd87   :  { %v6717_v29 = vadd.f32 %v2869_v8, %v2868_v31 }
 0xd89   :  { %2936 = vmatmul.mubr.f32.vlgmr.msra.gmra.mrb[26].mxu0 %v6717_v29  ;;  %3363 = vst [vmem:[#allocation8 + $0x20] sm:$0xff] %v6717_v29  ;;  %4303 = vmatmul.mubr.f32.vlgmr.msra.gmra.mrb[42].mxu1 %v6717_v29 }
 0xd8a   :  { %5234 = vmatpush1.bf16.msra.mxu0 %v6368_v25  ;;  %5265 = vmatpush3.bf16.msra.mxu1 %v6406_v43 }
 0xd8b   :  { %5236 = vmatprep.subr.bf16.mxu0 %v6372_v27  ;;  %5266 = vmatprep.subr.bf16.mxu1 %v5735_v48 }
 0xd8c   :  { %3097 = vmatprep.mubr.f32.mxu0 %v5734_v0  ;;  %4337 = vmatprep.mubr.msk.f32.mxu1 %vm5736_vm1, %v5734_v0 }
 0xd8e   :  { %5238 = vmatpush1.bf16.msra.mxu0 %v6374_v22  ;;  %5268 = vmatpush3.bf16.msra.mxu1 %v6417_v18 }
 0xd8f   :  { %5240 = vmatprep.subr.bf16.mxu0 %v6378_v33  ;;  %5269 = vmatprep.subr.bf16.mxu1 %v5735_v48 }
 0xd92   :  { %5242 = vmatpush1.bf16.msra.mxu0 %v6380_v45  ;;  %5271 = vmatpush3.bf16.msra.mxu1 %v6423_v49 }
 0xd93   :  { %5244 = vmatprep.subr.bf16.mxu0 %v6384_v56  ;;  %5272 = vmatprep.subr.bf16.mxu1 %v5735_v48 }
 0xd96   :  { %5246 = vmatpush1.bf16.msra.mxu0 %v6386_v3  ;;  %5274 = vmatpush3.bf16.msra.mxu1 %v6426_v28 }
 0xd97   :  { %5248 = vmatprep.subr.bf16.mxu0 %v6390_v14  ;;  %5275 = vmatprep.subr.bf16.mxu1 %v5735_v48 }
 0xd9a   :  { %5250 = vmatpush1.bf16.msra.mxu0 %v6392_v26  ;;  %5277 = vmatpush3.bf16.msra.mxu1 %v6430_v23 }
 0xd9b   :  { %5252 = vmatprep.subr.bf16.mxu0 %v6396_v1  ;;  %5278 = vmatprep.subr.bf16.mxu1 %v5735_v48 }
 0xd9e   :  { %5254 = vmatpush1.bf16.msra.mxu0 %v6398_v35  ;;  %5280 = vmatpush3.bf16.msra.mxu1 %v6434_v42 }
 0xd9f   :  { %5256 = vmatprep.subr.bf16.mxu0 %v6402_v47  ;;  %5281 = vmatprep.subr.bf16.mxu1 %v5735_v48 }
 0xda2   :  { %5258 = vmatpush1.bf16.msra.mxu0 %v6404_v62  ;;  %5283 = vmatpush3.bf16.msra.mxu1 %v6438_v61 }
 0xda3   :  { %5260 = vmatprep.subr.bf16.mxu0 %v6411_v7  ;;  %5284 = vmatprep.subr.bf16.mxu1 %v5735_v48 }
 0xda6   :  { %5262 = vmatpush1.bf16.msra.mxu0 %v6414_v44  ;;  %5286 = vmatpush3.bf16.msra.mxu1 %v6442_v10 }
 0xda7   :  { %5288 = vmatprep.subr.bf16.mxu0 %v6366_v59  ;;  %5319 = vmatprep.subr.bf16.mxu1 %v5735_v48 }
 0xe5c   :  { %v2937_v24 = vpop.f32.mrb[26].mxu0  ;;  %v3008_v30 = vpop.f32.mrb[42].mxu1 }
 0xe5d   :  { %v5396_v32 = vadd.f32 %v6518_v21, %v2937_v24  ;;  %v2939_v5 = vpop.f32.mrb[27].mxu0  ;;  %v4304_v41 = vpop.f32.mrb[43].mxu1  ;;  %v3009_v59 = vadd.f32 %v3008_v30, %v6525_v52  ;;  %v1993_v30 = vadd.f32 %v6512_v53, %v6528_v20 }
 0xe5e   :  { %v5398_v50 = vadd.f32 %v6520_v34, %v2939_v5 }
 0xe5f   :  { %v3443_v46 = vmul.f32 -1.442695, %v5396_v32 }
 0xe60   :  { %v3444_v57 = vmul.f32 -1.442695, %v5398_v50 }
 0xe61   :  { %5581 = vpow2.f32 %v3443_v46 }
 0xe62   :  { %5583 = vpow2.f32 %v3444_v57 }
 0xe6b   :  { %v5582_v9 = vpop.eup %5581 }
 0xe6c   :  { %v3016_v58 = vadd.f32 1.0, %v5582_v9  ;;  %v5584_v55 = vpop.eup %5583 }
 0xe6d   :  { %v3023_v6 = vadd.f32 1.0, %v5584_v55 }
 0xe6e   :  { %5585 = vrcp.f32 %v3016_v58 }
 0xe6f   :  { %5587 = vrcp.f32 %v3023_v6 }
 0xe78   :  { %v5586_v12 = vpop.eup %5585 }
 0xe79   :  { %v3026_v13 = vmul.f32 %v5586_v12, %v3009_v59  ;;  %v5588_v36 = vpop.eup %5587 }
 0xe7a   :  { %v3029_v38 = vsub.f32 1.0, %v5588_v36  ;;  %v3031_v11 = vmul.f32 %v5588_v36, %v6717_v29 }
 0xe7b   :  { %v3027_v17 = vadd.f32 %v3026_v13, %v1983_v4 }
 0xe7d   :  { %5589 = vtanh.f32 %v3027_v17 }
 0xe87   :  { %v5590_v15 = vpop.eup %5589 }
 0xe88   :  { %v3030_v16 = vmul.f32 %v5590_v15, %v3029_v38 }
 0xe8a   :  { %v3032_v39 = vadd.f32 %v3031_v11, %v3030_v16 }
 0xe8c   :  { %3098 = vmatmul.mubr.f32.vlgmr.msra.gmra.mrb[28].mxu0 %v3032_v39  ;;  %3364 = vst [vmem:[#allocation8 + $0x28] sm:$0xff] %v3032_v39  ;;  %4338 = vmatmul.mubr.f32.vlgmr.msra.gmra.mrb[44].mxu1 %v3032_v39 }
 0xe8d   :  { %5290 = vmatpush1.bf16.msra.mxu0 %v6368_v25  ;;  %5321 = vmatpush3.bf16.msra.mxu1 %v6406_v43 }
 0xe8e   :  { %5292 = vmatprep.subr.bf16.mxu0 %v6372_v27  ;;  %5322 = vmatprep.subr.bf16.mxu1 %v5735_v48 }
 0xe8f   :  { %3259 = vmatprep.mubr.f32.mxu0 %v5734_v0  ;;  %4372 = vmatprep.mubr.msk.f32.mxu1 %vm5736_vm1, %v5734_v0 }
 0xe91   :  { %5294 = vmatpush1.bf16.msra.mxu0 %v6374_v22  ;;  %5324 = vmatpush3.bf16.msra.mxu1 %v6417_v18 }
 0xe92   :  { %5296 = vmatprep.subr.bf16.mxu0 %v6378_v33  ;;  %5325 = vmatprep.subr.bf16.mxu1 %v5735_v48 }
 0xe95   :  { %5298 = vmatpush1.bf16.msra.mxu0 %v6380_v45  ;;  %5327 = vmatpush3.bf16.msra.mxu1 %v6423_v49 }
 0xe96   :  { %5300 = vmatprep.subr.bf16.mxu0 %v6384_v56  ;;  %5328 = vmatprep.subr.bf16.mxu1 %v5735_v48 }
 0xe99   :  { %5302 = vmatpush1.bf16.msra.mxu0 %v6386_v3  ;;  %5330 = vmatpush3.bf16.msra.mxu1 %v6426_v28 }
 0xe9a   :  { %5304 = vmatprep.subr.bf16.mxu0 %v6390_v14  ;;  %5331 = vmatprep.subr.bf16.mxu1 %v5735_v48 }
 0xe9d   :  { %5306 = vmatpush1.bf16.msra.mxu0 %v6392_v26  ;;  %5333 = vmatpush3.bf16.msra.mxu1 %v6430_v23 }
 0xe9e   :  { %5308 = vmatprep.subr.bf16.mxu0 %v6396_v1  ;;  %5334 = vmatprep.subr.bf16.mxu1 %v5735_v48 }
 0xea1   :  { %5310 = vmatpush1.bf16.msra.mxu0 %v6398_v35  ;;  %5336 = vmatpush3.bf16.msra.mxu1 %v6434_v42 }
 0xea2   :  { %5312 = vmatprep.subr.bf16.mxu0 %v6402_v47  ;;  %5337 = vmatprep.subr.bf16.mxu1 %v5735_v48 }
 0xea5   :  { %5314 = vmatpush1.bf16.msra.mxu0 %v6404_v62  ;;  %5339 = vmatpush3.bf16.msra.mxu1 %v6438_v61  ;;  %v1988_v62 = vadd.f32 %v6516_v19, %v6528_v20 }
 0xea6   :  { %5316 = vmatprep.subr.bf16.mxu0 %v6411_v7  ;;  %5340 = vmatprep.subr.bf16.mxu1 %v5735_v48 }
 0xea9   :  { %5318 = vmatpush1.bf16.msra.mxu0 %v6414_v44  ;;  %5342 = vmatpush3.bf16.msra.mxu1 %v6442_v10 }
 0xf5f   :  { %v3099_v0 = vpop.f32.mrb[28].mxu0  ;;  %v3170_v25 = vpop.f32.mrb[44].mxu1 }
 0xf60   :  { %v5400_v27 = vadd.f32 %v6518_v21, %v3099_v0  ;;  %v3101_v22 = vpop.f32.mrb[29].mxu0  ;;  %v4339_v33 = vpop.f32.mrb[45].mxu1  ;;  %v3171_v35 = vadd.f32 %v3170_v25, %v6525_v52 }
 0xf61   :  { %v5402_v56 = vadd.f32 %v6520_v34, %v3101_v22 }
 0xf62   :  { %v3445_v45 = vmul.f32 -1.442695, %v5400_v27 }
 0xf63   :  { %v3446_v3 = vmul.f32 -1.442695, %v5402_v56 }
 0xf64   :  { %5591 = vpow2.f32 %v3445_v45 }
 0xf65   :  { %5593 = vpow2.f32 %v3446_v3 }
 0xf6e   :  { %v5592_v14 = vpop.eup %5591 }
 0xf6f   :  { %v3178_v26 = vadd.f32 1.0, %v5592_v14  ;;  %v5594_v48 = vpop.eup %5593 }
 0xf70   :  { %v3185_v1 = vadd.f32 1.0, %v5594_v48 }
 0xf71   :  { %5595 = vrcp.f32 %v3178_v26 }
 0xf72   :  { %5597 = vrcp.f32 %v3185_v1 }
 0xf7b   :  { %v5596_v47 = vpop.eup %5595 }
 0xf7c   :  { %v3188_v43 = vmul.f32 %v5596_v47, %v3171_v35  ;;  %v5598_v44 = vpop.eup %5597 }
 0xf7d   :  { %v3191_v18 = vsub.f32 1.0, %v5598_v44  ;;  %v3193_v23 = vmul.f32 %v5598_v44, %v3032_v39 }
 0xf7e   :  { %v3189_v7 = vadd.f32 %v3188_v43, %v1988_v62 }
 0xf80   :  { %5599 = vtanh.f32 %v3189_v7 }
 0xf8a   :  { %v5600_v49 = vpop.eup %5599 }
 0xf8b   :  { %v3192_v28 = vmul.f32 %v5600_v49, %v3191_v18 }
 0xf8d   :  { %v3194_v42 = vadd.f32 %v3193_v23, %v3192_v28 }
 0xf8f   :  { %3260 = vmatmul.mubr.f32.vlgmr.msra.gmra.mrb[30].mxu0 %v3194_v42  ;;  %3365 = vst [vmem:[#allocation8 + $0x30] sm:$0xff] %v3194_v42  ;;  %4373 = vmatmul.mubr.f32.vlgmr.msra.gmra.mrb[46].mxu1 %v3194_v42 }
0x1062   :  { %v3261_v61 = vpop.f32.mrb[30].mxu0  ;;  %v3332_v10 = vpop.f32.mrb[46].mxu1 }
0x1063   :  { %v5404_v2 = vadd.f32 %v6518_v21, %v3261_v61  ;;  %v3263_v40 = vpop.f32.mrb[31].mxu0  ;;  %v4374_v60 = vpop.f32.mrb[47].mxu1  ;;  %v3333_v29 = vadd.f32 %v3332_v10, %v6525_v52 }
0x1064   :  { %v5406_v51 = vadd.f32 %v6520_v34, %v3263_v40 }
0x1065   :  { %v3447_v19 = vmul.f32 -1.442695, %v5404_v2 }
0x1066   :  { %v3448_v63 = vmul.f32 -1.442695, %v5406_v51 }
0x1067   :  { %5601 = vpow2.f32 %v3447_v19 }
0x1068   :  { %5603 = vpow2.f32 %v3448_v63 }
0x1071   :  { %v5602_v37 = vpop.eup %5601 }
0x1072   :  { %v3340_v54 = vadd.f32 1.0, %v5602_v37  ;;  %v5604_v31 = vpop.eup %5603 }
0x1073   :  { %v3347_v8 = vadd.f32 1.0, %v5604_v31 }
0x1074   :  { %5605 = vrcp.f32 %v3340_v54 }
0x1075   :  { %5607 = vrcp.f32 %v3347_v8 }
0x107e   :  { %v5606_v24 = vpop.eup %5605 }
0x107f   :  { %v3350_v21 = vmul.f32 %v5606_v24, %v3333_v29  ;;  %v5608_v5 = vpop.eup %5607 }
0x1080   :  { %v3353_v34 = vsub.f32 1.0, %v5608_v5  ;;  %v3355_v50 = vmul.f32 %v5608_v5, %v3194_v42 }
0x1081   :  { %v3351_v32 = vadd.f32 %v3350_v21, %v1993_v30 }
0x1083   :  { %5609 = vtanh.f32 %v3351_v32 }
0x108d   :  { %v5610_v41 = vpop.eup %5609 }
0x108e   :  { %v3354_v46 = vmul.f32 %v5610_v41, %v3353_v34 }
0x1090   :  { %v3356_v57 = vadd.f32 %v3355_v50, %v3354_v46 }
0x1092   :  { %3366 = vst [vmem:[#allocation8 + $0x38] sm:$0xff] %v3356_v57  ;;  %3358 = vst [vmem:[#allocation9 + $0x8] sm:$0xff] %v3356_v57 }
0x1093   :  { %5688 = shalt.err (!%p5685_p0)
}
0x1094   :  { %s5689_s22 = scalar_lea.hbm %s6846_s9, 1024 }
0x1095   :  { %p5690_p1 = scmp.ne.s32.totalorder %s6846_s9, %s5689_s22  ;;  %p5693_p2 = scmp.lt.u32.totalorder %s5689_s22, %s6846_s9 }
0x1097   :  { %p5695_p3 = pnand %p5693_p2, %p5690_p1 }
0x1099   :  { %5698 = shalt.err (!%p5695_p3)
}
0x109a   :  { %s5739_s28 = smov 128   ;;  %s5740_s29 = smov 8  }
0x109b   :  { %3378 = dma.vmem_to_hbm [thread:$0]  %s3373_s8, 1024, %s6846_s9, [#allocation4], %s5739_s28, %s5739_s28, %s5740_s29  }
0x109c   :  { %s5699_s16 = scalar_lea.vmem %s6806_s14, 256  ;;  %p5704_p5 = scmp.lt.s32.totalorder %s6806_s14, %s6806_s14 }
0x109d   :  { %p5700_p4 = scmp.ne.s32.totalorder %s6806_s14, %s5699_s16  ;;  %p5705_p6 = scmp.lt.s32.totalorder %s5699_s16, %s5699_s16 }
0x109f   :  { %p5706_p7 = por %p5705_p6, %p5704_p5 }
0x10a1   :  { %p5707_p8 = pnand %p5706_p7, %p5700_p4 }
0x10a3   :  { %5710 = shalt.err (!%p5707_p8)
}
0x10a4   :  { %s5711_s13 = scalar_lea.hbm %s6847_s10, 256 }
0x10a5   :  { %p5712_p9 = scmp.ne.s32.totalorder %s6847_s10, %s5711_s13  ;;  %p5715_p10 = scmp.lt.u32.totalorder %s5711_s13, %s6847_s10 }
0x10a7   :  { %p5717_p11 = pnand %p5715_p10, %p5712_p9 }
0x10a9   :  { %5720 = shalt.err (!%p5717_p11)
}
0x10aa   :  { %3390 = dma.vmem_to_hbm [thread:$0]  %s6806_s14, 256, %s6847_s10, [#allocation10], %s5739_s28, %s5739_s28, %s5740_s29  }
0x10ab   :  { %5725 = dma.done.wait [#allocation4], 1024  }
0x10ac   :  { %5726 = vsyncadd [#allocation4], 4294966272 }
0x10ad   :  { %5727 = dma.done.wait [#allocation10], 256  }
0x10ae   :  { %5728 = vsyncadd [#allocation10], 4294967040 }
0x10af   :  { %3397 = vsyncpa [#allocation3], 1 }
0x10b0   :  { %3398 = vsyncpa [#allocation6], 1 }
0x10b1   :  { %3399 = vsyncpa [#allocation4], 1 }
0x10b2   :  { %3400 = vsyncpa [#allocation10], 1 }

</bundles_post_ra>
